<compile_context>
chip_gen: v7x
topology: tpu7x:2x2x1
jax: 0.10.0
libtpu: 0.0.40
codegen_flags: <defaults>
</compile_context>

<pallas_src>
import jax
import jax.numpy as jnp
from jax.experimental import pallas as pl
from jax.experimental.pallas import tpu as pltpu

LEAKY_SLOPE = 0.3   # nn.LeakyReLU(0.3)
LANE = 128          # TPU lane width; channel dims are zero-padded to this.


# ------------------------------ small helpers --------------------------------

def _pad_axis(a, axis, mult=LANE):
    """Zero-pad `axis` of `a` up to a multiple of `mult`."""
    extra = (-a.shape[axis]) % mult
    if extra == 0:
        return a
    widths = [(0, 0)] * a.ndim
    widths[axis] = (0, extra)
    return jnp.pad(a, widths)


def _periodic_pad(x, p):
    """PeriodicPadding2D on NHWC: circular wrap along W, zero pad along H."""
    if p == 0:
        return x
    xw = jnp.concatenate([x[:, :, -p:, :], x, x[:, :, :p, :]], axis=2)
    return jnp.pad(xw, ((0, 0), (p, p), (0, 0), (0, 0)))


def _pick_row_tile(H, W, target_rows=512):
    """Largest divisor TH of H with TH*W <= target_rows and TH*W % 8 == 0."""
    best = None
    for th in range(1, H + 1):
        if H % th == 0 and th * W <= target_rows and (th * W) % 8 == 0:
            best = th
    if best is None:
        if W % 8 == 0:
            best = 1
        else:
            raise ValueError(f"cannot pick a row tile for H={H}, W={W}")
    return best


# --------------------------- fused conv Pallas kernel -------------------------

def periodic_conv_fused(x, w, b, *, ksize, pad,
                        scale=None, shift=None, residual=None,
                        post_scale=None, post_shift=None,
                        out_dtype=jnp.bfloat16):
    """One PeriodicConv2D as a single fused Pallas kernel.

    Per output tile (rows = a group of image rows, lanes = channels):
        acc = sum_{kh,kw} x_pad[.., +kh, +kw, :] @ w[kh, kw]     (MXU, f32 acc)
        z   = acc + b
        z   = BN(LeakyReLU(z))            if scale/shift given
        z   = z + residual                if residual given (identity shortcut)
        z   = LeakyReLU(BN(z))            if post_scale/post_shift given (head)

    x: (N, H, W, Cp) bf16, channels padded to a multiple of 128.
    w: (k, k, Cp, Co) bf16.    b / scale / shift / post_*: (1, Co) f32.
    residual: (N, H, W, Co) bf16 or None.
    Returns (N, H, W, Co) in `out_dtype`.
    """
    N, H, W, Cp = x.shape
    k = ksize
    Co = w.shape[-1]
    assert w.shape == (k, k, Cp, Co)
    assert k == 2 * pad + 1, "kernel implements 'same' periodic convolutions"
    if residual is not None:
        assert residual.shape == (N, H, W, Co)

    xp = _periodic_pad(x, pad)                       # (N, Hp, Wp, Cp)
    Hp, Wp = xp.shape[1], xp.shape[2]

    TH = _pick_row_tile(H, W)                        # image-row tile
    HT = H // TH
    TM = TH * W                                      # output rows per tile

    with_bn = scale is not None
    with_res = residual is not None
    with_post = post_scale is not None

    def kernel(*refs):
        x_ref, w_ref, b_ref = refs[0], refs[1], refs[2]
        i = 3
        if with_bn:
            s_ref, t_ref = refs[i], refs[i + 1]
            i += 2
        if with_res:
            r_ref = refs[i]
            i += 1
        if with_post:
            ps_ref, pt_ref = refs[i], refs[i + 1]
            i += 2
        o_ref, acc_ref = refs[i], refs[i + 1]

        ht = pl.program_id(1)
        kh = pl.program_id(2)            # reduction axis over kernel-row taps

        @pl.when(kh == 0)
        def _():
            acc_ref[...] = jnp.zeros_like(acc_ref)

        row0 = ht * TH + kh
        for kw in range(k):              # static tap loop along W
            xt = x_ref[0, pl.ds(row0, TH), pl.ds(kw, W), :]      # (TH, W, Cp)
            xt = xt.reshape(TM, Cp)
            acc_ref[...] += jnp.dot(xt, w_ref[kh, kw],
                                    preferred_element_type=jnp.float32)

        @pl.when(kh == k - 1)
        def _():
            z = acc_ref[...] + b_ref[...]
            if with_bn:
                z = jnp.where(z >= 0, z, LEAKY_SLOPE * z)        # LeakyReLU(0.3)
                z = z * s_ref[...] + t_ref[...]                  # BatchNorm (eval)
            if with_res:
                z = z + r_ref[...].astype(jnp.float32)           # identity shortcut
            if with_post:
                z = z * ps_ref[...] + pt_ref[...]                # head BatchNorm
                z = jnp.where(z >= 0, z, LEAKY_SLOPE * z)        # head LeakyReLU
            o_ref[...] = z.astype(o_ref.dtype)

    chan_spec = pl.BlockSpec((1, Co), lambda n, ht, kh: (0, 0))

    def row_spec():
        return pl.BlockSpec((TM, Co), lambda n, ht, kh: (n * HT + ht, 0))

    inputs = [xp, w, b]
    in_specs = [
        # whole padded image, resident across (ht, kh) steps of the same n
        pl.BlockSpec((1, Hp, Wp, Cp), lambda n, ht, kh: (n, 0, 0, 0)),
        # full conv weight, VMEM-resident for the whole grid
        pl.BlockSpec((k, k, Cp, Co), lambda n, ht, kh: (0, 0, 0, 0)),
        chan_spec,                                   # bias
    ]
    if with_bn:
        inputs += [scale, shift]
        in_specs += [chan_spec, chan_spec]
    if with_res:
        inputs.append(residual.reshape(N * H * W, Co))
        in_specs.append(row_spec())
    if with_post:
        inputs += [post_scale, post_shift]
        in_specs += [chan_spec, chan_spec]

    out = pl.pallas_call(
        kernel,
        out_shape=jax.ShapeDtypeStruct((N * H * W, Co), out_dtype),
        grid_spec=pltpu.PrefetchScalarGridSpec(
            num_scalar_prefetch=0,
            grid=(N, HT, k),
            in_specs=in_specs,
            out_specs=row_spec(),
            scratch_shapes=[pltpu.VMEM((TM, Co), jnp.float32)],
        ),
        compiler_params=pltpu.CompilerParams(
            dimension_semantics=("parallel", "parallel", "arbitrary"),
            vmem_limit_bytes=32 * 1024 * 1024,
        ),
    )(*inputs)
    return out.reshape(N, H, W, Co)


# --------------------------- parameter construction ---------------------------

def _init_conv(key, cin, cout, k):
    """Kaiming-uniform-like init; weight (k,k,cin,cout) padded to lane width, bf16."""
    kw_key, kb_key = jax.random.split(key)
    fan_in = cin * k * k
    bound = 1.0 / (fan_in ** 0.5)
    w = jax.random.uniform(kw_key, (k, k, cin, cout), jnp.float32, -bound, bound)
    b = jax.random.uniform(kb_key, (cout,), jnp.float32, -bound, bound)
    w = _pad_axis(_pad_axis(w, 2), 3).astype(jnp.bfloat16)   # pad cin, cout
    b = _pad_axis(b, 0).reshape(1, -1)                       # stays f32
    return w, b


def _init_bn(key, c, eps=1e-5):
    """BatchNorm2d (eval): fold gamma/beta/running stats into scale+shift (f32)."""
    kg, kb, km, kv = jax.random.split(key, 4)
    gamma = 1.0 + 0.1 * jax.random.normal(kg, (c,), jnp.float32)
    beta = 0.1 * jax.random.normal(kb, (c,), jnp.float32)
    mean = 0.1 * jax.random.normal(km, (c,), jnp.float32)
    var = jnp.abs(1.0 + 0.1 * jax.random.normal(kv, (c,), jnp.float32))
    s = gamma / jnp.sqrt(var + eps)
    t = beta - mean * s
    # padded lanes get scale=0 / shift=0 so they stay exactly zero.
    return _pad_axis(s, 0).reshape(1, -1), _pad_axis(t, 0).reshape(1, -1)


def init_resnet_params(key, in_channels, hidden, out_channels, n_blocks,
                       time_history=1, time_future=1):
    keys = jax.random.split(key, 3 + n_blocks)
    params = {}
    params['proj_w'], params['proj_b'] = _init_conv(
        keys[0], time_history * in_channels, hidden, 7)       # image_proj (k=7)
    blocks = []
    for i in range(n_blocks):
        bk = jax.random.split(keys[2 + i], 4)
        w1, b1 = _init_conv(bk[0], hidden, hidden, 3)
        s1, t1 = _init_bn(bk[1], hidden)
        w2, b2 = _init_conv(bk[2], hidden, hidden, 3)
        s2, t2 = _init_bn(bk[3], hidden)
        blocks.append(dict(w1=w1, b1=b1, s1=s1, t1=t1, w2=w2, b2=b2, s2=s2, t2=t2))
    params['blocks'] = blocks
    kn, kf = jax.random.split(keys[1])
    params['s_out'], params['t_out'] = _init_bn(kn, hidden)   # self.norm
    params['final_w'], params['final_b'] = _init_conv(
        kf, hidden, time_future * out_channels, 7)            # self.final (k=7)
    params['out_ch'] = time_future * out_channels
    return params


# ------------------------------- model forward --------------------------------

def resnet_predict(params, x, region_info):
    if x.ndim == 5:   # flatten(1, 2): (N, T, C, H, W) -> (N, T*C, H, W)
        x = x.reshape(x.shape[0], x.shape[1] * x.shape[2], x.shape[3], x.shape[4])
    min_h, max_h = region_info['min_h'], region_info['max_h']
    min_w, max_w = region_info['min_w'], region_info['max_w']
    x = x[:, :, min_h:max_h + 1, min_w:max_w + 1]
    x = jnp.transpose(x, (0, 2, 3, 1)).astype(jnp.float32)    # NCHW -> NHWC
    x = _pad_axis(x, 3).astype(jnp.bfloat16)                  # lane-pad channels

    # image_proj: conv + bias only (activation is applied inside blocks / head).
    h = periodic_conv_fused(x, params['proj_w'], params['proj_b'], ksize=7, pad=3)

    n_blocks = len(params['blocks'])
    for i, blk in enumerate(params['blocks']):
        res = h
        # conv1 -> LeakyReLU -> BN   (dropout = identity in eval)
        c1 = periodic_conv_fused(h, blk['w1'], blk['b1'], ksize=3, pad=1,
                                 scale=blk['s1'], shift=blk['t1'])
        # conv2 -> LeakyReLU -> BN -> + residual; on the last block the head's
        # BN -> LeakyReLU is fused into the same epilogue (no extra HBM pass).
        is_last = i == n_blocks - 1
        h = periodic_conv_fused(
            c1, blk['w2'], blk['b2'], ksize=3, pad=1,
            scale=blk['s2'], shift=blk['t2'], residual=res,
            post_scale=params['s_out'] if is_last else None,
            post_shift=params['t_out'] if is_last else None)

    if n_blocks == 0:
        # No conv epilogue to fuse the head norm+act into; plain-JAX fallback.
        hf = h.astype(jnp.float32) * params['s_out'] + params['t_out']
        h = jnp.where(hf >= 0, hf, LEAKY_SLOPE * hf).astype(jnp.bfloat16)

    # final = PeriodicConv2D(activation(norm(h)))  (norm/act already applied above)
    out = periodic_conv_fused(h, params['final_w'], params['final_b'],
                              ksize=7, pad=3, out_dtype=jnp.float32)
    out = out[:, :, :, :params['out_ch']]                     # drop padded lanes
    return jnp.transpose(out, (0, 3, 1, 2))                   # NHWC -> NCHW


def resnet_forward(params, x, y, out_variables, region_info, metric, lat):
    pred = resnet_predict(params, x, region_info)
    min_h, max_h = region_info['min_h'], region_info['max_h']
    min_w, max_w = region_info['min_w'], region_info['max_w']
    y_r = y[:, :, min_h:max_h + 1, min_w:max_w + 1]
    lat_r = lat[min_h:max_h + 1]
    # metric callables are caller-provided (as in the PyTorch forward).
    return [m(pred, y_r, out_variables, lat_r) for m in metric], x


# ------------------------------------ main -------------------------------------

if __name__ == "__main__":
    key = jax.random.PRNGKey(0)
    N, Cin, H, W = 2, 3, 16, 16
    hidden, n_blocks = 32, 2

    kp, kx, ky = jax.random.split(key, 3)
    params = init_resnet_params(kp, in_channels=Cin, hidden=hidden,
                                out_channels=Cin, n_blocks=n_blocks)

    x = jax.random.normal(kx, (N, Cin, H, W), jnp.float32)
    y = jax.random.normal(ky, (N, Cin, H, W), jnp.float32)
    lat = jnp.linspace(-88.0, 88.0, H)
    region_info = {'min_h': 0, 'max_h': H - 1, 'min_w': 0, 'max_w': W - 1}

    def lat_weighted_mse(pred, y_t, out_variables, lat_t):
        wlat = jnp.cos(jnp.deg2rad(lat_t))
        wlat = wlat / jnp.mean(wlat)
        return jnp.mean(((pred - y_t) ** 2) * wlat[None, None, :, None])

    metrics, x_out = resnet_forward(params, x, y, ["v0", "v1", "v2"],
                                    region_info, [lat_weighted_mse], lat)
    pred = resnet_predict(params, x, region_info)
    jax.block_until_ready(pred)
    jax.block_until_ready(metrics[0])
    assert pred.shape == (N, Cin, H, W)
    assert x_out.shape == x.shape
    print("KERNEL_OK")
</pallas_src>

<mosaic_0001>
module attributes {stable_mosaic.version = 11 : i64} {
  func.func @kernel(%arg0: i32, %arg1: i32, %arg2: i32, %arg3: memref<1x22x22x128xbf16, #tpu.memory_space<vmem>>, %arg4: memref<7x7x128x128xbf16, #tpu.memory_space<vmem>>, %arg5: memref<1x128xf32, #tpu.memory_space<vmem>>, %arg6: memref<256x128xbf16, #tpu.memory_space<vmem>>, %arg7: memref<256x128xf32, #tpu.memory_space<vmem>>) attributes {dimension_semantics = [#tpu.dimension_semantics<parallel>, #tpu.dimension_semantics<parallel>, #tpu.dimension_semantics<arbitrary>], iteration_bounds = array<i64: 2, 1, 7>, scalar_prefetch = 0 : i64, scratch_operands = 1 : i64, tpu.core_type = #tpu.core_type<tc>, window_params = [{transform_indices = @transform_0, window_bounds = array<i64: 1, 22, 22, 128>}, {pipeline_mode = #tpu.pipeline_mode<synchronous>, transform_indices = @transform_1, window_bounds = array<i64: 7, 7, 128, 128>}, {pipeline_mode = #tpu.pipeline_mode<synchronous>, transform_indices = @transform_2, window_bounds = array<i64: 1, 128>}, {transform_indices = @transform_3, window_bounds = array<i64: 256, 128>}]} {
    %c0_i32 = arith.constant 0 : i32
    %0 = arith.cmpi eq, %arg2, %c0_i32 : i32
    %1 = arith.extui %0 : i1 to i32
    %c0_i32_0 = arith.constant 0 : i32
    %2 = arith.cmpi ne, %1, %c0_i32_0 : i32
    scf.if %2 {
      %cst_71 = arith.constant 0.000000e+00 : f32
      %85 = vector.broadcast %cst_71 : f32 to vector<256x128xf32>
      %c0_72 = arith.constant 0 : index
      %c0_73 = arith.constant 0 : index
      %86 = vector.load %arg7[%c0_72, %c0_73] : memref<256x128xf32, #tpu.memory_space<vmem>>, vector<256x128xf32>
      tpu.vector_store %arg7[%c0_72, %c0_73], %85 {strides = array<i32>} : memref<256x128xf32, #tpu.memory_space<vmem>>, vector<256x128xf32>,
    } else {
    }
    %c16_i32 = arith.constant 16 : i32
    %3 = arith.muli %arg1, %c16_i32 : i32
    %4 = arith.addi %3, %arg2 : i32
    %c0 = arith.constant 0 : index
    %5 = arith.index_cast %4 : i32 to index
    %c0_1 = arith.constant 0 : index
    %c0_2 = arith.constant 0 : index
    %6 = vector.load %arg3[%c0, %5, %c0_1, %c0_2] : memref<1x22x22x128xbf16, #tpu.memory_space<vmem>>, vector<1x16x16x128xbf16>
    %7 = vector.shape_cast %6 : vector<1x16x16x128xbf16> to vector<16x16x128xbf16>
    %8 = vector.shape_cast %7 : vector<16x16x128xbf16> to vector<256x128xbf16>
    %c0_3 = arith.constant 0 : index
    %c0_4 = arith.constant 0 : index
    %9 = vector.load %arg7[%c0_3, %c0_4] : memref<256x128xf32, #tpu.memory_space<vmem>>, vector<256x128xf32>
    %10 = arith.index_cast %arg2 : i32 to index
    %c0_5 = arith.constant 0 : index
    %c0_6 = arith.constant 0 : index
    %c0_7 = arith.constant 0 : index
    %11 = vector.load %arg4[%10, %c0_5, %c0_6, %c0_7] : memref<7x7x128x128xbf16, #tpu.memory_space<vmem>>, vector<1x1x128x128xbf16>
    %12 = vector.shape_cast %11 : vector<1x1x128x128xbf16> to vector<128x128xbf16>
    %cst = arith.constant dense<0.000000e+00> : vector<256x128xf32>
    %13 = tpu.matmul %8, %12, %cst {dimension_numbers = #tpu.dot_dimension_numbers<[1], [0], [0], [1], [0, 0, 1, 1], [], []>} : vector<256x128xbf16>, vector<128x128xbf16>, vector<256x128xf32> -> vector<256x128xf32>
    %14 = arith.addf %9, %13 : vector<256x128xf32>
    %c0_8 = arith.constant 0 : index
    %c0_9 = arith.constant 0 : index
    %15 = vector.load %arg7[%c0_8, %c0_9] : memref<256x128xf32, #tpu.memory_space<vmem>>, vector<256x128xf32>
    tpu.vector_store %arg7[%c0_8, %c0_9], %14 {strides = array<i32>} : memref<256x128xf32, #tpu.memory_space<vmem>>, vector<256x128xf32>,
    %c0_10 = arith.constant 0 : index
    %16 = arith.index_cast %4 : i32 to index
    %c1 = arith.constant 1 : index
    %c0_11 = arith.constant 0 : index
    %17 = vector.load %arg3[%c0_10, %16, %c1, %c0_11] : memref<1x22x22x128xbf16, #tpu.memory_space<vmem>>, vector<1x16x16x128xbf16>
    %18 = vector.shape_cast %17 : vector<1x16x16x128xbf16> to vector<16x16x128xbf16>
    %19 = vector.shape_cast %18 : vector<16x16x128xbf16> to vector<256x128xbf16>
    %c0_12 = arith.constant 0 : index
    %c0_13 = arith.constant 0 : index
    %20 = vector.load %arg7[%c0_12, %c0_13] : memref<256x128xf32, #tpu.memory_space<vmem>>, vector<256x128xf32>
    %21 = arith.index_cast %arg2 : i32 to index
    %c1_14 = arith.constant 1 : index
    %c0_15 = arith.constant 0 : index
    %c0_16 = arith.constant 0 : index
    %22 = vector.load %arg4[%21, %c1_14, %c0_15, %c0_16] : memref<7x7x128x128xbf16, #tpu.memory_space<vmem>>, vector<1x1x128x128xbf16>
    %23 = vector.shape_cast %22 : vector<1x1x128x128xbf16> to vector<128x128xbf16>
    %cst_17 = arith.constant dense<0.000000e+00> : vector<256x128xf32>
    %24 = tpu.matmul %19, %23, %cst_17 {dimension_numbers = #tpu.dot_dimension_numbers<[1], [0], [0], [1], [0, 0, 1, 1], [], []>} : vector<256x128xbf16>, vector<128x128xbf16>, vector<256x128xf32> -> vector<256x128xf32>
    %25 = arith.addf %20, %24 : vector<256x128xf32>
    %c0_18 = arith.constant 0 : index
    %c0_19 = arith.constant 0 : index
    %26 = vector.load %arg7[%c0_18, %c0_19] : memref<256x128xf32, #tpu.memory_space<vmem>>, vector<256x128xf32>
    tpu.vector_store %arg7[%c0_18, %c0_19], %25 {strides = array<i32>} : memref<256x128xf32, #tpu.memory_space<vmem>>, vector<256x128xf32>,
    %c0_20 = arith.constant 0 : index
    %27 = arith.index_cast %4 : i32 to index
    %c2 = arith.constant 2 : index
    %c0_21 = arith.constant 0 : index
    %28 = vector.load %arg3[%c0_20, %27, %c2, %c0_21] : memref<1x22x22x128xbf16, #tpu.memory_space<vmem>>, vector<1x16x16x128xbf16>
    %29 = vector.shape_cast %28 : vector<1x16x16x128xbf16> to vector<16x16x128xbf16>
    %30 = vector.shape_cast %29 : vector<16x16x128xbf16> to vector<256x128xbf16>
    %c0_22 = arith.constant 0 : index
    %c0_23 = arith.constant 0 : index
    %31 = vector.load %arg7[%c0_22, %c0_23] : memref<256x128xf32, #tpu.memory_space<vmem>>, vector<256x128xf32>
    %32 = arith.index_cast %arg2 : i32 to index
    %c2_24 = arith.constant 2 : index
    %c0_25 = arith.constant 0 : index
    %c0_26 = arith.constant 0 : index
    %33 = vector.load %arg4[%32, %c2_24, %c0_25, %c0_26] : memref<7x7x128x128xbf16, #tpu.memory_space<vmem>>, vector<1x1x128x128xbf16>
    %34 = vector.shape_cast %33 : vector<1x1x128x128xbf16> to vector<128x128xbf16>
    %cst_27 = arith.constant dense<0.000000e+00> : vector<256x128xf32>
    %35 = tpu.matmul %30, %34, %cst_27 {dimension_numbers = #tpu.dot_dimension_numbers<[1], [0], [0], [1], [0, 0, 1, 1], [], []>} : vector<256x128xbf16>, vector<128x128xbf16>, vector<256x128xf32> -> vector<256x128xf32>
    %36 = arith.addf %31, %35 : vector<256x128xf32>
    %c0_28 = arith.constant 0 : index
    %c0_29 = arith.constant 0 : index
    %37 = vector.load %arg7[%c0_28, %c0_29] : memref<256x128xf32, #tpu.memory_space<vmem>>, vector<256x128xf32>
    tpu.vector_store %arg7[%c0_28, %c0_29], %36 {strides = array<i32>} : memref<256x128xf32, #tpu.memory_space<vmem>>, vector<256x128xf32>,
    %c0_30 = arith.constant 0 : index
    %38 = arith.index_cast %4 : i32 to index
    %c3 = arith.constant 3 : index
    %c0_31 = arith.constant 0 : index
    %39 = vector.load %arg3[%c0_30, %38, %c3, %c0_31] : memref<1x22x22x128xbf16, #tpu.memory_space<vmem>>, vector<1x16x16x128xbf16>
    %40 = vector.shape_cast %39 : vector<1x16x16x128xbf16> to vector<16x16x128xbf16>
    %41 = vector.shape_cast %40 : vector<16x16x128xbf16> to vector<256x128xbf16>
    %c0_32 = arith.constant 0 : index
    %c0_33 = arith.constant 0 : index
    %42 = vector.load %arg7[%c0_32, %c0_33] : memref<256x128xf32, #tpu.memory_space<vmem>>, vector<256x128xf32>
    %43 = arith.index_cast %arg2 : i32 to index
    %c3_34 = arith.constant 3 : index
    %c0_35 = arith.constant 0 : index
    %c0_36 = arith.constant 0 : index
    %44 = vector.load %arg4[%43, %c3_34, %c0_35, %c0_36] : memref<7x7x128x128xbf16, #tpu.memory_space<vmem>>, vector<1x1x128x128xbf16>
    %45 = vector.shape_cast %44 : vector<1x1x128x128xbf16> to vector<128x128xbf16>
    %cst_37 = arith.constant dense<0.000000e+00> : vector<256x128xf32>
    %46 = tpu.matmul %41, %45, %cst_37 {dimension_numbers = #tpu.dot_dimension_numbers<[1], [0], [0], [1], [0, 0, 1, 1], [], []>} : vector<256x128xbf16>, vector<128x128xbf16>, vector<256x128xf32> -> vector<256x128xf32>
    %47 = arith.addf %42, %46 : vector<256x128xf32>
    %c0_38 = arith.constant 0 : index
    %c0_39 = arith.constant 0 : index
    %48 = vector.load %arg7[%c0_38, %c0_39] : memref<256x128xf32, #tpu.memory_space<vmem>>, vector<256x128xf32>
    tpu.vector_store %arg7[%c0_38, %c0_39], %47 {strides = array<i32>} : memref<256x128xf32, #tpu.memory_space<vmem>>, vector<256x128xf32>,
    %c0_40 = arith.constant 0 : index
    %49 = arith.index_cast %4 : i32 to index
    %c4 = arith.constant 4 : index
    %c0_41 = arith.constant 0 : index
    %50 = vector.load %arg3[%c0_40, %49, %c4, %c0_41] : memref<1x22x22x128xbf16, #tpu.memory_space<vmem>>, vector<1x16x16x128xbf16>
    %51 = vector.shape_cast %50 : vector<1x16x16x128xbf16> to vector<16x16x128xbf16>
    %52 = vector.shape_cast %51 : vector<16x16x128xbf16> to vector<256x128xbf16>
    %c0_42 = arith.constant 0 : index
    %c0_43 = arith.constant 0 : index
    %53 = vector.load %arg7[%c0_42, %c0_43] : memref<256x128xf32, #tpu.memory_space<vmem>>, vector<256x128xf32>
    %54 = arith.index_cast %arg2 : i32 to index
    %c4_44 = arith.constant 4 : index
    %c0_45 = arith.constant 0 : index
    %c0_46 = arith.constant 0 : index
    %55 = vector.load %arg4[%54, %c4_44, %c0_45, %c0_46] : memref<7x7x128x128xbf16, #tpu.memory_space<vmem>>, vector<1x1x128x128xbf16>
    %56 = vector.shape_cast %55 : vector<1x1x128x128xbf16> to vector<128x128xbf16>
    %cst_47 = arith.constant dense<0.000000e+00> : vector<256x128xf32>
    %57 = tpu.matmul %52, %56, %cst_47 {dimension_numbers = #tpu.dot_dimension_numbers<[1], [0], [0], [1], [0, 0, 1, 1], [], []>} : vector<256x128xbf16>, vector<128x128xbf16>, vector<256x128xf32> -> vector<256x128xf32>
    %58 = arith.addf %53, %57 : vector<256x128xf32>
    %c0_48 = arith.constant 0 : index
    %c0_49 = arith.constant 0 : index
    %59 = vector.load %arg7[%c0_48, %c0_49] : memref<256x128xf32, #tpu.memory_space<vmem>>, vector<256x128xf32>
    tpu.vector_store %arg7[%c0_48, %c0_49], %58 {strides = array<i32>} : memref<256x128xf32, #tpu.memory_space<vmem>>, vector<256x128xf32>,
    %c0_50 = arith.constant 0 : index
    %60 = arith.index_cast %4 : i32 to index
    %c5 = arith.constant 5 : index
    %c0_51 = arith.constant 0 : index
    %61 = vector.load %arg3[%c0_50, %60, %c5, %c0_51] : memref<1x22x22x128xbf16, #tpu.memory_space<vmem>>, vector<1x16x16x128xbf16>
    %62 = vector.shape_cast %61 : vector<1x16x16x128xbf16> to vector<16x16x128xbf16>
    %63 = vector.shape_cast %62 : vector<16x16x128xbf16> to vector<256x128xbf16>
    %c0_52 = arith.constant 0 : index
    %c0_53 = arith.constant 0 : index
    %64 = vector.load %arg7[%c0_52, %c0_53] : memref<256x128xf32, #tpu.memory_space<vmem>>, vector<256x128xf32>
    %65 = arith.index_cast %arg2 : i32 to index
    %c5_54 = arith.constant 5 : index
    %c0_55 = arith.constant 0 : index
    %c0_56 = arith.constant 0 : index
    %66 = vector.load %arg4[%65, %c5_54, %c0_55, %c0_56] : memref<7x7x128x128xbf16, #tpu.memory_space<vmem>>, vector<1x1x128x128xbf16>
    %67 = vector.shape_cast %66 : vector<1x1x128x128xbf16> to vector<128x128xbf16>
    %cst_57 = arith.constant dense<0.000000e+00> : vector<256x128xf32>
    %68 = tpu.matmul %63, %67, %cst_57 {dimension_numbers = #tpu.dot_dimension_numbers<[1], [0], [0], [1], [0, 0, 1, 1], [], []>} : vector<256x128xbf16>, vector<128x128xbf16>, vector<256x128xf32> -> vector<256x128xf32>
    %69 = arith.addf %64, %68 : vector<256x128xf32>
    %c0_58 = arith.constant 0 : index
    %c0_59 = arith.constant 0 : index
    %70 = vector.load %arg7[%c0_58, %c0_59] : memref<256x128xf32, #tpu.memory_space<vmem>>, vector<256x128xf32>
    tpu.vector_store %arg7[%c0_58, %c0_59], %69 {strides = array<i32>} : memref<256x128xf32, #tpu.memory_space<vmem>>, vector<256x128xf32>,
    %c0_60 = arith.constant 0 : index
    %71 = arith.index_cast %4 : i32 to index
    %c6 = arith.constant 6 : index
    %c0_61 = arith.constant 0 : index
    %72 = vector.load %arg3[%c0_60, %71, %c6, %c0_61] : memref<1x22x22x128xbf16, #tpu.memory_space<vmem>>, vector<1x16x16x128xbf16>
    %73 = vector.shape_cast %72 : vector<1x16x16x128xbf16> to vector<16x16x128xbf16>
    %74 = vector.shape_cast %73 : vector<16x16x128xbf16> to vector<256x128xbf16>
    %c0_62 = arith.constant 0 : index
    %c0_63 = arith.constant 0 : index
    %75 = vector.load %arg7[%c0_62, %c0_63] : memref<256x128xf32, #tpu.memory_space<vmem>>, vector<256x128xf32>
    %76 = arith.index_cast %arg2 : i32 to index
    %c6_64 = arith.constant 6 : index
    %c0_65 = arith.constant 0 : index
    %c0_66 = arith.constant 0 : index
    %77 = vector.load %arg4[%76, %c6_64, %c0_65, %c0_66] : memref<7x7x128x128xbf16, #tpu.memory_space<vmem>>, vector<1x1x128x128xbf16>
    %78 = vector.shape_cast %77 : vector<1x1x128x128xbf16> to vector<128x128xbf16>
    %cst_67 = arith.constant dense<0.000000e+00> : vector<256x128xf32>
    %79 = tpu.matmul %74, %78, %cst_67 {dimension_numbers = #tpu.dot_dimension_numbers<[1], [0], [0], [1], [0, 0, 1, 1], [], []>} : vector<256x128xbf16>, vector<128x128xbf16>, vector<256x128xf32> -> vector<256x128xf32>
    %80 = arith.addf %75, %79 : vector<256x128xf32>
    %c0_68 = arith.constant 0 : index
    %c0_69 = arith.constant 0 : index
    %81 = vector.load %arg7[%c0_68, %c0_69] : memref<256x128xf32, #tpu.memory_space<vmem>>, vector<256x128xf32>
    tpu.vector_store %arg7[%c0_68, %c0_69], %80 {strides = array<i32>} : memref<256x128xf32, #tpu.memory_space<vmem>>, vector<256x128xf32>,
    %c6_i32 = arith.constant 6 : i32
    %82 = arith.cmpi eq, %arg2, %c6_i32 : i32
    %83 = arith.extui %82 : i1 to i32
    %c0_i32_70 = arith.constant 0 : i32
    %84 = arith.cmpi ne, %83, %c0_i32_70 : i32
    scf.if %84 {
      %c0_71 = arith.constant 0 : index
      %c0_72 = arith.constant 0 : index
      %85 = vector.load %arg7[%c0_71, %c0_72] : memref<256x128xf32, #tpu.memory_space<vmem>>, vector<256x128xf32>
      %c0_73 = arith.constant 0 : index
      %c0_74 = arith.constant 0 : index
      %86 = vector.load %arg5[%c0_73, %c0_74] : memref<1x128xf32, #tpu.memory_space<vmem>>, vector<1x128xf32>
      %87 = vector.broadcast %86 : vector<1x128xf32> to vector<256x128xf32>
      %88 = arith.addf %85, %87 : vector<256x128xf32>
      %89 = arith.truncf %88 : vector<256x128xf32> to vector<256x128xbf16>
      %c0_75 = arith.constant 0 : index
      %c0_76 = arith.constant 0 : index
      %90 = vector.load %arg6[%c0_75, %c0_76] : memref<256x128xbf16, #tpu.memory_space<vmem>>, vector<256x128xbf16>
      tpu.vector_store %arg6[%c0_75, %c0_76], %89 {strides = array<i32>} : memref<256x128xbf16, #tpu.memory_space<vmem>>, vector<256x128xbf16>,
    } else {
    }
    return
  }
  func.func @transform_0(%arg0: i32, %arg1: i32, %arg2: i32) -> (i32, i32, i32, i32) {
    %c0_i32 = arith.constant 0 : i32
    %c0_i32_0 = arith.constant 0 : i32
    %c0_i32_1 = arith.constant 0 : i32
    %c0_i32_2 = arith.constant 0 : i32
    return %arg0, %c0_i32, %c0_i32_0, %c0_i32_1 : i32, i32, i32, i32
  }
  func.func @transform_1(%arg0: i32, %arg1: i32, %arg2: i32) -> (i32, i32, i32, i32) {
    %c0_i32 = arith.constant 0 : i32
    %c0_i32_0 = arith.constant 0 : i32
    %c0_i32_1 = arith.constant 0 : i32
    %c0_i32_2 = arith.constant 0 : i32
    %c0_i32_3 = arith.constant 0 : i32
    return %c0_i32, %c0_i32_0, %c0_i32_1, %c0_i32_2 : i32, i32, i32, i32
  }
  func.func @transform_2(%arg0: i32, %arg1: i32, %arg2: i32) -> (i32, i32) {
    %c0_i32 = arith.constant 0 : i32
    %c0_i32_0 = arith.constant 0 : i32
    %c0_i32_1 = arith.constant 0 : i32
    return %c0_i32, %c0_i32_0 : i32, i32
  }
  func.func @transform_3(%arg0: i32, %arg1: i32, %arg2: i32) -> (i32, i32) {
    %c1_i32 = arith.constant 1 : i32
    %0 = arith.muli %arg0, %c1_i32 : i32
    %1 = arith.addi %0, %arg1 : i32
    %c0_i32 = arith.constant 0 : i32
    %c0_i32_0 = arith.constant 0 : i32
    return %1, %c0_i32 : i32, i32
  }
}

</mosaic_0001>

<bundles_post_ra>
// kernel: tpu_custom_call.1
= control target key start
LH: loop header
LB: loop body
LE: loop exit
PB: predicated region body
PF: predicated region fallthrough
CT: control target
= control target key end

     0   :  { %8 = vsyncpa [#allocation4], 0  ;;  %s8311_s0 = inlined_call_operand.vmem [shape: bf16[2,22,22,128], index: 0, kind: input, shape index: {}]   ;;  %s8312_s1 = inlined_call_operand.hbm [shape: bf16[7,7,128,128], index: 1, kind: input, shape index: {}]   ;;  %s8313_s2 = inlined_call_operand.hbm [shape: f32[1,128], index: 2, kind: input, shape index: {}]   ;;  %s8314_s3 = inlined_call_operand.hbm [shape: bf16[512,128], index: 3, kind: output, shape index: {}]  }
   0x1   :  { %9 = vsyncpa [#allocation7], 0 }
   0x2   :  { %10 = vsyncpa [#allocation5], 0 }
   0x3   :  { %12 = vsyncpa [#allocation5 + $0x1], 0  ;;  %s7226_s12 = smov 0   ;;  %s7228_s13 = smov 0  }
   0x4   :  { %s7230_s14 = smov 0   ;;  %s7232_s15 = smov 0  }
   0x5   :  { %s7234_s16 = smov 0   ;;  %s7236_s17 = smov 0  }
   0x6   :  { %s7238_s18 = smov 0   ;;  %s7240_s19 = smov 0  }
   0x7 LB: > { %8321 = sst [smem:[#allocation12_spill]] %s7192_s18  ;;  %s5487_s20 = sadd.s32 4294967295, %s7196_s19   ;;  %s7196_s19 = sphi %s7240_s19, %s18_s19   ;;  %s7192_s18 = sphi %s7238_s18, %s8347_s18   ;;  %s7188_s17 = sphi %s7236_s17, %s8352_s17   ;;  %s7184_s16 = sphi %s7234_s16, %s8345_s16   ;;  %s7180_s15 = sphi %s7232_s15, %s8351_s15   ;;  %s7176_s14 = sphi %s7230_s14, %s8350_s14   ;;  %s7172_s13 = sphi %s7228_s13, %s8349_s13   ;;  %s7168_s12 = sphi %s7226_s12, %s8348_s12  }
   0x8   : > { %s5488_s21 = sadd.s32 4294967294, %s7196_s19   ;;  %s30_s22 = sadd.s32 1, %s7188_s17 }
   0x9   : > { %s37_s23 = sadd.s32 1, %s7192_s18  ;;  %p31_p0 = scmp.ge.s32.totalorder %s30_s22, 7 }
   0xa   : > { %s114_s24 = sadd.s32 1, %s7176_s14  ;;  %p124_p1 = scmp.ne.s32.totalorder %s7176_s14, %s7172_s13 }
   0xb   : > { %p125_p2 = scmp.eq.s32.totalorder %s5487_s20, 13  ;;  %s8354_s22 = smov (%p31_p0, %s30_s22), 0 }
   0xc   : > { %8322 = sst [smem:[#allocation13_spill]] %s8354_s22  ;;  %s8356_s23 = smov (!%p31_p0, %s37_s23), %s7192_s18 }
   0xd   : > { %p7276_p3 = por %p125_p2, %p124_p1  ;;  %p130_p4 = scmp.ne.s32.totalorder %s7172_s13, %s7168_s12 }
   0xe   : > { %p39_p5 = scmp.ge.s32.totalorder %s8356_s23, 2  ;;  %p131_p6 = scmp.eq.s32.totalorder %s5488_s21, 13 }
   0xf   : > { %s8323_s25 = scalar_select %p7276_p3, 1, 0 }
  0x10   : > { %p5489_p7 = scmp.ge.s32.totalorder %s7196_s19, 1  ;;  %p138_p8 = scmp.lt.s32.totalorder %s7196_s19, 15 }
  0x11   : > { %s8358_s23 = smov (%p39_p5, %s8356_s23), 0  ;;  %p7286_p9 = por %p131_p6, %p130_p4 }
  0x12   : > { %8324 = sst [smem:[#allocation14_spill]] %s8358_s23  ;;  %p7290_p10 = pnand %p5489_p7, %p138_p8 }
  0x13   : > { %s8325_s26 = scalar_select %p7286_p9, 1, 0 }
  0x14   : > { %s8326_s27 = scalar_select %p7290_p10, 1, 0 }
  0x15   : > { %s111_s28 = ssub.s32 %s7192_s18, %s8358_s23  ;;  %p6871_p12 = pneg %p7290_p10 }
  0x16   : > { %p112_p11 = scmp.eq.s32.totalorder %s111_s28, 0  ;;  %p7298_p13 = scmp.eq.s32.totalorder %s5487_s20, 0 }
  0x17   : > { %s7198_s4 = smov [#allocation3]   ;;  %s7038_s9 = scalar_lea.hbm %s8312_s1, 50176 }
  0x18   : > { %s8327_s29 = scalar_select %p7298_p13, 1, 0 }
  0x19   : > { %s7303_s30 = scalar_select %p112_p11, %s7176_s14, %s114_s24  }
  0x1a   : > { %s150_s5 = sshll.u32 %s7198_s4, 4  ;;  %p7307_p0 = pnand %p7298_p13, %p6871_p12  ;;  %s151_s5 = int_to_ptr.vmem [resolvable:$true] %s150_s5 }
  0x1b   : > { %p7039_p1 = scmp.ne.s32.totalorder %s8312_s1, %s7038_s9  ;;  %p7045_p6 = scmp.lt.u32.totalorder %s7038_s9, %s8312_s1 }
  0x1c   : > { %p7040_p2 = pneg %p7307_p0 }
  0x1e   : > { %p7041_p4 = pnand %p7040_p2, %p7039_p1 }
  0x20   : > { %p7042_p5 = pneg %p7041_p4 }
  0x22   : > { %p7047_p7 = pnand %p7045_p6, %p7042_p5 }
  0x24   : > { %7050 = shalt.err (!%p7047_p7)
}
  0x25   : > { %s7051_s24 = scalar_lea.vmem %s151_s5, 50176  ;;  %p7059_p9 = scmp.lt.s32.totalorder %s151_s5, %s151_s5 }
  0x26   : > { %p7052_p8 = scmp.ne.s32.totalorder %s151_s5, %s7051_s24  ;;  %p7060_p3 = scmp.lt.s32.totalorder %s7051_s24, %s7051_s24 }
  0x28   : > { %p7054_p11 = pnand %p7052_p8, %p7040_p2  ;;  %p7061_p13 = por %p7060_p3, %p7059_p9 }
  0x2a   : > { %p7055_p12 = pneg %p7054_p11 }
  0x2c   : > { %p7062_p10 = pnand %p7061_p13, %p7055_p12 }
  0x2e   : > { %7065 = shalt.err (!%p7062_p10)
}
  0x2f   : > { %s7199_s28 = smov 64   ;;  %s7200_s4 = smov 4  }
  0x30   : > { %6874 = dma.hbm_to_vmem [thread:$0]  (!%p7307_p0), %s8312_s1, 50176, %s151_s5, [#allocation4], %s7199_s28, %s7199_s28, %s7200_s4  }
  0x31   : > { %s7201_s9 = smov [#allocation6]   ;;  %s7066_s21 = scalar_lea.hbm %s8313_s2, 16 }
  0x32   : > { %s164_s10 = sshll.u32 %s7201_s9, 4  ;;  %p7067_p3 = scmp.ne.s32.totalorder %s8313_s2, %s7066_s21  ;;  %s165_s10 = int_to_ptr.vmem [resolvable:$true] %s164_s10 }
  0x33   : > { %p7073_p13 = scmp.lt.u32.totalorder %s7066_s21, %s8313_s2 }
  0x34   : > { %p7069_p9 = pnand %p7067_p3, %p7040_p2 }
  0x36   : > { %p7070_p10 = pneg %p7069_p9 }
  0x38   : > { %p7075_p1 = pnand %p7073_p13, %p7070_p10 }
  0x3a   : > { %7078 = shalt.err (!%p7075_p1)
}
  0x3b   : > { %s7079_s5 = scalar_lea.vmem %s165_s10, 16  ;;  %s7086_s28 = scalar_lea.vmem %s165_s10, 32 }
  0x3c   : > { %p7080_p4 = scmp.ne.s32.totalorder %s165_s10, %s7079_s5  ;;  %p7087_p7 = scmp.lt.s32.totalorder %s165_s10, %s165_s10 }
  0x3d   : > { %p7088_p8 = scmp.lt.s32.totalorder %s7086_s28, %s7079_s5 }
  0x3e   : > { %p7082_p5 = pnand %p7080_p4, %p7040_p2 }
  0x3f   : > { %p7089_p11 = por %p7088_p8, %p7087_p7 }
  0x40   : > { %p7083_p6 = pneg %p7082_p5 }
  0x42   : > { %p7090_p12 = pnand %p7089_p11, %p7083_p6 }
  0x44   : > { %7093 = shalt.err (!%p7090_p12)
}
  0x45   : > { %6877 = dma.hbm_to_vmem [thread:$0]  (!%p7307_p0), %s8313_s2, 16, %s165_s10, [#allocation7]  }
  0x46   : > { %p8329_p3 = scmp.ne.s32.totalorder %s8326_s27, 0 }
  0x47   : > { %p8330_p9 = scmp.ne.s32.totalorder (!%p8329_p3), %s8327_s29, 0 }
  0x48   : > { %185 = sbr.rel (%p8329_p3) target bundleno = 694 (0x2b6), region = 32 }
  0x4f   : > { %7155 = dma.done.wait (%p8330_p9), [#allocation4], 50176  }
  0x50   : > { %7157 = vsyncadd (%p8330_p9), [#allocation4], 4294917120 }
  0x51   : > { %7159 = dma.done.wait (%p8330_p9), [#allocation7], 16  }
  0x52   : > { %7161 = vsyncadd (%p8330_p9), [#allocation7], 4294967280  ;;  %s210_s22 = sand.u32 1, %s7172_s13   ;;  %p213_p0 = scmp.lt.s32.totalorder %s7184_s16, 1 }
  0x53   : > { %s5496_s27 = sshll.u32 %s210_s22, 7  ;;  %p5498_p2 = scmp.ne.s32.totalorder %s7180_s15, 0 }
  0x54   : > { %s214_s6 = scalar_select %p213_p0, %s7184_s16, 1 }
  0x55   : > { %s7373_s10 = scalar_lea.vmem [#allocation8], %s5496_s27  ;;  %224 = sbr.rel (%p5498_p2) target bundleno = 102 (0x66), region = 44  ;;  %v7202_v0 = vmov (!%p5498_p2), 0.0  }
  0x56   : > { %s6860_s4 = smul.u32 264, %s214_s6  ;;  %225 = vst [vmem:[#allocation2] sm:$0xff] (!%p5498_p2), %v7202_v0  ;;  %226 = vst [vmem:[#allocation2 + $0x8] sm:$0xff] (!%p5498_p2), %v7202_v0 }
  0x57   : > { %227 = vst [vmem:[#allocation2 + $0x10] sm:$0xff] (!%p5498_p2), %v7202_v0  ;;  %228 = vst [vmem:[#allocation2 + $0x18] sm:$0xff] (!%p5498_p2), %v7202_v0 }
  0x58   : > { %s7371_s9 = scalar_lea.vmem %s8311_s0, %s6860_s4  ;;  %229 = vst [vmem:[#allocation2 + $0x20] sm:$0xff] (!%p5498_p2), %v7202_v0  ;;  %230 = vst [vmem:[#allocation2 + $0x28] sm:$0xff] (!%p5498_p2), %v7202_v0 }
  0x59   : > { %231 = vst [vmem:[#allocation2 + $0x30] sm:$0xff] (!%p5498_p2), %v7202_v0  ;;  %232 = vst [vmem:[#allocation2 + $0x38] sm:$0xff] (!%p5498_p2), %v7202_v0 }
  0x5a   : > { %233 = vst [vmem:[#allocation2 + $0x40] sm:$0xff] (!%p5498_p2), %v7202_v0  ;;  %234 = vst [vmem:[#allocation2 + $0x48] sm:$0xff] (!%p5498_p2), %v7202_v0 }
  0x5b   : > { %235 = vst [vmem:[#allocation2 + $0x50] sm:$0xff] (!%p5498_p2), %v7202_v0  ;;  %236 = vst [vmem:[#allocation2 + $0x58] sm:$0xff] (!%p5498_p2), %v7202_v0 }
  0x5c   : > { %237 = vst [vmem:[#allocation2 + $0x60] sm:$0xff] %v7202_v0  ;;  %238 = vst [vmem:[#allocation2 + $0x68] sm:$0xff] %v7202_v0 }
  0x5d   : > { %239 = vst [vmem:[#allocation2 + $0x70] sm:$0xff] %v7202_v0  ;;  %240 = vst [vmem:[#allocation2 + $0x78] sm:$0xff] %v7202_v0 }
  0x5e   : > { %241 = vst [vmem:[#allocation2 + $0x80] sm:$0xff] %v7202_v0  ;;  %242 = vst [vmem:[#allocation2 + $0x88] sm:$0xff] %v7202_v0 }
  0x5f   : > { %243 = vst [vmem:[#allocation2 + $0x90] sm:$0xff] %v7202_v0  ;;  %244 = vst [vmem:[#allocation2 + $0x98] sm:$0xff] %v7202_v0 }
  0x60   : > { %245 = vst [vmem:[#allocation2 + $0xa0] sm:$0xff] %v7202_v0  ;;  %246 = vst [vmem:[#allocation2 + $0xa8] sm:$0xff] %v7202_v0 }
  0x61   : > { %247 = vst [vmem:[#allocation2 + $0xb0] sm:$0xff] %v7202_v0  ;;  %248 = vst [vmem:[#allocation2 + $0xb8] sm:$0xff] %v7202_v0 }
  0x62   : > { %249 = vst [vmem:[#allocation2 + $0xc0] sm:$0xff] %v7202_v0  ;;  %250 = vst [vmem:[#allocation2 + $0xc8] sm:$0xff] %v7202_v0 }
  0x63   : > { %251 = vst [vmem:[#allocation2 + $0xd0] sm:$0xff] %v7202_v0  ;;  %252 = vst [vmem:[#allocation2 + $0xd8] sm:$0xff] %v7202_v0 }
  0x64   : > { %253 = vst [vmem:[#allocation2 + $0xe0] sm:$0xff] %v7202_v0  ;;  %254 = vst [vmem:[#allocation2 + $0xe8] sm:$0xff] %v7202_v0 }
  0x65   : > { %255 = vst [vmem:[#allocation2 + $0xf0] sm:$0xff] %v7202_v0  ;;  %256 = vst [vmem:[#allocation2 + $0xf8] sm:$0xff] %v7202_v0 }
  0x66 PF: > { %s5859_s29 = smul.u32 448, %s7180_s15  ;;  %vm2184_vm0 = vsmask.f32 2304  ;;  %vm2185_vm1 = vsmask.f32 6416  ;;  %vm3119_vm3 = vcmask 1041408  }
  0x67   : > { %s5858_s20 = smul.u32 12, %s7180_s15  ;;  %vm7408_vm2 = vmor %vm2184_vm0, %vm2185_vm1  ;;  %vm3120_vm4 = vcmask 1045508   ;;  %vm762_vm6 = vsmask.f32 3328  ;;  %vm763_vm7 = vsmask.f32 7440 }
  0x68   : > { %s7377_s11 = scalar_lea.vmem [#allocation3], %s5859_s29  ;;  %vm7480_vm5 = vmor %vm3119_vm3, %vm3120_vm4  ;;  %vm3670_vm9 = vsmask.f32 1280  ;;  %vm3671_vm10 = vsmask.f32 5392  ;;  %vm1633_vm12 = vcmask 1042432  }
  0x69   : > { %v6958_v1 = vld [vmem:[%s7377_s11] sm:$0xff]   ;;  %v6960_v3 = vld [vmem:[%s7377_s11 + $0x8] sm:$0xff]   ;;  %v6962_v5 = vld [vmem:[%s7377_s11 + $0x10] sm:$0xff]   ;;  %s7392_s21 = scalar_lea.vmem %s7371_s9, %s5858_s20  ;;  %vm1634_vm13 = vcmask 1046532   ;;  %vm4605_vm15 = vcmask 1040384   ;;  %vm4606_vm0 = vcmask 1044484  }
  0x6a   : > { %v6959_v2 = vld [vmem:[%s7377_s11 + $0xc0] sm:$0xff]   ;;  %6156 = vmatprep.subr.bf16.mxu1 %v6958_v1  ;;  %v6961_v4 = vld [vmem:[%s7377_s11 + $0xc8] sm:$0xff]   ;;  %v6963_v6 = vld [vmem:[%s7377_s11 + $0xd0] sm:$0xff]   ;;  %p5819_p10 = scmp.ne.s32.totalorder %s7180_s15, 6 }
  0x6b   : > { %6300 = vmatprep.subr.bf16.mxu0 %v6959_v2  ;;  %6157 = vmatpush3.bf16.msra.mxu1 %v6958_v1  ;;  %v6964_v7 = vld [vmem:[%s7377_s11 + $0x18] sm:$0xff]   ;;  %v6966_v9 = vld [vmem:[%s7377_s11 + $0x20] sm:$0xff]   ;;  %v6968_v11 = vld [vmem:[%s7377_s11 + $0x28] sm:$0xff]  }
  0x6c   : > { %6301 = vmatpush3.bf16.msra.mxu0 %v6959_v2  ;;  %6158 = vmatprep.subr.bf16.mxu1 %v6960_v3  ;;  %v6965_v8 = vld [vmem:[%s7377_s11 + $0xd8] sm:$0xff]   ;;  %v6967_v10 = vld [vmem:[%s7377_s11 + $0xe0] sm:$0xff]   ;;  %v6969_v12 = vld [vmem:[%s7377_s11 + $0xe8] sm:$0xff]  }
  0x6d   : > { %6302 = vmatprep.subr.bf16.mxu0 %v6961_v4  ;;  %v6974_v13 = vld [vmem:[%s7392_s21] sm:$0xff]   ;;  %v2138_v16 = vld [vmem:[%s7392_s21 + $0x8] sm:$0x3]  ;;  %v6970_v21 = vld [vmem:[%s7377_s11 + $0x30] sm:$0xff]  }
  0x6e   : > { %v2136_v14 = vld [vmem:[%s7392_s21] sm:$0xe]  ;;  %v2137_v15 = vld [vmem:[%s7392_s21 + $0x4] sm:$0xf]  ;;  %6172 = vmatprep.mubr.bf16.mxu1 %v6974_v13  ;;  %v6971_v22 = vld [vmem:[%s7377_s11 + $0xf0] sm:$0xff]   ;;  %v2207_v23 = vshrl.u32 %v2138_v16, 16 }
  0x6f   : > { %6159 = vmatpush3.bf16.msra.mxu1 %v6960_v3  ;;  %v2188_v17 = vshrl.u32 %v2136_v14, 16  ;;  %v2191_v18 = vshll.u32 %v2136_v14, 16  ;;  %v2197_v19 = vshrl.u32 %v2137_v15, 16  ;;  %v2200_v20 = vshll.u32 %v2137_v15, 16  ;;  %v2139_v31 = vld [vmem:[%s7392_s21 + $0xc] sm:$0xe]  ;;  %vm7578_vm8 = vmor %vm762_vm6, %vm763_vm7 }
  0x70   : > { %6303 = vmatpush3.bf16.msra.mxu0 %v6961_v4  ;;  %6160 = vmatprep.subr.bf16.mxu1 %v6962_v5  ;;  %v2210_v24 = vshll.u32 %v2138_v16, 16  ;;  %v2209_v29 = vrot.slane %v2207_v23, 5  ;;  %v6972_v32 = vld [vmem:[%s7377_s11 + $0x38] sm:$0xff]   ;;  %v2140_v35 = vld [vmem:[%s7392_s21 + $0x10] sm:$0xf]  ;;  %v2216_v37 = vshrl.u32 %v2139_v31, 16  ;;  %vm7723_vm11 = vmor %vm3670_vm9, %vm3671_vm10 }
  0x71   : > { %6304 = vmatprep.subr.bf16.mxu0 %v6963_v6  ;;  %v2190_v25 = vrot.slane %v2188_v17, 5  ;;  %v2193_v26 = vrot.slane %v2191_v18, 6  ;;  %v2199_v27 = vrot.slane %v2197_v19, 5  ;;  %v2202_v28 = vrot.slane %v2200_v20, 6  ;;  %v2141_v36 = vld [vmem:[%s7392_s21 + $0x14] sm:$0x3]  ;;  %vm7831_vm14 = vmor %vm1633_vm12, %vm1634_vm13 }
  0x72   : > { %v2212_v30 = vrot.slane %v2210_v24, 6  ;;  %v2219_v38 = vshll.u32 %v2139_v31, 16  ;;  %v6973_v39 = vld [vmem:[%s7377_s11 + $0xf8] sm:$0xff]   ;;  %v2225_v42 = vshrl.u32 %v2140_v35, 16  ;;  %v2228_v43 = vshll.u32 %v2140_v35, 16  ;;  %v6976_v57 = vld [vmem:[%s7377_s11 + $0x40] sm:$0xff]   ;;  %vm7965_vm1 = vmor %vm4605_vm15, %vm4606_vm0 }
  0x73   : > { %6161 = vmatpush3.bf16.msra.mxu1 %v6962_v5  ;;  %v2194_v33 = vor.u32 %v2193_v26, %v2190_v25  ;;  %v2203_v34 = vor.u32 %v2202_v28, %v2199_v27  ;;  %v2235_v44 = vshrl.u32 %v2141_v36, 16  ;;  %v2218_v47 = vrot.slane %v2216_v37, 5  ;;  %v2142_v60 = vld [vmem:[%s7392_s21 + $0x18] sm:$0xe]  ;;  %v6975_v61 = vld [vmem:[%s7392_s21 + $0xc] sm:$0xff]   ;;  %v6977_v4 = vld [vmem:[%s7377_s11 + $0x100] sm:$0xff]  }
  0x74   : > { %6305 = vmatpush3.bf16.msra.mxu0 %v6963_v6  ;;  %6162 = vmatprep.subr.bf16.mxu1 %v6964_v7  ;;  %v2213_v41 = vor.u32 %v2212_v30, %v2209_v29  ;;  %v2221_v48 = vrot.slane %v2219_v38, 6  ;;  %v2227_v49 = vrot.slane %v2225_v42, 5  ;;  %v2230_v50 = vrot.slane %v2228_v43, 6  ;;  %v2143_v63 = vld [vmem:[%s7392_s21 + $0x1c] sm:$0xf]  ;;  %v6978_v13 = vld [vmem:[%s7377_s11 + $0x108] sm:$0xff]  }
  0x75   : > { %6306 = vmatprep.subr.bf16.mxu0 %v6965_v8  ;;  %v2195_v45 = vrot.slane %v2194_v33, 4  ;;  %v2205_v46 = vrot.slane %v2203_v34, 4  ;;  %v2237_v51 = vrot.slane %v2235_v44, 5  ;;  %v2238_v52 = vshll.u32 %v2141_v36, 16  ;;  %v2144_v0 = vld [vmem:[%s7392_s21 + $0x20] sm:$0x3] }
  0x76   : > { %v2222_v55 = vor.u32 %v2221_v48, %v2218_v47  ;;  %v2231_v58 = vor.u32 %v2230_v50, %v2227_v49  ;;  %v2244_v1 = vshrl.u32 %v2142_v60, 16  ;;  %v2247_v5 = vshll.u32 %v2142_v60, 16  ;;  %v6981_v17 = vld [vmem:[%s7377_s11 + $0x48] sm:$0xff]   ;;  %v6982_v35 = vld [vmem:[%s7377_s11 + $0x110] sm:$0xff]  }
  0x77   : > { %6163 = vmatpush3.bf16.msra.mxu1 %v6964_v7  ;;  %v2204_v53 = vsel %vm7408_vm2, %v2195_v45, %v2203_v34  ;;  %v2214_v54 = vsel %vm7408_vm2, %v2205_v46, %v2213_v41  ;;  %v2240_v59 = vrot.slane %v2238_v52, 6  ;;  %v2253_v6 = vshrl.u32 %v2143_v63, 16  ;;  %v2146_v24 = vld [vmem:[%s7392_s21 + $0x28] sm:$0xf]  ;;  %v2147_v25 = vld [vmem:[%s7392_s21 + $0x2c] sm:$0x3] }
  0x78   : > { %6307 = vmatpush3.bf16.msra.mxu0 %v6965_v8  ;;  %6164 = vmatprep.subr.bf16.mxu1 %v6966_v9  ;;  %v5640_v56 = vcombine.low %v2204_v53, %v2214_v54  ;;  %v2223_v62 = vrot.slane %v2222_v55, 4  ;;  %v2233_v2 = vrot.slane %v2231_v58, 4  ;;  %v6979_v8 = vld [vmem:[%s7392_s21 + $0x18] sm:$0xff]   ;;  %v2249_v14 = vrot.slane %v2247_v5, 6  ;;  %v6980_v37 = vld [vmem:[%s7392_s21 + $0x24] sm:$0xff]   ;;  %v6984_v53 = vld [vmem:[%s7392_s21 + $0x30] sm:$0xff]  }
  0x79   : > { %6308 = vmatprep.subr.bf16.mxu0 %v6967_v10  ;;  %v2241_v3 = vor.u32 %v2240_v59, %v2237_v51  ;;  %v2255_v15 = vrot.slane %v2253_v6, 5  ;;  %v2266_v16 = vshll.u32 %v2144_v0, 16  ;;  %v2281_v29 = vshrl.u32 %v2146_v24, 16  ;;  %v2148_v48 = vld [vmem:[%s7392_s21 + $0x30] sm:$0xe]  ;;  %v6983_v52 = vld [vmem:[%s7377_s11 + $0x118] sm:$0xff]  }
  0x7a   : > { %6316 = vmatprep.mubr.bf16.mxu0 %v5640_v56  ;;  %v2232_v7 = vsel %vm7408_vm2, %v2223_v62, %v2231_v58  ;;  %v2284_v30 = vshll.u32 %v2146_v24, 16  ;;  %v2291_v34 = vshrl.u32 %v2147_v25, 16  ;;  %v2294_v44 = vshll.u32 %v2147_v25, 16  ;;  %v2149_v49 = vld [vmem:[%s7392_s21 + $0x34] sm:$0xf] }
  0x7b   : > { %6165 = vmatpush3.bf16.msra.mxu1 %v6966_v9  ;;  %v2246_v9 = vrot.slane %v2244_v1, 5  ;;  %v2268_v23 = vrot.slane %v2266_v16, 6  ;;  %v2150_v54 = vld [vmem:[%s7392_s21 + $0x38] sm:$0x3]  ;;  %v2300_v55 = vshrl.u32 %v2148_v48, 16  ;;  %v2303_v56 = vshll.u32 %v2148_v48, 16 }
  0x7c   : > { %6309 = vmatpush3.bf16.msra.mxu0 %v6967_v10  ;;  %6166 = vmatprep.subr.bf16.mxu1 %v6968_v11  ;;  %v2256_v10 = vshll.u32 %v2143_v63, 16  ;;  %v2286_v41 = vrot.slane %v2284_v30, 6  ;;  %v2293_v43 = vrot.slane %v2291_v34, 5  ;;  %v2296_v51 = vrot.slane %v2294_v44, 6  ;;  %v6986_v1 = vld [vmem:[%s7377_s11 + $0x50] sm:$0xff]   ;;  %v6988_v30 = vld [vmem:[%s7377_s11 + $0x128] sm:$0xff]  }
  0x7d   : > { %6310 = vmatprep.subr.bf16.mxu0 %v6969_v12  ;;  %v2309_v59 = vshrl.u32 %v2149_v49, 16  ;;  %v2312_v60 = vshll.u32 %v2149_v49, 16  ;;  %v2302_v62 = vrot.slane %v2300_v55, 5  ;;  %v2305_v63 = vrot.slane %v2303_v56, 6  ;;  %v6991_v55 = vld [vmem:[%s7377_s11 + $0x58] sm:$0xff]  }
  0x7e   : > { %v2258_v19 = vrot.slane %v2256_v10, 6  ;;  %v2322_v5 = vshll.u32 %v2150_v54, 16  ;;  %v6987_v10 = vld [vmem:[%s7377_s11 + $0x120] sm:$0xff]  }
  0x7f   : > { %6167 = vmatpush3.bf16.msra.mxu1 %v6968_v11  ;;  %v2263_v11 = vshrl.u32 %v2144_v0, 16  ;;  %v2319_v0 = vshrl.u32 %v2150_v54, 16  ;;  %v6990_v54 = vld [vmem:[%s7392_s21 + $0x54] sm:$0xff]  }
  0x80   : > { %6311 = vmatpush3.bf16.msra.mxu0 %v6969_v12  ;;  %6168 = vmatprep.subr.bf16.mxu1 %v6970_v21  ;;  %v2242_v12 = vsel %vm7408_vm2, %v2233_v2, %v2241_v3  ;;  %v2259_v27 = vor.u32 %v2258_v19, %v2255_v15  ;;  %v2311_v3 = vrot.slane %v2309_v59, 5  ;;  %v2153_v15 = vld [vmem:[%s7392_s21 + $0x44] sm:$0x3] }
  0x81   : > { %6312 = vmatprep.subr.bf16.mxu0 %v6971_v22  ;;  %v5641_v18 = vcombine.low %v2232_v7, %v2242_v12  ;;  %v2265_v20 = vrot.slane %v2263_v11, 5  ;;  %v2306_v7 = vor.u32 %v2305_v63, %v2302_v62  ;;  %v2347_v25 = vshrl.u32 %v2153_v15, 16  ;;  %v2157_v63 = vld [vmem:[%s7392_s21 + $0x54] sm:$0xe] }
  0x82   : > { %v2261_v36 = vrot.slane %v2259_v27, 4  ;;  %v2350_v34 = vshll.u32 %v2153_v15, 16 }
  0x83   : > { %6169 = vmatpush3.bf16.msra.mxu1 %v6970_v21  ;;  %v2145_v21 = vld [vmem:[%s7392_s21 + $0x24] sm:$0xe] }
  0x84   : > { %6313 = vmatpush3.bf16.msra.mxu0 %v6971_v22  ;;  %6170 = vmatprep.subr.bf16.mxu1 %v6972_v32  ;;  %v2250_v22 = vor.u32 %v2249_v14, %v2246_v9  ;;  %v2272_v26 = vshrl.u32 %v2145_v21, 16  ;;  %v2275_v28 = vshll.u32 %v2145_v21, 16  ;;  %v2151_v9 = vld [vmem:[%s7392_s21 + $0x3c] sm:$0xe]  ;;  %v2152_v14 = vld [vmem:[%s7392_s21 + $0x40] sm:$0xf] }
  0x85   : > { %6314 = vmatprep.subr.bf16.mxu0 %v6973_v39  ;;  %v2328_v16 = vshrl.u32 %v2151_v9, 16  ;;  %v2337_v19 = vshrl.u32 %v2152_v14, 16 }
  0x86   : > { %v2251_v31 = vrot.slane %v2250_v22, 4  ;;  %v2274_v33 = vrot.slane %v2272_v26, 5  ;;  %v2277_v38 = vrot.slane %v2275_v28, 6 }
  0x87   : > { %6171 = vmatpush3.bf16.msra.mxu1 %v6972_v32  ;;  %v2269_v32 = vor.u32 %v2268_v23, %v2265_v20  ;;  %v2340_v20 = vshll.u32 %v2152_v14, 16  ;;  %v6985_v23 = vld [vmem:[%s7392_s21 + $0x3c] sm:$0xff]   ;;  %v2330_v24 = vrot.slane %v2328_v16, 5  ;;  %v2339_v28 = vrot.slane %v2337_v19, 5 }
  0x88   : > { %6315 = vmatpush3.bf16.msra.mxu0 %v6973_v39  ;;  %6204 = vmatprep.subr.bf16.mxu1 %v6976_v57  ;;  %v2283_v39 = vrot.slane %v2281_v29, 5  ;;  %v2260_v42 = vsel %vm7408_vm2, %v2251_v31, %v2259_v27  ;;  %v2278_v46 = vor.u32 %v2277_v38, %v2274_v33  ;;  %v6989_v31 = vld [vmem:[%s7392_s21 + $0x48] sm:$0xff]   ;;  %v2349_v33 = vrot.slane %v2347_v25, 5  ;;  %v6993_v14 = vld [vmem:[%s7377_s11 + $0x138] sm:$0xff]   ;;  %v6994_v19 = vld [vmem:[%s7392_s21 + $0x60] sm:$0xff]  }
  0x89   : > { %6348 = vmatprep.subr.bf16.mxu0 %v6977_v4  ;;  %v2270_v45 = vsel %vm7408_vm2, %v2261_v36, %v2269_v32  ;;  %v2342_v29 = vrot.slane %v2340_v20, 6  ;;  %v2154_v38 = vld [vmem:[%s7392_s21 + $0x48] sm:$0xe] }
  0x8a   : > { %6173 = vmatmul.mubr.bf16.vlgmr.msra.gmra.mrb[0].mxu1 %v6975_v61  ;;  %v2287_v47 = vor.u32 %v2286_v41, %v2283_v39  ;;  %v5642_v50 = vcombine.low %v2260_v42, %v2270_v45  ;;  %v2297_v61 = vor.u32 %v2296_v51, %v2293_v43  ;;  %v2155_v39 = vld [vmem:[%s7392_s21 + $0x4c] sm:$0xf]  ;;  %v2352_v41 = vrot.slane %v2350_v34, 6  ;;  %v2156_v42 = vld [vmem:[%s7392_s21 + $0x50] sm:$0x3] }
  0x8b   : > { %6317 = vmatmul.mubr.bf16.vlgmr.msra.gmra.mrb[0].mxu0 %v5641_v18  ;;  %6205 = vmatpush3.bf16.msra.mxu1 %v6976_v57  ;;  %v2279_v57 = vrot.slane %v2278_v46, 4  ;;  %v2331_v18 = vshll.u32 %v2151_v9, 16  ;;  %v2356_v43 = vshrl.u32 %v2154_v38, 16  ;;  %v2359_v44 = vshll.u32 %v2154_v38, 16 }
  0x8c   : > { %6349 = vmatpush3.bf16.msra.mxu0 %v6977_v4  ;;  %6176 = vmatprep.mubr.bf16.mxu1 %v6979_v8  ;;  %v2289_v58 = vrot.slane %v2287_v47, 4  ;;  %v2314_v4 = vrot.slane %v2312_v60, 6  ;;  %v2321_v8 = vrot.slane %v2319_v0, 5  ;;  %v2365_v45 = vshrl.u32 %v2155_v39, 16  ;;  %v6992_v60 = vld [vmem:[%s7377_s11 + $0x130] sm:$0xff]  }
  0x8d   : > { %6350 = vmatprep.subr.bf16.mxu0 %v6978_v13  ;;  %6206 = vmatprep.subr.bf16.mxu1 %v6981_v17  ;;  %v2288_v2 = vsel %vm7408_vm2, %v2279_v57, %v2287_v47  ;;  %v2333_v27 = vrot.slane %v2331_v18, 6  ;;  %v2368_v48 = vshll.u32 %v2155_v39, 16  ;;  %v2375_v49 = vshrl.u32 %v2156_v42, 16  ;;  %v2158_v0 = vld [vmem:[%s7392_s21 + $0x58] sm:$0xf] }
  0x8e   : > { %6320 = vmatprep.mubr.bf16.mxu0 %v5642_v50  ;;  %v2298_v6 = vsel %vm7408_vm2, %v2289_v58, %v2297_v61  ;;  %v2315_v12 = vor.u32 %v2314_v4, %v2311_v3  ;;  %v2353_v50 = vor.u32 %v2352_v41, %v2349_v33  ;;  %v2358_v51 = vrot.slane %v2356_v43, 5  ;;  %v2159_v4 = vld [vmem:[%s7392_s21 + $0x5c] sm:$0x3] }
  0x8f   : > { %6207 = vmatpush3.bf16.msra.mxu1 %v6981_v17  ;;  %v5643_v11 = vcombine.low %v2288_v2, %v2298_v6  ;;  %v2307_v17 = vrot.slane %v2306_v7, 4  ;;  %v2334_v36 = vor.u32 %v2333_v27, %v2330_v24  ;;  %v2370_v57 = vrot.slane %v2368_v48, 6  ;;  %v3023_v27 = vld [vmem:[%s7392_s21] sm:$0xc] }
  0x90   : > { %6351 = vmatpush3.bf16.msra.mxu0 %v6978_v13  ;;  %6208 = vmatprep.subr.bf16.mxu1 %v6986_v1  ;;  %v2324_v13 = vrot.slane %v2322_v5, 6  ;;  %v2317_v21 = vrot.slane %v2315_v12, 4  ;;  %v2377_v58 = vrot.slane %v2375_v49, 5  ;;  %v2378_v59 = vshll.u32 %v2156_v42, 16  ;;  %v6997_v42 = vld [vmem:[%s7392_s21 + $0x78] sm:$0xff]  }
  0x91   : > { %6352 = vmatprep.subr.bf16.mxu0 %v6982_v35  ;;  %v2316_v26 = vsel %vm7408_vm2, %v2307_v17, %v2315_v12  ;;  %v2335_v46 = vrot.slane %v2334_v36, 4  ;;  %v2384_v5 = vshrl.u32 %v2157_v63, 16  ;;  %v2387_v7 = vshll.u32 %v2157_v63, 16  ;;  %v6995_v36 = vld [vmem:[%s7392_s21 + $0x6c] sm:$0xff]  }
  0x92   : > { %6177 = vmatmul.mubr.bf16.gmra.mrb[4].mxu1 %v6980_v37  ;;  %v2325_v22 = vor.u32 %v2324_v13, %v2321_v8  ;;  %v2343_v37 = vor.u32 %v2342_v29, %v2339_v28  ;;  %v2380_v3 = vrot.slane %v2378_v59, 6  ;;  %v2393_v8 = vshrl.u32 %v2158_v0, 16  ;;  %v3024_v28 = vld [vmem:[%s7392_s21 + $0x4] sm:$0xf]  ;;  %v3025_v29 = vld [vmem:[%s7392_s21 + $0x8] sm:$0x3] }
  0x93   : > { %6180 = vmatprep.mubr.bf16.mxu1 %v6984_v53  ;;  %6209 = vmatpush3.bf16.msra.mxu1 %v6986_v1  ;;  %v2367_v53 = vrot.slane %v2365_v45, 5  ;;  %v2396_v9 = vshll.u32 %v2158_v0, 16  ;;  %v2386_v12 = vrot.slane %v2384_v5, 5  ;;  %v2403_v13 = vshrl.u32 %v2159_v4, 16  ;;  %v3027_v45 = vld [vmem:[%s7392_s21 + $0x10] sm:$0xf] }
  0x94   : > { %6353 = vmatpush3.bf16.msra.mxu0 %v6982_v35  ;;  %v2326_v32 = vsel %vm7408_vm2, %v2317_v21, %v2325_v22  ;;  %v2345_v47 = vrot.slane %v2343_v37, 4  ;;  %v2344_v56 = vsel %vm7408_vm2, %v2335_v46, %v2343_v37  ;;  %6210 = vmatprep.subr.bf16.mxu1 %v6991_v55  ;;  %v2389_v16 = vrot.slane %v2387_v7, 6  ;;  %v6996_v37 = vld [vmem:[%s7377_s11 + $0x60] sm:$0xff]   ;;  %v3028_v46 = vld [vmem:[%s7392_s21 + $0x14] sm:$0x3] }
  0x95   : > { %6354 = vmatprep.subr.bf16.mxu0 %v6983_v52  ;;  %6321 = vmatmul.mubr.bf16.gmra.mrb[4].mxu0 %v5643_v11  ;;  %v5644_v35 = vcombine.low %v2316_v26, %v2326_v32  ;;  %v2371_v2 = vor.u32 %v2370_v57, %v2367_v53  ;;  %v2381_v11 = vor.u32 %v2380_v3, %v2377_v58  ;;  %v2395_v17 = vrot.slane %v2393_v8, 5  ;;  %v3031_v57 = vld [vmem:[%s7392_s21 + $0x20] sm:$0x3]  ;;  %v3033_v5 = vld [vmem:[%s7392_s21 + $0x28] sm:$0xf] }
  0x96   : > { %v2354_v61 = vsel %vm7408_vm2, %v2345_v47, %v2353_v50  ;;  %v2398_v18 = vrot.slane %v2396_v9, 6  ;;  %v2405_v21 = vrot.slane %v2403_v13, 5  ;;  %v2406_v22 = vshll.u32 %v2159_v4, 16  ;;  %v3032_v4 = vld [vmem:[%s7392_s21 + $0x24] sm:$0xc] }
  0x97   : > { %6324 = vmatprep.mubr.bf16.mxu0 %v5644_v35  ;;  %v5645_v1 = vcombine.low %v2344_v56, %v2354_v61  ;;  %6211 = vmatpush3.bf16.msra.mxu1 %v6991_v55  ;;  %v2390_v25 = vor.u32 %v2389_v16, %v2386_v12  ;;  %v3124_v32 = vrot.slane %v3024_v28, 6  ;;  %v3127_v33 = vrot.slane %v3025_v29, 6  ;;  %v3030_v55 = vld [vmem:[%s7392_s21 + $0x1c] sm:$0xf]  ;;  %v3036_v16 = vld [vmem:[%s7392_s21 + $0x34] sm:$0xf] }
  0x98   : > { %6355 = vmatpush3.bf16.msra.mxu0 %v6983_v52  ;;  %v2361_v52 = vrot.slane %v2359_v44, 6  ;;  %v2399_v26 = vor.u32 %v2398_v18, %v2395_v17  ;;  %6212 = vmatprep.subr.bf16.mxu1 %v6996_v37  ;;  %v3026_v44 = vld [vmem:[%s7392_s21 + $0xc] sm:$0xc]  ;;  %v3131_v50 = vrot.slane %v3027_v45, 6  ;;  %v3134_v53 = vrot.slane %v3028_v46, 6  ;;  %v7003_v17 = vld [vmem:[%s7377_s11 + $0x70] sm:$0xff]  }
  0x99   : > { %6356 = vmatprep.subr.bf16.mxu0 %v6987_v10  ;;  %v2391_v34 = vrot.slane %v2390_v25, 4  ;;  %v3126_v41 = vrot.slane %v3124_v32, 4  ;;  %v5665_v49 = vrot.slane %v3026_v44, 10  ;;  %v3138_v59 = vrot.slane %v3030_v55, 6  ;;  %v3037_v18 = vld [vmem:[%s7392_s21 + $0x38] sm:$0x3] }
  0x9a   : > { %6181 = vmatmul.mubr.bf16.gmra.mrb[8].mxu1 %v6985_v23  ;;  %v2362_v62 = vor.u32 %v2361_v52, %v2358_v51  ;;  %v2401_v35 = vrot.slane %v2399_v26, 4  ;;  %v3133_v56 = vrot.slane %v3131_v50, 4  ;;  %v3141_v61 = vrot.slane %v3031_v57, 6  ;;  %v7002_v25 = vld [vmem:[%s7392_s21 + $0x9c] sm:$0xff]  }
  0x9b   : > { %6184 = vmatprep.mubr.bf16.mxu1 %v6989_v31  ;;  %v5664_v31 = vrot.slane %v3023_v27, 10  ;;  %v2400_v43 = vsel %vm7408_vm2, %v2391_v34, %v2399_v26  ;;  %v3128_v48 = vsel %vm7480_vm5, %v3126_v41, %v3127_v33  ;;  %6213 = vmatpush3.bf16.msra.mxu1 %v6996_v37  ;;  %v3132_v63 = vsel %vm7480_vm5, %v5665_v49, %v3131_v50  ;;  %v3038_v26 = vld [vmem:[%s7392_s21 + $0x3c] sm:$0xc]  ;;  %v3039_v29 = vld [vmem:[%s7392_s21 + $0x40] sm:$0xf] }
  0x9c   : > { %6357 = vmatpush3.bf16.msra.mxu0 %v6987_v10  ;;  %v2363_v6 = vrot.slane %v2362_v62, 4  ;;  %v2373_v10 = vrot.slane %v2371_v2, 4  ;;  %v7000_v62 = vld [vmem:[%s7377_s11 + $0x140] sm:$0xff]   ;;  %v3135_v0 = vsel %vm7480_vm5, %v3133_v56, %v3134_v53  ;;  %v5667_v8 = vrot.slane %v3032_v4, 10  ;;  %v3041_v37 = vld [vmem:[%s7392_s21 + $0x48] sm:$0xc] }
  0x9d   : > { %6358 = vmatprep.subr.bf16.mxu0 %v6988_v30  ;;  %6325 = vmatmul.mubr.bf16.gmra.mrb[8].mxu0 %v5645_v1  ;;  %v3125_v39 = vsel %vm7480_vm5, %v5664_v31, %v3124_v32  ;;  %v3140_v1 = vrot.slane %v3138_v59, 4  ;;  %v3145_v9 = vrot.slane %v3033_v5, 6  ;;  %v5698_v12 = vcombine.low %v3132_v63, %v3135_v0  ;;  %v7005_v32 = vld [vmem:[%s7392_s21 + $0xa8] sm:$0xff]   ;;  %v7008_v53 = vld [vmem:[%s7377_s11 + $0x150] sm:$0xff]   ;;  %v3046_v55 = vld [vmem:[%s7392_s21 + $0x5c] sm:$0x3] }
  0x9e   : > { %v2372_v15 = vsel %vm7408_vm2, %v2363_v6, %v2371_v2  ;;  %v2382_v20 = vsel %vm7408_vm2, %v2373_v10, %v2381_v11  ;;  %v5697_v52 = vcombine.low %v3125_v39, %v3128_v48  ;;  %v6998_v2 = vld [vmem:[%s7392_s21 + $0x84] sm:$0xff]   ;;  %v3034_v6 = vld [vmem:[%s7392_s21 + $0x2c] sm:$0x3]  ;;  %v7001_v11 = vld [vmem:[%s7392_s21 + $0x90] sm:$0xff]   ;;  %v5669_v31 = vrot.slane %v3038_v26, 10 }
  0x9f   : > { %v5646_v24 = vcombine.low %v2372_v15, %v2382_v20  ;;  %v3142_v7 = vsel %vm7480_vm5, %v3140_v1, %v3141_v61  ;;  %v3148_v10 = vrot.slane %v3034_v6, 6  ;;  %v3035_v15 = vld [vmem:[%s7392_s21 + $0x30] sm:$0xc]  ;;  %v3152_v20 = vrot.slane %v3036_v16, 6  ;;  %v3042_v41 = vld [vmem:[%s7392_s21 + $0x4c] sm:$0xf] }
  0xa0   : > { %6359 = vmatpush3.bf16.msra.mxu0 %v6988_v30  ;;  %v2408_v30 = vrot.slane %v2406_v22, 6  ;;  %v7004_v22 = vld [vmem:[%s7377_s11 + $0x148] sm:$0xff]   ;;  %v3146_v27 = vsel %vm7480_vm5, %v5667_v8, %v3145_v9  ;;  %v3166_v45 = vrot.slane %v3042_v41, 6  ;;  %v714_v61 = vld [vmem:[%s7392_s21] sm:$0xf] }
  0xa1   : > { %6360 = vmatprep.subr.bf16.mxu0 %v6992_v60  ;;  %6328 = vmatprep.mubr.bf16.mxu0 %v5646_v24  ;;  %v3154_v24 = vrot.slane %v3152_v20, 4  ;;  %v715_v1 = vld [vmem:[%s7392_s21 + $0x4] sm:$0xf]  ;;  %v769_v4 = vshll.u32 %v714_v61, 16  ;;  %v3047_v8 = vld [vmem:[%s7392_s21 + $0x60] sm:$0xc] }
  0xa2   : > { %6185 = vmatmul.mubr.bf16.gmra.mrb[12].mxu1 %v6990_v54  ;;  %v2409_v38 = vor.u32 %v2408_v30, %v2405_v21  ;;  %v3029_v54 = vld [vmem:[%s7392_s21 + $0x18] sm:$0xc]  ;;  %v3155_v21 = vrot.slane %v3037_v18, 6  ;;  %v3040_v30 = vld [vmem:[%s7392_s21 + $0x44] sm:$0x3]  ;;  %v3168_v50 = vrot.slane %v3166_v45, 4 }
  0xa3   : > { %6188 = vmatprep.mubr.bf16.mxu1 %v6994_v19  ;;  %v5666_v58 = vrot.slane %v3029_v54, 10  ;;  %v5668_v19 = vrot.slane %v3035_v15, 10  ;;  %v7006_v54 = vld [vmem:[%s7392_s21 + $0xb4] sm:$0xff]   ;;  %v775_v5 = vshll.u32 %v715_v1, 16  ;;  %v779_v6 = vshrl.u32 %v715_v1, 16 }
  0xa4   : > { %6361 = vmatpush3.bf16.msra.mxu0 %v6992_v60  ;;  %v2410_v47 = vsel %vm7408_vm2, %v2401_v35, %v2409_v38  ;;  %v6999_v60 = vld [vmem:[%s7377_s11 + $0x68] sm:$0xff]   ;;  %v3156_v34 = vsel %vm7480_vm5, %v3154_v24, %v3155_v21  ;;  %v3159_v35 = vrot.slane %v3039_v29, 6  ;;  %v771_v16 = vrot.slane %v769_v4, 5  ;;  %v719_v29 = vld [vmem:[%s7392_s21 + $0x14] sm:$0x1] }
  0xa5   : > { %6362 = vmatprep.subr.bf16.mxu0 %v6993_v14  ;;  %v5647_v51 = vcombine.low %v2400_v43, %v2410_v47  ;;  %6214 = vmatprep.subr.bf16.mxu1 %v6999_v60  ;;  %v3139_v3 = vsel %vm7480_vm5, %v5666_v58, %v3138_v59  ;;  %v3153_v33 = vsel %vm7480_vm5, %v5668_v19, %v3152_v20  ;;  %v5670_v43 = vrot.slane %v3041_v37, 10  ;;  %v7007_v47 = vld [vmem:[%s7377_s11 + $0x78] sm:$0xff]   ;;  %v717_v19 = vld [vmem:[%s7392_s21 + $0xc] sm:$0xf] }
  0xa6   : > { %6215 = vmatpush3.bf16.msra.mxu1 %v6999_v60  ;;  %v5699_v13 = vcombine.low %v3139_v3, %v3142_v7  ;;  %v3161_v39 = vrot.slane %v3159_v35, 4  ;;  %v5701_v44 = vcombine.low %v3153_v33, %v3156_v34  ;;  %v3160_v48 = vsel %vm7480_vm5, %v5669_v31, %v3159_v35  ;;  %v7010_v20 = vld [vmem:[%s7377_s11 + $0x158] sm:$0xff]  }
  0xa7   : > { %6329 = vmatmul.mubr.bf16.gmra.mrb[12].mxu0 %v5647_v51  ;;  %6216 = vmatprep.subr.bf16.mxu1 %v7003_v17  ;;  %v3044_v51 = vld [vmem:[%s7392_s21 + $0x54] sm:$0xc]  ;;  %v3167_v58 = vsel %vm7480_vm5, %v5670_v43, %v3166_v45  ;;  %v3176_v60 = vrot.slane %v3046_v55, 6  ;;  %v766_v3 = vshrl.u32 %v714_v61, 16  ;;  %v781_v18 = vrot.slane %v779_v6, 4 }
  0xa8   : > { %6363 = vmatpush3.bf16.msra.mxu0 %v6993_v14  ;;  %6364 = vmatprep.mubr.bf16.mxu0 %v5697_v52  ;;  %v3147_v14 = vrot.slane %v3145_v9, 4  ;;  %v3045_v52 = vld [vmem:[%s7392_s21 + $0x58] sm:$0xf]  ;;  %v5671_v56 = vrot.slane %v3044_v51, 10  ;;  %v790_v26 = vshrl.u32 %v717_v19, 16 }
  0xa9   : > { %6396 = vmatprep.subr.bf16.mxu0 %v7000_v62  ;;  %v3173_v57 = vrot.slane %v3045_v52, 6 }
  0xaa   : > { %6189 = vmatmul.mubr.bf16.gmra.mrb[16].mxu1 %v6995_v36  ;;  %v3149_v28 = vsel %vm7480_vm5, %v3147_v14, %v3148_v10  ;;  %v3162_v36 = vrot.slane %v3040_v30, 6  ;;  %v5672_v14 = vrot.slane %v3047_v8, 10  ;;  %v793_v30 = vshll.u32 %v717_v19, 16 }
  0xab   : > { %6192 = vmatprep.mubr.bf16.mxu1 %v6997_v42  ;;  %6217 = vmatpush3.bf16.msra.mxu1 %v7003_v17  ;;  %v5700_v38 = vcombine.low %v3146_v27, %v3149_v28  ;;  %v3043_v42 = vld [vmem:[%s7392_s21 + $0x50] sm:$0x3]  ;;  %v3175_v0 = vrot.slane %v3173_v57, 4  ;;  %v7564_v10 = vsel %vm7480_vm5, %v5671_v56, %v3173_v57  ;;  %v777_v17 = vrot.slane %v775_v5, 5  ;;  %v3053_v5 = vld [vmem:[%s7392_s21 + $0x78] sm:$0xc] }
  0xac   : > { %v3169_v46 = vrot.slane %v3043_v42, 6  ;;  %v3163_v49 = vsel %vm7480_vm5, %v3161_v39, %v3162_v36  ;;  %6218 = vmatprep.subr.bf16.mxu1 %v7007_v47  ;;  %v792_v35 = vrot.slane %v790_v26, 4  ;;  %v795_v39 = vrot.slane %v793_v30, 5  ;;  %v3050_v42 = vld [vmem:[%s7392_s21 + $0x6c] sm:$0xc] }
  0xad   : > { %v5702_v63 = vcombine.low %v3160_v48, %v3163_v49  ;;  %v7570_v15 = vsel %vm7480_vm5, %v3175_v0, %v3176_v60  ;;  %v782_v28 = vor.u32 %v781_v18, %v777_v17  ;;  %v3052_v48 = vld [vmem:[%s7392_s21 + $0x74] sm:$0x3]  ;;  %v5673_v57 = vrot.slane %v3050_v42, 10  ;;  %v7012_v18 = vld [vmem:[%s7377_s11 + $0x160] sm:$0xff]   ;;  %v3058_v42 = vld [vmem:[%s7392_s21 + $0x8c] sm:$0x3] }
  0xae   : > { %v3170_v59 = vsel %vm7480_vm5, %v3168_v50, %v3169_v46  ;;  %v5704_v43 = vcombine.low %v7564_v10, %v7570_v15  ;;  %v809_v46 = vshll.u32 %v719_v29, 16  ;;  %v796_v52 = vor.u32 %v795_v39, %v792_v35  ;;  %v3054_v10 = vld [vmem:[%s7392_s21 + $0x7c] sm:$0xf]  ;;  %v725_v29 = vld [vmem:[%s7392_s21 + $0x2c] sm:$0x1] }
  0xaf   : > { %6365 = vmatmul.mubr.bf16.vlgmr.msra.gmra.mrb[0].mxu0 %v5698_v12  ;;  %6219 = vmatpush3.bf16.msra.mxu1 %v7007_v47  ;;  %v5703_v9 = vcombine.low %v3167_v58, %v3170_v59  ;;  %v3048_v12 = vld [vmem:[%s7392_s21 + $0x64] sm:$0xf]  ;;  %v3051_v47 = vld [vmem:[%s7392_s21 + $0x70] sm:$0xf]  ;;  %v721_v58 = vld [vmem:[%s7392_s21 + $0x1c] sm:$0xf] }
  0xb0   : > { %6368 = vmatprep.mubr.bf16.mxu0 %v5699_v13  ;;  %6397 = vmatpush3.bf16.msra.mxu0 %v7000_v62  ;;  %v7556_v62 = vld [vmem:[%s7377_s11 + $0x80] sm:$0xff]   ;;  %v3049_v13 = vld [vmem:[%s7392_s21 + $0x68] sm:$0x3]  ;;  %v811_v56 = vrot.slane %v809_v46, 5  ;;  %v797_v59 = vrot.slane %v796_v52, 4  ;;  %v3187_v60 = vrot.slane %v3051_v47, 6 }
  0xb1   : > { %6398 = vmatprep.subr.bf16.mxu0 %v7004_v22  ;;  %6252 = vmatprep.subr.bf16.mxu1 %v7556_v62  ;;  %v3183_v24 = vrot.slane %v3049_v13, 6  ;;  %v3190_v61 = vrot.slane %v3052_v48, 6  ;;  %v827_v4 = vshrl.u32 %v721_v58, 16  ;;  %v3056_v35 = vld [vmem:[%s7392_s21 + $0x84] sm:$0xc]  ;;  %v7013_v52 = vld [vmem:[%s7377_s11 + $0x90] sm:$0xff]  }
  0xb2   : > { %6193 = vmatmul.mubr.bf16.gmra.mrb[20].mxu1 %v6998_v2  ;;  %v716_v2 = vld [vmem:[%s7392_s21 + $0x8] sm:$0x1]  ;;  %v3189_v8 = vrot.slane %v3187_v60, 4 }
  0xb3   : > { %6196 = vmatprep.mubr.bf16.mxu1 %v7001_v11  ;;  %v785_v7 = vshll.u32 %v716_v2, 16  ;;  %v768_v11 = vrot.slane %v766_v3, 4  ;;  %v823_v3 = vshll.u32 %v721_v58, 16  ;;  %v7015_v58 = vld [vmem:[%s7377_s11 + $0x98] sm:$0xff]  }
  0xb4   : > { %6399 = vmatpush3.bf16.msra.mxu0 %v7004_v22  ;;  %v3180_v22 = vrot.slane %v3048_v12, 6  ;;  %v7011_v12 = vld [vmem:[%s7377_s11 + $0x88] sm:$0xff]  }
  0xb5   : > { %6400 = vmatprep.subr.bf16.mxu0 %v7008_v53  ;;  %v787_v21 = vrot.slane %v785_v7, 5  ;;  %v772_v27 = vor.u32 %v771_v16, %v768_v11  ;;  %v3188_v7 = vsel %vm7480_vm5, %v5673_v57, %v3187_v60  ;;  %v3055_v11 = vld [vmem:[%s7392_s21 + $0x80] sm:$0x3]  ;;  %v825_v15 = vrot.slane %v823_v3, 5  ;;  %v727_v57 = vld [vmem:[%s7392_s21 + $0x34] sm:$0xf] }
  0xb6   : > { %v3181_v33 = vsel %vm7480_vm5, %v5672_v14, %v3180_v22  ;;  %v3182_v34 = vrot.slane %v3180_v22, 4  ;;  %v829_v16 = vrot.slane %v827_v4, 4  ;;  %v5674_v22 = vrot.slane %v3053_v5, 10 }
  0xb7   : > { %6369 = vmatmul.mubr.bf16.gmra.mrb[4].mxu0 %v5700_v38  ;;  %v773_v37 = vrot.slane %v772_v27, 4  ;;  %v783_v38 = vrot.slane %v782_v28, 4  ;;  %v3194_v28 = vrot.slane %v3054_v10, 6  ;;  %v3204_v3 = vrot.slane %v3058_v42, 6  ;;  %v3063_v42 = vld [vmem:[%s7392_s21 + $0xa0] sm:$0xf] }
  0xb8   : > { %6372 = vmatprep.mubr.bf16.mxu0 %v5701_v44  ;;  %6401 = vmatpush3.bf16.msra.mxu0 %v7008_v53  ;;  %v3184_v44 = vsel %vm7480_vm5, %v3182_v34, %v3183_v24  ;;  %v720_v53 = vld [vmem:[%s7392_s21 + $0x18] sm:$0xf]  ;;  %v724_v24 = vld [vmem:[%s7392_s21 + $0x28] sm:$0xf]  ;;  %v830_v27 = vor.u32 %v829_v16, %v825_v15  ;;  %v871_v10 = vshll.u32 %v727_v57, 16  ;;  %v875_v16 = vshrl.u32 %v727_v57, 16 }
  0xb9   : > { %6402 = vmatprep.subr.bf16.mxu0 %v7010_v20  ;;  %v778_v49 = vsel %vm7578_vm8, %v773_v37, %v777_v17  ;;  %v788_v50 = vsel %vm7578_vm8, %v783_v38, %v787_v21  ;;  %v5705_v51 = vcombine.low %v3181_v33, %v3184_v44  ;;  %v814_v0 = vshrl.u32 %v720_v53, 16  ;;  %v723_v17 = vld [vmem:[%s7392_s21 + $0x24] sm:$0xf]  ;;  %v732_v57 = vld [vmem:[%s7392_s21 + $0x48] sm:$0xf] }
  0xba   : > { %6197 = vmatmul.mubr.bf16.gmra.mrb[24].mxu1 %v7002_v25  ;;  %v718_v25 = vld [vmem:[%s7392_s21 + $0x10] sm:$0xf]  ;;  %v817_v2 = vshll.u32 %v720_v53, 16  ;;  %v838_v33 = vshrl.u32 %v723_v17, 16  ;;  %v841_v34 = vshll.u32 %v723_v17, 16  ;;  %v831_v38 = vrot.slane %v830_v27, 4 }
  0xbb   : > { %6200 = vmatprep.mubr.bf16.mxu1 %v7005_v32  ;;  %v799_v31 = vshll.u32 %v718_v25, 16  ;;  %v803_v36 = vshrl.u32 %v718_v25, 16  ;;  %v3195_v39 = vsel %vm7480_vm5, %v5674_v22, %v3194_v28  ;;  %v847_v46 = vshll.u32 %v724_v24, 16  ;;  %v729_v17 = vld [vmem:[%s7392_s21 + $0x3c] sm:$0xf] }
  0xbc   : > { %6403 = vmatpush3.bf16.msra.mxu0 %v7010_v20  ;;  %v819_v14 = vrot.slane %v817_v2, 5  ;;  %v3191_v20 = vsel %vm7480_vm5, %v3189_v8, %v3190_v61  ;;  %v840_v44 = vrot.slane %v838_v33, 4  ;;  %v851_v47 = vshrl.u32 %v724_v24, 16  ;;  %v730_v24 = vld [vmem:[%s7392_s21 + $0x40] sm:$0xf] }
  0xbd   : > { %v801_v41 = vrot.slane %v799_v31, 5  ;;  %v805_v45 = vrot.slane %v803_v36, 4  ;;  %v5706_v25 = vcombine.low %v3188_v7, %v3191_v20  ;;  %6404 = vmatprep.subr.bf16.mxu0 %v7012_v18  ;;  %v3197_v31 = vrot.slane %v3055_v11, 6  ;;  %v3057_v36 = vld [vmem:[%s7392_s21 + $0x88] sm:$0xf] }
  0xbe   : > { %v853_v60 = vrot.slane %v851_v47, 4  ;;  %v3060_v11 = vld [vmem:[%s7392_s21 + $0x94] sm:$0xf]  ;;  %v3064_v47 = vld [vmem:[%s7392_s21 + $0xa4] sm:$0x3] }
  0xbf   : > { %6373 = vmatmul.mubr.bf16.gmra.mrb[8].mxu0 %v5702_v63  ;;  %v806_v55 = vor.u32 %v805_v45, %v801_v41  ;;  %v722_v63 = vld [vmem:[%s7392_s21 + $0x20] sm:$0x1]  ;;  %v802_v6 = vsel %vm7578_vm8, %v797_v59, %v801_v41  ;;  %v3196_v41 = vrot.slane %v3194_v28, 4  ;;  %v843_v45 = vrot.slane %v841_v34, 5  ;;  %v7016_v59 = vld [vmem:[%s7377_s11 + $0x170] sm:$0xff]  }
  0xc0   : > { %6376 = vmatprep.mubr.bf16.mxu0 %v5703_v9  ;;  %v816_v9 = vrot.slane %v814_v0, 4  ;;  %v833_v21 = vshll.u32 %v722_v63, 16  ;;  %6405 = vmatpush3.bf16.msra.mxu0 %v7012_v18  ;;  %v5675_v63 = vrot.slane %v3056_v35, 10  ;;  %v3201_v0 = vrot.slane %v3057_v36, 6  ;;  %v7017_v18 = vld [vmem:[%s7377_s11 + $0x178] sm:$0xff]  }
  0xc1   : > { %v807_v1 = vrot.slane %v806_v55, 4  ;;  %v844_v55 = vor.u32 %v843_v45, %v840_v44  ;;  %v877_v28 = vrot.slane %v875_v16, 4  ;;  %v3208_v33 = vrot.slane %v3060_v11, 6  ;;  %v731_v35 = vld [vmem:[%s7392_s21 + $0x44] sm:$0x1]  ;;  %v7021_v11 = vld [vmem:[%s7377_s11 + $0xb0] sm:$0xff]  }
  0xc2   : > { %6201 = vmatmul.mubr.bf16.gmra.mrb[28].mxu1 %v7006_v54  ;;  %v5542_v54 = vcombine.low %v778_v49, %v788_v50  ;;  %v820_v26 = vor.u32 %v819_v14, %v816_v9  ;;  %v835_v30 = vrot.slane %v833_v21, 5  ;;  %v3198_v49 = vsel %vm7480_vm5, %v3196_v41, %v3197_v31  ;;  %v3062_v41 = vld [vmem:[%s7392_s21 + $0x9c] sm:$0xc]  ;;  %v3067_v16 = vld [vmem:[%s7392_s21 + $0xb0] sm:$0x3] }
  0xc3   : > { %v812_v13 = vsel %vm7578_vm8, %v807_v1, %v811_v56  ;;  %v857_v50 = vshll.u32 %v725_v29, 16  ;;  %v849_v56 = vrot.slane %v847_v46, 5  ;;  %v728_v1 = vld [vmem:[%s7392_s21 + $0x38] sm:$0x1]  ;;  %v845_v2 = vrot.slane %v844_v55, 4 }
  0xc4   : > { %6220 = vmatprep.mubr.bf16.mxu1 %v5542_v54  ;;  %v5543_v19 = vcombine.low %v802_v6, %v812_v13  ;;  %v821_v37 = vrot.slane %v820_v26, 4  ;;  %v836_v48 = vsel %vm7578_vm8, %v831_v38, %v835_v30  ;;  %v5707_v54 = vcombine.low %v3195_v39, %v3198_v49  ;;  %v3059_v6 = vld [vmem:[%s7392_s21 + $0x90] sm:$0xc]  ;;  %v3061_v13 = vld [vmem:[%s7392_s21 + $0x98] sm:$0x3] }
  0xc5   : > { %v859_v61 = vrot.slane %v857_v50, 5  ;;  %v854_v7 = vor.u32 %v853_v60, %v849_v56  ;;  %v3202_v8 = vsel %vm7480_vm5, %v5675_v63, %v3201_v0  ;;  %v3203_v9 = vrot.slane %v3201_v0, 4  ;;  %v733_v63 = vld [vmem:[%s7392_s21 + $0x4c] sm:$0xf] }
  0xc6   : > { %v873_v21 = vrot.slane %v871_v10, 5  ;;  %v881_v22 = vshll.u32 %v728_v1, 16  ;;  %v5676_v29 = vrot.slane %v3059_v6, 10  ;;  %v3211_v34 = vrot.slane %v3061_v13, 6  ;;  %v3066_v10 = vld [vmem:[%s7392_s21 + $0xac] sm:$0xf] }
  0xc7   : > { %6377 = vmatmul.mubr.bf16.gmra.mrb[12].mxu0 %v5704_v43  ;;  %v7014_v43 = vld [vmem:[%s7377_s11 + $0x168] sm:$0xff]   ;;  %v3205_v20 = vsel %vm7480_vm5, %v3203_v9, %v3204_v3  ;;  %v886_v39 = vshrl.u32 %v729_v17, 16  ;;  %v3210_v44 = vrot.slane %v3208_v33, 4  ;;  %v889_v45 = vshll.u32 %v729_v17, 16 }
  0xc8   : > { %6380 = vmatprep.mubr.bf16.mxu0 %v5705_v51  ;;  %v726_v51 = vld [vmem:[%s7392_s21 + $0x30] sm:$0xf]  ;;  %6406 = vmatprep.subr.bf16.mxu0 %v7014_v43  ;;  %v5708_v26 = vcombine.low %v3202_v8, %v3205_v20  ;;  %v883_v31 = vrot.slane %v881_v22, 5  ;;  %v878_v38 = vor.u32 %v877_v28, %v873_v21  ;;  %v895_v46 = vshll.u32 %v730_v24, 16  ;;  %v3065_v9 = vld [vmem:[%s7392_s21 + $0xa8] sm:$0xc] }
  0xc9   : > { %6407 = vmatpush3.bf16.msra.mxu0 %v7014_v43  ;;  %v862_v4 = vshrl.u32 %v726_v51, 16  ;;  %v865_v5 = vshll.u32 %v726_v51, 16  ;;  %v3209_v43 = vsel %vm7480_vm5, %v5676_v29, %v3208_v33  ;;  %v888_v50 = vrot.slane %v886_v39, 4  ;;  %v737_v33 = vld [vmem:[%s7392_s21 + $0x5c] sm:$0x1] }
  0xca   : > { %6221 = vmatmul.mubr.bf16.vlgmr.msra.gmra.mrb[0].mxu1 %v5543_v19  ;;  %6408 = vmatprep.subr.bf16.mxu0 %v7016_v59  ;;  %v855_v19 = vrot.slane %v854_v7, 4  ;;  %v879_v49 = vrot.slane %v878_v38, 4  ;;  %v899_v51 = vshrl.u32 %v730_v24, 16  ;;  %v897_v55 = vrot.slane %v895_v46, 5  ;;  %v3068_v38 = vld [vmem:[%s7392_s21 + $0xb4] sm:$0xc] }
  0xcb   : > { %6253 = vmatpush3.bf16.msra.mxu1 %v7556_v62  ;;  %v826_v62 = vsel %vm7578_vm8, %v821_v37, %v825_v15  ;;  %v864_v14 = vrot.slane %v862_v4, 4  ;;  %v867_v15 = vrot.slane %v865_v5, 5  ;;  %v3215_v3 = vrot.slane %v3063_v42, 6  ;;  %v734_v4 = vld [vmem:[%s7392_s21 + $0x50] sm:$0x1]  ;;  %v7023_v39 = vld [vmem:[%s7377_s11 + $0xb8] sm:$0xff]  }
  0xcc   : > { %6254 = vmatprep.subr.bf16.mxu1 %v7011_v12  ;;  %v5544_v53 = vcombine.low %v826_v62, %v836_v48  ;;  %v860_v30 = vsel %vm7578_vm8, %v855_v19, %v859_v61  ;;  %v7655_v62 = vld [vmem:[%s7377_s11 + $0x180] sm:$0xff]   ;;  %v901_v60 = vrot.slane %v899_v51, 4  ;;  %v5677_v61 = vrot.slane %v3062_v41, 10 }
  0xcd   : > { %6409 = vmatpush3.bf16.msra.mxu0 %v7016_v59  ;;  %v868_v27 = vor.u32 %v867_v15, %v864_v14  ;;  %v3218_v6 = vrot.slane %v3064_v47, 6  ;;  %v910_v7 = vshrl.u32 %v732_v57, 16  ;;  %v913_v8 = vshll.u32 %v732_v57, 16 }
  0xce   : > { %6224 = vmatprep.mubr.bf16.mxu1 %v5544_v53  ;;  %6410 = vmatprep.subr.bf16.mxu0 %v7017_v18  ;;  %v3212_v53 = vsel %vm7480_vm5, %v3210_v44, %v3211_v34  ;;  %v902_v5 = vor.u32 %v901_v60, %v897_v55  ;;  %v3217_v14 = vrot.slane %v3215_v3, 4  ;;  %v919_v15 = vshll.u32 %v733_v63, 16 }
  0xcf   : > { %6381 = vmatmul.mubr.bf16.gmra.mrb[16].mxu0 %v5706_v25  ;;  %6255 = vmatpush3.bf16.msra.mxu1 %v7011_v12  ;;  %v850_v12 = vsel %vm7578_vm8, %v845_v2, %v849_v56  ;;  %v7018_v25 = vld [vmem:[%s7377_s11 + $0xa0] sm:$0xff]   ;;  %v869_v37 = vrot.slane %v868_v27, 4  ;;  %v905_v56 = vshll.u32 %v731_v35, 16  ;;  %v5709_v59 = vcombine.low %v3209_v43, %v3212_v53  ;;  %v736_v27 = vld [vmem:[%s7392_s21 + $0x58] sm:$0xf] }
  0xd0   : > { %6384 = vmatprep.mubr.bf16.mxu0 %v5707_v54  ;;  %6256 = vmatprep.subr.bf16.mxu1 %v7013_v52  ;;  %v5545_v36 = vcombine.low %v850_v12, %v860_v30  ;;  %v891_v54 = vrot.slane %v889_v45, 5  ;;  %v3216_v12 = vsel %vm7480_vm5, %v5677_v61, %v3215_v3  ;;  %v903_v17 = vrot.slane %v902_v5, 4  ;;  %v3069_v45 = vld [vmem:[%s7392_s21 + $0xb8] sm:$0xf]  ;;  %v739_v5 = vld [vmem:[%s7392_s21 + $0x64] sm:$0xf] }
  0xd1   : > { %6411 = vmatpush3.bf16.msra.mxu0 %v7017_v18  ;;  %v874_v48 = vsel %vm7578_vm8, %v869_v37, %v873_v21  ;;  %v907_v2 = vrot.slane %v905_v56, 5  ;;  %v912_v18 = vrot.slane %v910_v7, 4  ;;  %v915_v19 = vrot.slane %v913_v8, 5  ;;  %v735_v21 = vld [vmem:[%s7392_s21 + $0x54] sm:$0xf] }
  0xd2   : > { %6225 = vmatmul.mubr.bf16.gmra.mrb[4].mxu1 %v5545_v36  ;;  %6444 = vmatprep.subr.bf16.mxu0 %v7655_v62  ;;  %v892_v1 = vor.u32 %v891_v54, %v888_v50  ;;  %v923_v20 = vshrl.u32 %v733_v63, 16  ;;  %v3219_v24 = vsel %vm7480_vm5, %v3217_v14, %v3218_v6  ;;  %v5678_v36 = vrot.slane %v3065_v9, 10  ;;  %v3070_v50 = vld [vmem:[%s7392_s21 + $0xbc] sm:$0x3]  ;;  %v740_v8 = vld [vmem:[%s7392_s21 + $0x68] sm:$0x1] }
  0xd3   : > { %6257 = vmatpush3.bf16.msra.mxu1 %v7013_v52  ;;  %v7019_v52 = vld [vmem:[%s7377_s11 + $0xa8] sm:$0xff]   ;;  %v908_v28 = vsel %vm7578_vm8, %v903_v17, %v907_v2  ;;  %v5710_v29 = vcombine.low %v3216_v12, %v3219_v24  ;;  %v916_v30 = vor.u32 %v915_v19, %v912_v18  ;;  %v3222_v37 = vrot.slane %v3066_v10, 6 }
  0xd4   : > { %6258 = vmatprep.subr.bf16.mxu1 %v7015_v58  ;;  %v893_v13 = vrot.slane %v892_v1, 4  ;;  %v3225_v43 = vrot.slane %v3067_v16, 6  ;;  %v934_v44 = vshrl.u32 %v735_v21, 16  ;;  %v947_v54 = vshrl.u32 %v736_v27, 16 }
  0xd5   : > { %v917_v41 = vrot.slane %v916_v30, 4  ;;  %v3223_v46 = vsel %vm7480_vm5, %v5678_v36, %v3222_v37  ;;  %v3224_v47 = vrot.slane %v3222_v37, 4  ;;  %v5679_v63 = vrot.slane %v3068_v38, 10 }
  0xd6   : > { %v898_v22 = vsel %vm7578_vm8, %v893_v13, %v897_v55  ;;  %v936_v53 = vrot.slane %v934_v44, 4  ;;  %v949_v61 = vrot.slane %v947_v54, 4  ;;  %v3232_v7 = vrot.slane %v3070_v50, 6 }
  0xd7   : > { %6385 = vmatmul.mubr.bf16.gmra.mrb[20].mxu0 %v5708_v26  ;;  %6259 = vmatpush3.bf16.msra.mxu1 %v7015_v58  ;;  %v884_v58 = vsel %vm7578_vm8, %v879_v49, %v883_v31  ;;  %v929_v26 = vshll.u32 %v734_v4, 16  ;;  %v925_v31 = vrot.slane %v923_v20, 4  ;;  %v5547_v34 = vcombine.low %v898_v22, %v908_v28 }
  0xd8   : > { %6260 = vmatprep.subr.bf16.mxu1 %v7018_v25  ;;  %v5546_v0 = vcombine.low %v874_v48, %v884_v58  ;;  %6388 = vmatprep.mubr.bf16.mxu0 %v5709_v59  ;;  %v937_v48 = vshll.u32 %v735_v21, 16  ;;  %v943_v49 = vshll.u32 %v736_v27, 16  ;;  %v3226_v55 = vsel %vm7480_vm5, %v3224_v47, %v3225_v43  ;;  %v741_v43 = vld [vmem:[%s7392_s21 + $0x6c] sm:$0xf] }
  0xd9   : > { %v931_v35 = vrot.slane %v929_v26, 5  ;;  %v953_v58 = vshll.u32 %v737_v33, 16  ;;  %v5711_v60 = vcombine.low %v3223_v46, %v3226_v55  ;;  %v3229_v4 = vrot.slane %v3069_v45, 6  ;;  %v3623_v26 = vld [vmem:[%s7392_s21 + $0x4] sm:$0xf] }
  0xda   : > { %6228 = vmatprep.mubr.bf16.mxu1 %v5546_v0  ;;  %v939_v56 = vrot.slane %v937_v48, 5  ;;  %v945_v57 = vrot.slane %v943_v49, 5  ;;  %v738_v0 = vld [vmem:[%s7392_s21 + $0x60] sm:$0xf]  ;;  %v967_v14 = vshll.u32 %v739_v5, 16  ;;  %v971_v19 = vshrl.u32 %v739_v5, 16 }
  0xdb   : > { %6261 = vmatpush3.bf16.msra.mxu1 %v7018_v25  ;;  %v921_v25 = vrot.slane %v919_v15, 5  ;;  %v955_v3 = vrot.slane %v953_v58, 5  ;;  %v958_v9 = vshrl.u32 %v738_v0, 16  ;;  %v961_v10 = vshll.u32 %v738_v0, 16  ;;  %v7701_v15 = vld [vmem:[%s7377_s11 + $0xc0] sm:$0xff]  }
  0xdc   : > { %6262 = vmatprep.subr.bf16.mxu1 %v7019_v52  ;;  %6229 = vmatmul.mubr.bf16.gmra.mrb[8].mxu1 %v5547_v34  ;;  %v940_v2 = vor.u32 %v939_v56, %v936_v53  ;;  %v950_v6 = vor.u32 %v949_v61, %v945_v57  ;;  %v3230_v13 = vsel %vm7480_vm5, %v5679_v63, %v3229_v4  ;;  %v3231_v12 = vrot.slane %v3229_v4, 4  ;;  %v742_v48 = vld [vmem:[%s7392_s21 + $0x70] sm:$0xf]  ;;  %v743_v55 = vld [vmem:[%s7392_s21 + $0x74] sm:$0x1] }
  0xdd   : > { %v926_v42 = vor.u32 %v925_v31, %v921_v25  ;;  %v922_v51 = vsel %vm7578_vm8, %v917_v41, %v921_v25  ;;  %v960_v17 = vrot.slane %v958_v9, 4  ;;  %v963_v18 = vrot.slane %v961_v10, 5  ;;  %v3622_v25 = vld [vmem:[%s7392_s21] sm:$0xc]  ;;  %v3624_v31 = vld [vmem:[%s7392_s21 + $0x8] sm:$0x7] }
  0xde   : > { %v951_v16 = vrot.slane %v950_v6, 4  ;;  %v3233_v21 = vsel %vm7480_vm5, %v3231_v12, %v3232_v7  ;;  %v969_v22 = vrot.slane %v967_v14, 5  ;;  %v977_v24 = vshll.u32 %v740_v8, 16  ;;  %v3625_v58 = vld [vmem:[%s7392_s21 + $0xc] sm:$0xc] }
  0xdf   : > { %6263 = vmatpush3.bf16.msra.mxu1 %v7019_v52  ;;  %6389 = vmatmul.mubr.bf16.gmra.mrb[24].mxu0 %v5710_v29  ;;  %v927_v52 = vrot.slane %v926_v42, 4  ;;  %v5712_v28 = vcombine.low %v3230_v13, %v3233_v21  ;;  %v964_v29 = vor.u32 %v963_v18, %v960_v17  ;;  %v973_v30 = vrot.slane %v971_v19, 4  ;;  %v3626_v5 = vld [vmem:[%s7392_s21 + $0x10] sm:$0xf]  ;;  %v3627_v12 = vld [vmem:[%s7392_s21 + $0x14] sm:$0x7] }
  0xe0   : > { %6264 = vmatprep.subr.bf16.mxu1 %v7021_v11  ;;  %6392 = vmatprep.mubr.bf16.mxu0 %v5711_v60  ;;  %v956_v27 = vsel %vm7578_vm8, %v951_v16, %v955_v3  ;;  %v979_v34 = vrot.slane %v977_v24, 5  ;;  %v3674_v36 = vshrl.u32 %v3622_v25, 16  ;;  %v3677_v37 = vshll.u32 %v3622_v25, 16 }
  0xe1   : > { %v932_v59 = vsel %vm7578_vm8, %v927_v52, %v931_v35  ;;  %v965_v23 = vrot.slane %v964_v29, 4  ;;  %v974_v35 = vor.u32 %v973_v30, %v969_v22  ;;  %v3683_v38 = vshrl.u32 %v3623_v26, 16  ;;  %v745_v30 = vld [vmem:[%s7392_s21 + $0x7c] sm:$0xf] }
  0xe2   : > { %v5548_v1 = vcombine.low %v922_v51, %v932_v59  ;;  %v3693_v41 = vshrl.u32 %v3624_v31, 16  ;;  %v3696_v42 = vshll.u32 %v3624_v31, 16  ;;  %v3676_v46 = vrot.slane %v3674_v36, 6  ;;  %v3628_v36 = vld [vmem:[%s7392_s21 + $0x18] sm:$0xc] }
  0xe3   : > { %6265 = vmatpush3.bf16.msra.mxu1 %v7021_v11  ;;  %v941_v11 = vrot.slane %v940_v2, 4  ;;  %v970_v44 = vsel %vm7578_vm8, %v965_v23, %v969_v22  ;;  %v975_v45 = vrot.slane %v974_v35, 4  ;;  %v3679_v47 = vrot.slane %v3677_v37, 7  ;;  %v746_v23 = vld [vmem:[%s7392_s21 + $0x80] sm:$0x1] }
  0xe4   : > { %6266 = vmatprep.subr.bf16.mxu1 %v7023_v39  ;;  %6232 = vmatprep.mubr.bf16.mxu1 %v5548_v1  ;;  %v3685_v49 = vrot.slane %v3683_v38, 6  ;;  %v3695_v51 = vrot.slane %v3693_v41, 6  ;;  %v3698_v52 = vrot.slane %v3696_v42, 7  ;;  %v982_v56 = vshrl.u32 %v741_v43, 16 }
  0xe5   : > { %v946_v20 = vsel %vm7578_vm8, %v941_v11, %v945_v57  ;;  %v980_v53 = vsel %vm7578_vm8, %v975_v45, %v979_v34  ;;  %v3680_v54 = vor.u32 %v3679_v47, %v3676_v46  ;;  %v985_v57 = vshll.u32 %v741_v43, 16 }
  0xe6   : > { %v5549_v33 = vcombine.low %v946_v20, %v956_v27  ;;  %v5550_v59 = vcombine.low %v970_v44, %v980_v53  ;;  %v3699_v63 = vor.u32 %v3698_v52, %v3695_v51  ;;  %v991_v0 = vshll.u32 %v742_v48, 16  ;;  %v744_v20 = vld [vmem:[%s7392_s21 + $0x78] sm:$0xf] }
  0xe7   : > { %6267 = vmatpush3.bf16.msra.mxu1 %v7023_v39  ;;  %6393 = vmatmul.mubr.bf16.gmra.mrb[28].mxu0 %v5712_v28  ;;  %v3686_v39 = vshll.u32 %v3623_v26, 16  ;;  %v3681_v1 = vrot.slane %v3680_v54, 4  ;;  %v984_v2 = vrot.slane %v982_v56, 4  ;;  %v987_v3 = vrot.slane %v985_v57, 5 }
  0xe8   : > { %6492 = vmatprep.subr.bf16.mxu1 %v7701_v15  ;;  %6233 = vmatmul.mubr.bf16.gmra.mrb[12].mxu1 %v5549_v33  ;;  %v995_v4 = vshrl.u32 %v742_v48, 16  ;;  %v993_v7 = vrot.slane %v991_v0, 5  ;;  %v1001_v8 = vshll.u32 %v743_v55, 16  ;;  %v3702_v9 = vshrl.u32 %v3625_v58, 16 }
  0xe9   : > { %v3688_v50 = vrot.slane %v3686_v39, 7  ;;  %6236 = vmatprep.mubr.bf16.mxu1 %v5550_v59  ;;  %v988_v11 = vor.u32 %v987_v3, %v984_v2  ;;  %v3705_v14 = vshll.u32 %v3625_v58, 16  ;;  %v3711_v19 = vshrl.u32 %v3626_v5, 16  ;;  %v3630_v58 = vld [vmem:[%s7392_s21 + $0x20] sm:$0x7] }
  0xea   : > { %v997_v13 = vrot.slane %v995_v4, 4  ;;  %v1003_v17 = vrot.slane %v1001_v8, 5  ;;  %v3704_v18 = vrot.slane %v3702_v9, 6  ;;  %v3714_v27 = vshll.u32 %v3626_v5, 16 }
  0xeb   : > { %v3689_v61 = vor.u32 %v3688_v50, %v3685_v49  ;;  %v989_v22 = vrot.slane %v988_v11, 4  ;;  %v3707_v25 = vrot.slane %v3705_v14, 7  ;;  %v3713_v26 = vrot.slane %v3711_v19, 6  ;;  %v3629_v50 = vld [vmem:[%s7392_s21 + $0x1c] sm:$0xf] }
  0xec   : > { %v998_v24 = vor.u32 %v997_v13, %v993_v7  ;;  %v3721_v28 = vshrl.u32 %v3627_v12, 16  ;;  %v3724_v29 = vshll.u32 %v3627_v12, 16  ;;  %v1006_v35 = vshrl.u32 %v744_v20, 16  ;;  %v748_v11 = vld [vmem:[%s7392_s21 + $0x88] sm:$0xf] }
  0xed   : > { %v3691_v6 = vrot.slane %v3689_v61, 4  ;;  %v3690_v10 = vsel %vm7723_vm11, %v3681_v1, %v3689_v61  ;;  %v994_v31 = vsel %vm7578_vm8, %v989_v22, %v993_v7  ;;  %v3708_v34 = vor.u32 %v3707_v25, %v3704_v18  ;;  %v7022_v13 = vld [vmem:[%s7377_s11 + $0x188] sm:$0xff]  }
  0xee   : > { %v999_v33 = vrot.slane %v998_v24, 4  ;;  %v3716_v37 = vrot.slane %v3714_v27, 7  ;;  %v3723_v38 = vrot.slane %v3721_v28, 6  ;;  %v3726_v39 = vrot.slane %v3724_v29, 7  ;;  %v3631_v28 = vld [vmem:[%s7392_s21 + $0x24] sm:$0xc] }
  0xef   : > { %v3700_v16 = vsel %vm7723_vm11, %v3691_v6, %v3699_v63  ;;  %v1009_v41 = vshll.u32 %v744_v20, 16  ;;  %v3709_v43 = vrot.slane %v3708_v34, 4  ;;  %v1008_v44 = vrot.slane %v1006_v35, 4  ;;  %v747_v6 = vld [vmem:[%s7392_s21 + $0x84] sm:$0xf] }
  0xf0   : > { %v5738_v21 = vcombine.low %v3690_v10, %v3700_v16  ;;  %v1004_v42 = vsel %vm7578_vm8, %v999_v33, %v1003_v17  ;;  %v1015_v45 = vshll.u32 %v745_v30, 16  ;;  %v3717_v47 = vor.u32 %v3716_v37, %v3713_v26  ;;  %v749_v20 = vld [vmem:[%s7392_s21 + $0x8c] sm:$0x1]  ;;  %v3632_v34 = vld [vmem:[%s7392_s21 + $0x28] sm:$0xf] }
  0xf1   : > { %v5551_v46 = vcombine.low %v994_v31, %v1004_v42  ;;  %v3727_v48 = vor.u32 %v3726_v39, %v3723_v38  ;;  %v1011_v49 = vrot.slane %v1009_v41, 5  ;;  %v1019_v52 = vshrl.u32 %v745_v30, 16 }
  0xf2   : > { %6412 = vmatprep.mubr.bf16.mxu0 %v5738_v21  ;;  %v1017_v51 = vrot.slane %v1015_v45, 5  ;;  %v1025_v53 = vshll.u32 %v746_v23, 16  ;;  %v3730_v54 = vshrl.u32 %v3628_v36, 16  ;;  %v3718_v55 = vsel %vm7723_vm11, %v3709_v43, %v3717_v47  ;;  %v7024_v23 = vld [vmem:[%s7377_s11 + $0x190] sm:$0xff]  }
  0xf3   : > { %6237 = vmatmul.mubr.bf16.gmra.mrb[16].mxu1 %v5551_v46  ;;  %v3719_v56 = vrot.slane %v3717_v47, 4  ;;  %v1012_v57 = vor.u32 %v1011_v49, %v1008_v44  ;;  %v3733_v59 = vshll.u32 %v3628_v36, 16  ;;  %v1021_v61 = vrot.slane %v1019_v52, 4  ;;  %v3633_v44 = vld [vmem:[%s7392_s21 + $0x2c] sm:$0x7] }
  0xf4   : > { %v1027_v63 = vrot.slane %v1025_v53, 5  ;;  %v3732_v0 = vrot.slane %v3730_v54, 6  ;;  %v3739_v1 = vshrl.u32 %v3629_v50, 16  ;;  %v3742_v5 = vshll.u32 %v3629_v50, 16  ;;  %v750_v52 = vld [vmem:[%s7392_s21 + $0x90] sm:$0xf] }
  0xf5   : > { %v3728_v2 = vsel %vm7723_vm11, %v3719_v56, %v3727_v48  ;;  %v1013_v3 = vrot.slane %v1012_v57, 4  ;;  %v3735_v4 = vrot.slane %v3733_v59, 7  ;;  %v1022_v8 = vor.u32 %v1021_v61, %v1017_v51  ;;  %v7025_v53 = vld [vmem:[%s7377_s11 + $0x198] sm:$0xff]  }
  0xf6   : > { %v5739_v7 = vcombine.low %v3718_v55, %v3728_v2  ;;  %v3741_v9 = vrot.slane %v3739_v1, 6  ;;  %v3749_v10 = vshrl.u32 %v3630_v58, 16  ;;  %v3744_v16 = vrot.slane %v3742_v5, 7 }
  0xf7   : > { %v1018_v12 = vsel %vm7578_vm8, %v1013_v3, %v1017_v51  ;;  %v3736_v14 = vor.u32 %v3735_v4, %v3732_v0  ;;  %v3752_v17 = vshll.u32 %v3630_v58, 16  ;;  %v1023_v18 = vrot.slane %v1022_v8, 4  ;;  %v751_v58 = vld [vmem:[%s7392_s21 + $0x94] sm:$0xf]  ;;  %v752_v3 = vld [vmem:[%s7392_s21 + $0x98] sm:$0x1] }
  0xf8   : > { %6413 = vmatmul.mubr.bf16.vlgmr.msra.gmra.mrb[0].mxu0 %v5739_v7  ;;  %v3751_v19 = vrot.slane %v3749_v10, 6  ;;  %v1030_v21 = vshrl.u32 %v747_v6, 16  ;;  %v1033_v22 = vshll.u32 %v747_v6, 16  ;;  %v3745_v25 = vor.u32 %v3744_v16, %v3741_v9  ;;  %v3634_v10 = vld [vmem:[%s7392_s21 + $0x30] sm:$0xc] }
  0xf9   : > { %v3737_v24 = vrot.slane %v3736_v14, 4  ;;  %v3754_v26 = vrot.slane %v3752_v17, 7  ;;  %v1039_v27 = vshll.u32 %v748_v11, 16  ;;  %6445 = vmatpush3.bf16.msra.mxu0 %v7655_v62  ;;  %v1028_v29 = vsel %vm7578_vm8, %v1023_v18, %v1027_v63  ;;  %v3635_v17 = vld [vmem:[%s7392_s21 + $0x34] sm:$0xf] }
  0xfa   : > { %v1032_v30 = vrot.slane %v1030_v21, 4  ;;  %v1035_v31 = vrot.slane %v1033_v22, 5  ;;  %v1043_v33 = vshrl.u32 %v748_v11, 16  ;;  %6446 = vmatprep.subr.bf16.mxu0 %v7022_v13  ;;  %v5552_v35 = vcombine.low %v1018_v12, %v1028_v29  ;;  %v7026_v11 = vld [vmem:[%s7377_s11 + $0x1a0] sm:$0xff]   ;;  %v3636_v29 = vld [vmem:[%s7392_s21 + $0x38] sm:$0x7] }
  0xfb   : > { %v3746_v36 = vsel %vm7723_vm11, %v3737_v24, %v3745_v25  ;;  %v3747_v37 = vrot.slane %v3745_v25, 4  ;;  %v3755_v38 = vor.u32 %v3754_v26, %v3751_v19  ;;  %v1041_v41 = vrot.slane %v1039_v27, 5 }
  0xfc   : > { %v1036_v39 = vor.u32 %v1035_v31, %v1032_v30  ;;  %v1045_v62 = vrot.slane %v1043_v33, 4  ;;  %v1049_v42 = vshll.u32 %v749_v20, 16  ;;  %6240 = vmatprep.mubr.bf16.mxu1 %v5552_v35  ;;  %v3758_v45 = vshrl.u32 %v3631_v28, 16  ;;  %v7027_v33 = vld [vmem:[%s7377_s11 + $0x1a8] sm:$0xff]  }
  0xfd   : > { %v3756_v43 = vsel %vm7723_vm11, %v3747_v37, %v3755_v38  ;;  %v3761_v46 = vshll.u32 %v3631_v28, 16  ;;  %v3767_v47 = vshrl.u32 %v3632_v34, 16  ;;  %6447 = vmatpush3.bf16.msra.mxu0 %v7022_v13  ;;  %v3770_v57 = vshll.u32 %v3632_v34, 16  ;;  %v753_v37 = vld [vmem:[%s7392_s21 + $0x9c] sm:$0xf] }
  0xfe   : > { %v5740_v48 = vcombine.low %v3746_v36, %v3756_v43  ;;  %v1037_v49 = vrot.slane %v1036_v39, 4  ;;  %v1046_v50 = vor.u32 %v1045_v62, %v1041_v41  ;;  %v1051_v51 = vrot.slane %v1049_v42, 5  ;;  %6448 = vmatprep.subr.bf16.mxu0 %v7024_v23 }
  0xff   : > { %v3760_v54 = vrot.slane %v3758_v45, 6  ;;  %v3763_v55 = vrot.slane %v3761_v46, 7  ;;  %v3769_v56 = vrot.slane %v3767_v47, 6  ;;  %v3777_v63 = vshrl.u32 %v3633_v44, 16  ;;  %v754_v46 = vld [vmem:[%s7392_s21 + $0xa0] sm:$0xf] }
 0x100   : > { %6416 = vmatprep.mubr.bf16.mxu0 %v5740_v48  ;;  %v1042_v59 = vsel %vm7578_vm8, %v1037_v49, %v1041_v41  ;;  %v1047_v61 = vrot.slane %v1046_v50, 4  ;;  %v3780_v0 = vshll.u32 %v3633_v44, 16  ;;  %v3772_v2 = vrot.slane %v3770_v57, 7 }
 0x101   : > { %v3764_v1 = vor.u32 %v3763_v55, %v3760_v54  ;;  %v1054_v4 = vshrl.u32 %v750_v52, 16  ;;  %v1057_v5 = vshll.u32 %v750_v52, 16  ;;  %6449 = vmatpush3.bf16.msra.mxu0 %v7024_v23  ;;  %v3779_v7 = vrot.slane %v3777_v63, 6  ;;  %v755_v55 = vld [vmem:[%s7392_s21 + $0xa4] sm:$0x1] }
 0x102   : > { %v1052_v6 = vsel %vm7578_vm8, %v1047_v61, %v1051_v51  ;;  %v3782_v8 = vrot.slane %v3780_v0, 7  ;;  %v1063_v9 = vshll.u32 %v751_v58, 16  ;;  %6450 = vmatprep.subr.bf16.mxu0 %v7025_v53  ;;  %v3773_v14 = vor.u32 %v3772_v2, %v3769_v56  ;;  %v7028_v51 = vld [vmem:[%s7377_s11 + $0x1b0] sm:$0xff]   ;;  %v3637_v63 = vld [vmem:[%s7392_s21 + $0x3c] sm:$0xc] }
 0x103   : > { %v5553_v13 = vcombine.low %v1042_v59, %v1052_v6  ;;  %v3765_v12 = vrot.slane %v3764_v1, 4  ;;  %v1056_v16 = vrot.slane %v1054_v4, 4  ;;  %v1059_v19 = vrot.slane %v1057_v5, 5  ;;  %v3638_v4 = vld [vmem:[%s7392_s21 + $0x40] sm:$0xf] }
 0x104   : > { %v3783_v18 = vor.u32 %v3782_v8, %v3779_v7  ;;  %v1065_v20 = vrot.slane %v1063_v9, 5  ;;  %v1067_v21 = vshrl.u32 %v751_v58, 16  ;;  %v3775_v24 = vrot.slane %v3773_v14, 4  ;;  %v7029_v9 = vld [vmem:[%s7377_s11 + $0x1b8] sm:$0xff]  }
 0x105   : > { %6241 = vmatmul.mubr.bf16.gmra.mrb[20].mxu1 %v5553_v13  ;;  %v3774_v22 = vsel %vm7723_vm11, %v3765_v12, %v3773_v14  ;;  %v1073_v25 = vshll.u32 %v752_v3, 16  ;;  %v3786_v26 = vshrl.u32 %v3634_v10, 16  ;;  %6451 = vmatpush3.bf16.msra.mxu0 %v7025_v53  ;;  %v1060_v27 = vor.u32 %v1059_v19, %v1056_v16  ;;  %v3639_v13 = vld [vmem:[%s7392_s21 + $0x44] sm:$0x7] }
 0x106   : > { %v1069_v28 = vrot.slane %v1067_v21, 4  ;;  %v3789_v30 = vshll.u32 %v3634_v10, 16  ;;  %v3795_v31 = vshrl.u32 %v3635_v17, 16  ;;  %6452 = vmatprep.subr.bf16.mxu0 %v7026_v11  ;;  %v3784_v34 = vsel %vm7723_vm11, %v3775_v24, %v3783_v18 }
 0x107   : > { %v1075_v23 = vrot.slane %v1073_v25, 5  ;;  %v3788_v35 = vrot.slane %v3786_v26, 6  ;;  %v3798_v36 = vshll.u32 %v3635_v17, 16  ;;  %v5741_v38 = vcombine.low %v3774_v22, %v3784_v34  ;;  %v757_v26 = vld [vmem:[%s7392_s21 + $0xac] sm:$0xf] }
 0x108   : > { %v1061_v39 = vrot.slane %v1060_v27, 4  ;;  %v1070_v41 = vor.u32 %v1069_v28, %v1065_v20  ;;  %v3791_v62 = vrot.slane %v3789_v30, 7  ;;  %v3797_v42 = vrot.slane %v3795_v31, 6 }
 0x109   : > { %v3800_v43 = vrot.slane %v3798_v36, 7  ;;  %v3805_v44 = vshrl.u32 %v3636_v29, 16  ;;  %v3808_v45 = vshll.u32 %v3636_v29, 16  ;;  %6453 = vmatpush3.bf16.msra.mxu0 %v7026_v11  ;;  %v1078_v50 = vshrl.u32 %v753_v37, 16 }
 0x10a   : > { %6417 = vmatmul.mubr.bf16.gmra.mrb[4].mxu0 %v5741_v38  ;;  %v1066_v47 = vsel %vm7578_vm8, %v1061_v39, %v1065_v20  ;;  %v1071_v48 = vrot.slane %v1070_v41, 4  ;;  %v3792_v49 = vor.u32 %v3791_v62, %v3788_v35  ;;  %6454 = vmatprep.subr.bf16.mxu0 %v7027_v33  ;;  %v1081_v56 = vshll.u32 %v753_v37, 16  ;;  %v756_v20 = vld [vmem:[%s7392_s21 + $0xa8] sm:$0xf]  ;;  %v758_v38 = vld [vmem:[%s7392_s21 + $0xb0] sm:$0x1] }
 0x10b   : > { %v3801_v52 = vor.u32 %v3800_v43, %v3797_v42  ;;  %v3807_v53 = vrot.slane %v3805_v44, 6  ;;  %v3810_v54 = vrot.slane %v3808_v45, 7  ;;  %v1080_v59 = vrot.slane %v1078_v50, 4  ;;  %v3640_v44 = vld [vmem:[%s7392_s21 + $0x48] sm:$0xc] }
 0x10c   : > { %v1076_v57 = vsel %vm7578_vm8, %v1071_v48, %v1075_v23  ;;  %v3793_v58 = vrot.slane %v3792_v49, 4  ;;  %v1087_v61 = vshll.u32 %v754_v46, 16  ;;  %v1083_v3 = vrot.slane %v1081_v56, 5  ;;  %v3641_v49 = vld [vmem:[%s7392_s21 + $0x4c] sm:$0xf] }
 0x10d   : > { %v5554_v0 = vcombine.low %v1066_v47, %v1076_v57  ;;  %v3803_v1 = vrot.slane %v3801_v52, 4  ;;  %v3811_v2 = vor.u32 %v3810_v54, %v3807_v53  ;;  %6455 = vmatpush3.bf16.msra.mxu0 %v7027_v33  ;;  %v1091_v7 = vshrl.u32 %v754_v46, 16 }
 0x10e   : > { %v3802_v5 = vsel %vm7723_vm11, %v3793_v58, %v3801_v52  ;;  %v1089_v6 = vrot.slane %v1087_v61, 5  ;;  %v1097_v8 = vshll.u32 %v755_v55, 16  ;;  %6456 = vmatprep.subr.bf16.mxu0 %v7028_v51  ;;  %v1084_v11 = vor.u32 %v1083_v3, %v1080_v59  ;;  %v3642_v59 = vld [vmem:[%s7392_s21 + $0x50] sm:$0x7] }
 0x10f   : > { %6244 = vmatprep.mubr.bf16.mxu1 %v5554_v0  ;;  %v3812_v10 = vsel %vm7723_vm11, %v3803_v1, %v3811_v2  ;;  %v3814_v12 = vshrl.u32 %v3637_v63, 16  ;;  %v3817_v14 = vshll.u32 %v3637_v63, 16  ;;  %v1093_v17 = vrot.slane %v1091_v7, 4 }
 0x110   : > { %v5742_v16 = vcombine.low %v3802_v5, %v3812_v10  ;;  %v1099_v18 = vrot.slane %v1097_v8, 5  ;;  %v3823_v19 = vshrl.u32 %v3638_v4, 16  ;;  %v1085_v21 = vrot.slane %v1084_v11, 4  ;;  %v759_v5 = vld [vmem:[%s7392_s21 + $0xb4] sm:$0xf] }
 0x111   : > { %v3816_v22 = vrot.slane %v3814_v12, 6  ;;  %v3819_v24 = vrot.slane %v3817_v14, 7  ;;  %v3826_v25 = vshll.u32 %v3638_v4, 16  ;;  %6457 = vmatpush3.bf16.msra.mxu0 %v7028_v51  ;;  %v1094_v27 = vor.u32 %v1093_v17, %v1089_v6  ;;  %v760_v10 = vld [vmem:[%s7392_s21 + $0xb8] sm:$0xf] }
 0x112   : > { %6420 = vmatprep.mubr.bf16.mxu0 %v5742_v16  ;;  %v3825_v28 = vrot.slane %v3823_v19, 6  ;;  %v3833_v29 = vshrl.u32 %v3639_v13, 16  ;;  %v3836_v30 = vshll.u32 %v3639_v13, 16  ;;  %6458 = vmatprep.subr.bf16.mxu0 %v7029_v9  ;;  %v1090_v31 = vsel %vm7578_vm8, %v1085_v21, %v1089_v6 }
 0x113   : > { %v3820_v33 = vor.u32 %v3819_v24, %v3816_v22  ;;  %v3828_v34 = vrot.slane %v3826_v25, 7  ;;  %v1102_v23 = vshrl.u32 %v756_v20, 16  ;;  %v1095_v35 = vrot.slane %v1094_v27, 4 }
 0x114   : > { %v3835_v36 = vrot.slane %v3833_v29, 6  ;;  %v3838_v37 = vrot.slane %v3836_v30, 7  ;;  %v1105_v39 = vshll.u32 %v756_v20, 16  ;;  %v1111_v43 = vshll.u32 %v757_v26, 16 }
 0x115   : > { %v3821_v41 = vrot.slane %v3820_v33, 4  ;;  %v3829_v62 = vor.u32 %v3828_v34, %v3825_v28  ;;  %v1104_v42 = vrot.slane %v1102_v23, 4  ;;  %6459 = vmatpush3.bf16.msra.mxu0 %v7029_v9  ;;  %v1100_v45 = vsel %vm7578_vm8, %v1095_v35, %v1099_v18  ;;  %v761_v18 = vld [vmem:[%s7392_s21 + $0xbc] sm:$0x1] }
 0x116   : > { %v3839_v46 = vor.u32 %v3838_v37, %v3835_v36  ;;  %v1107_v47 = vrot.slane %v1105_v39, 5  ;;  %v1115_v48 = vshrl.u32 %v757_v26, 16  ;;  %v5555_v50 = vcombine.low %v1090_v31, %v1100_v45  ;;  %v3643_v26 = vld [vmem:[%s7392_s21 + $0x54] sm:$0xc]  ;;  %v3644_v31 = vld [vmem:[%s7392_s21 + $0x58] sm:$0xf] }
 0x117   : > { %v3830_v51 = vsel %vm7723_vm11, %v3821_v41, %v3829_v62  ;;  %v3831_v52 = vrot.slane %v3829_v62, 4  ;;  %v1113_v53 = vrot.slane %v1111_v43, 5  ;;  %v1121_v56 = vshll.u32 %v758_v38, 16  ;;  %v3645_v43 = vld [vmem:[%s7392_s21 + $0x5c] sm:$0x7] }
 0x118   : > { %v1108_v54 = vor.u32 %v1107_v47, %v1104_v42  ;;  %v1117_v55 = vrot.slane %v1115_v48, 4  ;;  %v3842_v57 = vshrl.u32 %v3640_v44, 16  ;;  %6245 = vmatmul.mubr.bf16.gmra.mrb[24].mxu1 %v5555_v50  ;;  %v3845_v61 = vshll.u32 %v3640_v44, 16 }
 0x119   : > { %v3840_v58 = vsel %vm7723_vm11, %v3831_v52, %v3839_v46  ;;  %v3851_v63 = vshrl.u32 %v3641_v49, 16  ;;  %v3854_v0 = vshll.u32 %v3641_v49, 16  ;;  %v1123_v4 = vrot.slane %v1121_v56, 5  ;;  %v1537_v49 = vld [vmem:[%s7392_s21] sm:$0xe] }
 0x11a   : > { %v5743_v1 = vcombine.low %v3830_v51, %v3840_v58  ;;  %v1109_v2 = vrot.slane %v1108_v54, 4  ;;  %v1118_v3 = vor.u32 %v1117_v55, %v1113_v53  ;;  %v3844_v6 = vrot.slane %v3842_v57, 6  ;;  %v1538_v54 = vld [vmem:[%s7392_s21 + $0x4] sm:$0xf]  ;;  %v1539_v58 = vld [vmem:[%s7392_s21 + $0x8] sm:$0x1] }
 0x11b   : > { %v3847_v7 = vrot.slane %v3845_v61, 7  ;;  %v3853_v8 = vrot.slane %v3851_v63, 6  ;;  %v3856_v9 = vrot.slane %v3854_v0, 7  ;;  %v3861_v12 = vshrl.u32 %v3642_v59, 16  ;;  %v3646_v0 = vld [vmem:[%s7392_s21 + $0x60] sm:$0xc] }
 0x11c   : > { %6421 = vmatmul.mubr.bf16.gmra.mrb[8].mxu0 %v5743_v1  ;;  %v1114_v11 = vsel %vm7578_vm8, %v1109_v2, %v1113_v53  ;;  %v1119_v13 = vrot.slane %v1118_v3, 4  ;;  %v3864_v14 = vshll.u32 %v3642_v59, 16  ;;  %v1126_v19 = vshrl.u32 %v759_v5, 16 }
 0x11d   : > { %v3848_v16 = vor.u32 %v3847_v7, %v3844_v6  ;;  %v3857_v17 = vor.u32 %v3856_v9, %v3853_v8  ;;  %v1129_v20 = vshll.u32 %v759_v5, 16  ;;  %v3863_v22 = vrot.slane %v3861_v12, 6  ;;  %v3647_v6 = vld [vmem:[%s7392_s21 + $0x64] sm:$0xf]  ;;  %v3648_v12 = vld [vmem:[%s7392_s21 + $0x68] sm:$0x7] }
 0x11e   : > { %v1124_v21 = vsel %vm7578_vm8, %v1119_v13, %v1123_v4  ;;  %v3866_v24 = vrot.slane %v3864_v14, 7  ;;  %v1135_v25 = vshll.u32 %v760_v10, 16  ;;  %v1128_v30 = vrot.slane %v1126_v19, 4 }
 0x11f   : > { %v5556_v27 = vcombine.low %v1114_v11, %v1124_v21  ;;  %v3849_v28 = vrot.slane %v3848_v16, 4  ;;  %v3859_v29 = vrot.slane %v3857_v17, 4  ;;  %v1131_v34 = vrot.slane %v1129_v20, 5  ;;  %v1540_v20 = vld [vmem:[%s7392_s21 + $0xc] sm:$0xe] }
 0x120   : > { %v3867_v33 = vor.u32 %v3866_v24, %v3863_v22  ;;  %v1137_v23 = vrot.slane %v1135_v25, 5  ;;  %v1139_v35 = vshrl.u32 %v760_v10, 16  ;;  %v1145_v37 = vshll.u32 %v761_v18, 16 }
 0x121   : > { %6248 = vmatprep.mubr.bf16.mxu1 %v5556_v27  ;;  %v3858_v36 = vsel %vm7723_vm11, %v3849_v28, %v3857_v17  ;;  %v3870_v38 = vshrl.u32 %v3643_v26, 16  ;;  %v3873_v39 = vshll.u32 %v3643_v26, 16  ;;  %v1132_v62 = vor.u32 %v1131_v34, %v1128_v30  ;;  %v1541_v26 = vld [vmem:[%s7392_s21 + $0x10] sm:$0xf] }
 0x122   : > { %v3868_v41 = vsel %vm7723_vm11, %v3859_v29, %v3867_v33  ;;  %v1141_v42 = vrot.slane %v1139_v35, 4  ;;  %v3879_v44 = vshrl.u32 %v3644_v31, 16  ;;  %v1147_v46 = vrot.slane %v1145_v37, 5  ;;  %v3649_v33 = vld [vmem:[%s7392_s21 + $0x6c] sm:$0xc] }
 0x123   : > { %v5744_v45 = vcombine.low %v3858_v36, %v3868_v41  ;;  %v3872_v47 = vrot.slane %v3870_v38, 6  ;;  %v3875_v48 = vrot.slane %v3873_v39, 7  ;;  %v1133_v50 = vrot.slane %v1132_v62, 4  ;;  %v3650_v37 = vld [vmem:[%s7392_s21 + $0x70] sm:$0xf] }
 0x124   : > { %v1142_v51 = vor.u32 %v1141_v42, %v1137_v23  ;;  %v3881_v52 = vrot.slane %v3879_v44, 6  ;;  %v3882_v53 = vshll.u32 %v3644_v31, 16  ;;  %v3889_v56 = vshrl.u32 %v3645_v43, 16  ;;  %v1542_v31 = vld [vmem:[%s7392_s21 + $0x14] sm:$0x1] }
 0x125   : > { %6424 = vmatprep.mubr.bf16.mxu0 %v5744_v45  ;;  %v3876_v55 = vor.u32 %v3875_v48, %v3872_v47  ;;  %v3892_v57 = vshll.u32 %v3645_v43, 16  ;;  %v1138_v59 = vsel %vm7578_vm8, %v1133_v50, %v1137_v23  ;;  %v5566_v5 = vrot.slane %v1537_v49, 9  ;;  %v3651_v45 = vld [vmem:[%s7392_s21 + $0x74] sm:$0x7] }
 0x126   : > { %v1143_v61 = vrot.slane %v1142_v51, 4  ;;  %v3884_v63 = vrot.slane %v3882_v53, 7  ;;  %v3891_v2 = vrot.slane %v3889_v56, 6  ;;  %v1638_v9 = vrot.slane %v1538_v54, 5  ;;  %v1543_v51 = vld [vmem:[%s7392_s21 + $0x18] sm:$0xe] }
 0x127   : > { %v3877_v1 = vrot.slane %v3876_v55, 4  ;;  %v3894_v3 = vrot.slane %v3892_v57, 7  ;;  %v1641_v10 = vrot.slane %v1539_v58, 5  ;;  %v3898_v14 = vshrl.u32 %v3646_v0, 16  ;;  %v1544_v56 = vld [vmem:[%s7392_s21 + $0x1c] sm:$0xf] }
 0x128   : > { %v1148_v7 = vsel %vm7578_vm8, %v1143_v61, %v1147_v46  ;;  %v3885_v8 = vor.u32 %v3884_v63, %v3881_v52  ;;  %v3901_v16 = vshll.u32 %v3646_v0, 16  ;;  %v1639_v19 = vsel %vm7831_vm14, %v5566_v5, %v1638_v9  ;;  %v1545_v57 = vld [vmem:[%s7392_s21 + $0x20] sm:$0x1]  ;;  %v3652_v58 = vld [vmem:[%s7392_s21 + $0x78] sm:$0xc] }
 0x129   : > { %v5557_v11 = vcombine.low %v1138_v59, %v1148_v7  ;;  %v3895_v13 = vor.u32 %v3894_v3, %v3891_v2  ;;  %v1640_v32 = vrot.slane %v1638_v9, 4  ;;  %v3900_v21 = vrot.slane %v3898_v14, 6 }
 0x12a   : > { %v3886_v17 = vsel %vm7723_vm11, %v3877_v1, %v3885_v8  ;;  %v3887_v18 = vrot.slane %v3885_v8, 4  ;;  %v3903_v22 = vrot.slane %v3901_v16, 7  ;;  %v3907_v24 = vshrl.u32 %v3647_v6, 16 }
 0x12b   : > { %6249 = vmatmul.mubr.bf16.gmra.mrb[28].mxu1 %v5557_v11  ;;  %v3910_v25 = vshll.u32 %v3647_v6, 16  ;;  %v1642_v28 = vsel %vm7831_vm14, %v1640_v32, %v1641_v10  ;;  %v3917_v29 = vshrl.u32 %v3648_v12, 16  ;;  %v3920_v30 = vshll.u32 %v3648_v12, 16  ;;  %v3653_v10 = vld [vmem:[%s7392_s21 + $0x7c] sm:$0xf] }
 0x12c   : > { %v3896_v27 = vsel %vm7723_vm11, %v3887_v18, %v3895_v13  ;;  %v5599_v23 = vcombine.low %v1639_v19, %v1642_v28  ;;  %v3904_v35 = vor.u32 %v3903_v22, %v3900_v21  ;;  %v3909_v36 = vrot.slane %v3907_v24, 6  ;;  %v3654_v21 = vld [vmem:[%s7392_s21 + $0x80] sm:$0x7] }
 0x12d   : > { %v5745_v34 = vcombine.low %v3886_v17, %v3896_v27  ;;  %v3912_v38 = vrot.slane %v3910_v25, 7  ;;  %v3919_v39 = vrot.slane %v3917_v29, 6  ;;  %v3922_v41 = vrot.slane %v3920_v30, 7  ;;  %v1546_v29 = vld [vmem:[%s7392_s21 + $0x24] sm:$0xe] }
 0x12e   : > { %v5567_v62 = vrot.slane %v1540_v20, 9  ;;  %6268 = vmatprep.mubr.bf16.mxu1 %v5599_v23  ;;  %v3905_v42 = vrot.slane %v3904_v35, 4  ;;  %v1645_v43 = vrot.slane %v1541_v26, 5  ;;  %v1648_v44 = vrot.slane %v1542_v31, 5  ;;  %v1547_v30 = vld [vmem:[%s7392_s21 + $0x28] sm:$0xf] }
 0x12f   : > { %6425 = vmatmul.mubr.bf16.gmra.mrb[12].mxu0 %v5745_v34  ;;  %v3926_v46 = vshrl.u32 %v3649_v33, 16  ;;  %v3913_v47 = vor.u32 %v3912_v38, %v3909_v36  ;;  %v3923_v48 = vor.u32 %v3922_v41, %v3919_v39  ;;  %v3929_v49 = vshll.u32 %v3649_v33, 16  ;;  %v7031_v31 = vld [vmem:[%s7377_s11 + $0xc8] sm:$0xff]   ;;  %v3655_v41 = vld [vmem:[%s7392_s21 + $0x84] sm:$0xc] }
 0x130   : > { %v3935_v50 = vshrl.u32 %v3650_v37, 16  ;;  %v1646_v52 = vsel %vm7831_vm14, %v5567_v62, %v1645_v43  ;;  %v1647_v53 = vrot.slane %v1645_v43, 4  ;;  %v3938_v55 = vshll.u32 %v3650_v37, 16  ;;  %v1548_v35 = vld [vmem:[%s7392_s21 + $0x2c] sm:$0x1] }
 0x131   : > { %v3928_v54 = vrot.slane %v3926_v46, 6  ;;  %v3914_v59 = vsel %vm7723_vm11, %v3905_v42, %v3913_v47  ;;  %v3915_v61 = vrot.slane %v3913_v47, 4  ;;  %v3931_v63 = vrot.slane %v3929_v49, 7 }
 0x132   : > { %v3937_v0 = vrot.slane %v3935_v50, 6  ;;  %v1649_v1 = vsel %vm7831_vm14, %v1647_v53, %v1648_v44  ;;  %v3940_v2 = vrot.slane %v3938_v55, 7  ;;  %v3945_v3 = vshrl.u32 %v3651_v45, 16  ;;  %v7032_v50 = vld [vmem:[%s7377_s11 + $0xd0] sm:$0xff]   ;;  %v3657_v53 = vld [vmem:[%s7392_s21 + $0x8c] sm:$0x7] }
 0x133   : > { %v3948_v5 = vshll.u32 %v3651_v45, 16  ;;  %v3924_v6 = vsel %vm7723_vm11, %v3915_v61, %v3923_v48  ;;  %v5600_v7 = vcombine.low %v1646_v52, %v1649_v1  ;;  %v3932_v8 = vor.u32 %v3931_v63, %v3928_v54  ;;  %v3656_v45 = vld [vmem:[%s7392_s21 + $0x88] sm:$0xf]  ;;  %v1549_v61 = vld [vmem:[%s7392_s21 + $0x30] sm:$0xe] }
 0x134   : > { %v5568_v9 = vrot.slane %v1543_v51, 9  ;;  %v5746_v11 = vcombine.low %v3914_v59, %v3924_v6  ;;  %v3941_v13 = vor.u32 %v3940_v2, %v3937_v0  ;;  %v3947_v12 = vrot.slane %v3945_v3, 6  ;;  %v1550_v3 = vld [vmem:[%s7392_s21 + $0x34] sm:$0xf] }
 0x135   : > { %v3950_v14 = vrot.slane %v3948_v5, 7  ;;  %6269 = vmatmul.mubr.bf16.vlgmr.msra.gmra.mrb[0].mxu1 %v5600_v7  ;;  %v3933_v16 = vrot.slane %v3932_v8, 4  ;;  %v1652_v17 = vrot.slane %v1544_v56, 5  ;;  %v1655_v18 = vrot.slane %v1545_v57, 5 }
 0x136   : > { %v3954_v19 = vshrl.u32 %v3652_v58, 16  ;;  %6428 = vmatprep.mubr.bf16.mxu0 %v5746_v11  ;;  %v3943_v32 = vrot.slane %v3941_v13, 4  ;;  %6500 = vmatpush3.bf16.msra.mxu1 %v7701_v15  ;;  %v3957_v22 = vshll.u32 %v3652_v58, 16  ;;  %v3963_v24 = vshrl.u32 %v3653_v10, 16 }
 0x137   : > { %v3951_v20 = vor.u32 %v3950_v14, %v3947_v12  ;;  %v3942_v25 = vsel %vm7723_vm11, %v3933_v16, %v3941_v13  ;;  %v1653_v26 = vsel %vm7831_vm14, %v5568_v9, %v1652_v17  ;;  %v1654_v27 = vrot.slane %v1652_v17, 4  ;;  %6493 = vmatprep.subr.bf16.mxu1 %v7031_v31  ;;  %v1551_v9 = vld [vmem:[%s7392_s21 + $0x38] sm:$0x1]  ;;  %v3658_v16 = vld [vmem:[%s7392_s21 + $0x90] sm:$0xc] }
 0x138   : > { %v3956_v28 = vrot.slane %v3954_v19, 6  ;;  %v3959_v33 = vrot.slane %v3957_v22, 7  ;;  %v3965_v34 = vrot.slane %v3963_v24, 6  ;;  %v3966_v23 = vshll.u32 %v3653_v10, 16  ;;  %v7033_v10 = vld [vmem:[%s7377_s11 + $0xd8] sm:$0xff]  }
 0x139   : > { %v3952_v15 = vsel %vm7723_vm11, %v3943_v32, %v3951_v20  ;;  %v1656_v37 = vsel %vm7831_vm14, %v1654_v27, %v1655_v18  ;;  %v3973_v38 = vshrl.u32 %v3654_v21, 16  ;;  %v3976_v39 = vshll.u32 %v3654_v21, 16  ;;  %v3659_v17 = vld [vmem:[%s7392_s21 + $0x94] sm:$0xf]  ;;  %v3660_v27 = vld [vmem:[%s7392_s21 + $0x98] sm:$0x7] }
 0x13a   : > { %v5747_v36 = vcombine.low %v3942_v25, %v3952_v15  ;;  %v5601_v62 = vcombine.low %v1653_v26, %v1656_v37  ;;  %v3960_v42 = vor.u32 %v3959_v33, %v3956_v28  ;;  %v3968_v43 = vrot.slane %v3966_v23, 7  ;;  %6501 = vmatpush3.bf16.msra.mxu1 %v7031_v31  ;;  %v1552_v23 = vld [vmem:[%s7392_s21 + $0x3c] sm:$0xe] }
 0x13b   : > { %v5569_v44 = vrot.slane %v1546_v29, 9  ;;  %v3975_v46 = vrot.slane %v3973_v38, 6  ;;  %v3978_v47 = vrot.slane %v3976_v39, 7  ;;  %v1659_v48 = vrot.slane %v1547_v30, 5  ;;  %6494 = vmatprep.subr.bf16.mxu1 %v7032_v50 }
 0x13c   : > { %6429 = vmatmul.mubr.bf16.gmra.mrb[16].mxu0 %v5747_v36  ;;  %v1662_v49 = vrot.slane %v1548_v35, 5  ;;  %6272 = vmatprep.mubr.bf16.mxu1 %v5601_v62  ;;  %v3961_v51 = vrot.slane %v3960_v42, 4  ;;  %v3969_v52 = vor.u32 %v3968_v43, %v3965_v34  ;;  %v3982_v54 = vshrl.u32 %v3655_v41, 16  ;;  %v7034_v35 = vld [vmem:[%s7377_s11 + $0xe0] sm:$0xff]  }
 0x13d   : > { %v3985_v55 = vshll.u32 %v3655_v41, 16  ;;  %v3979_v56 = vor.u32 %v3978_v47, %v3975_v46  ;;  %v1660_v57 = vsel %vm7831_vm14, %v5569_v44, %v1659_v48  ;;  %v1661_v58 = vrot.slane %v1659_v48, 4  ;;  %v1553_v41 = vld [vmem:[%s7392_s21 + $0x40] sm:$0xf] }
 0x13e   : > { %v3991_v59 = vshrl.u32 %v3656_v45, 16  ;;  %v3970_v63 = vsel %vm7723_vm11, %v3961_v51, %v3969_v52  ;;  %v3971_v0 = vrot.slane %v3969_v52, 4  ;;  %v3984_v1 = vrot.slane %v3982_v54, 6  ;;  %6502 = vmatpush3.bf16.msra.mxu1 %v7032_v50  ;;  %v3661_v50 = vld [vmem:[%s7392_s21 + $0x9c] sm:$0xc] }
 0x13f   : > { %v3987_v2 = vrot.slane %v3985_v55, 7  ;;  %v1663_v5 = vsel %vm7831_vm14, %v1661_v58, %v1662_v49  ;;  %v3994_v7 = vshll.u32 %v3656_v45, 16  ;;  %v4001_v8 = vshrl.u32 %v3657_v53, 16  ;;  %6495 = vmatprep.subr.bf16.mxu1 %v7033_v10  ;;  %v1554_v45 = vld [vmem:[%s7392_s21 + $0x44] sm:$0x1] }
 0x140   : > { %v3993_v6 = vrot.slane %v3991_v59, 6  ;;  %v3980_v11 = vsel %vm7723_vm11, %v3971_v0, %v3979_v56  ;;  %v5602_v13 = vcombine.low %v1660_v57, %v1663_v5  ;;  %v4004_v14 = vshll.u32 %v3657_v53, 16  ;;  %v3662_v51 = vld [vmem:[%s7392_s21 + $0xa0] sm:$0xf]  ;;  %v7035_v56 = vld [vmem:[%s7377_s11 + $0xe8] sm:$0xff]  }
 0x141   : > { %v3988_v12 = vor.u32 %v3987_v2, %v3984_v1  ;;  %v5748_v18 = vcombine.low %v3970_v63, %v3980_v11  ;;  %v3996_v19 = vrot.slane %v3994_v7, 7  ;;  %v4003_v32 = vrot.slane %v4001_v8, 6  ;;  %v3663_v0 = vld [vmem:[%s7392_s21 + $0xa4] sm:$0x7] }
 0x142   : > { %v5570_v20 = vrot.slane %v1549_v61, 9  ;;  %6273 = vmatmul.mubr.bf16.gmra.mrb[4].mxu1 %v5602_v13  ;;  %v4006_v22 = vrot.slane %v4004_v14, 7  ;;  %v1666_v24 = vrot.slane %v1550_v3, 5  ;;  %v1669_v25 = vrot.slane %v1551_v9, 5  ;;  %v1555_v9 = vld [vmem:[%s7392_s21 + $0x48] sm:$0xe] }
 0x143   : > { %v3989_v21 = vrot.slane %v3988_v12, 4  ;;  %6432 = vmatprep.mubr.bf16.mxu0 %v5748_v18  ;;  %v3997_v26 = vor.u32 %v3996_v19, %v3993_v6  ;;  %v4010_v28 = vshrl.u32 %v3658_v16, 16  ;;  %v4013_v29 = vshll.u32 %v3658_v16, 16  ;;  %6503 = vmatpush3.bf16.msra.mxu1 %v7033_v10  ;;  %v1556_v14 = vld [vmem:[%s7392_s21 + $0x4c] sm:$0xf]  ;;  %v7036_v16 = vld [vmem:[%s7377_s11 + $0xf0] sm:$0xff]  }
 0x144   : > { %v4019_v30 = vshrl.u32 %v3659_v17, 16  ;;  %v4007_v31 = vor.u32 %v4006_v22, %v4003_v32  ;;  %v1667_v15 = vsel %vm7831_vm14, %v5570_v20, %v1666_v24  ;;  %v1668_v33 = vrot.slane %v1666_v24, 4  ;;  %6496 = vmatprep.subr.bf16.mxu1 %v7034_v35  ;;  %v1557_v20 = vld [vmem:[%s7392_s21 + $0x50] sm:$0x1] }
 0x145   : > { %v4022_v34 = vshll.u32 %v3659_v17, 16  ;;  %v3998_v36 = vsel %vm7723_vm11, %v3989_v21, %v3997_v26  ;;  %v3999_v37 = vrot.slane %v3997_v26, 4  ;;  %v4012_v38 = vrot.slane %v4010_v28, 6  ;;  %v3664_v21 = vld [vmem:[%s7392_s21 + $0xa8] sm:$0xc] }
 0x146   : > { %v4015_v39 = vrot.slane %v4013_v29, 7  ;;  %v1670_v62 = vsel %vm7831_vm14, %v1668_v33, %v1669_v25  ;;  %v4021_v42 = vrot.slane %v4019_v30, 6  ;;  %v4029_v44 = vshrl.u32 %v3660_v27, 16 }
 0x147   : > { %v4024_v43 = vrot.slane %v4022_v34, 7  ;;  %v4008_v46 = vsel %vm7723_vm11, %v3999_v37, %v4007_v31  ;;  %v5603_v47 = vcombine.low %v1667_v15, %v1670_v62  ;;  %v4032_v49 = vshll.u32 %v3660_v27, 16  ;;  %6504 = vmatpush3.bf16.msra.mxu1 %v7034_v35  ;;  %v3665_v31 = vld [vmem:[%s7392_s21 + $0xac] sm:$0xf]  ;;  %v7037_v62 = vld [vmem:[%s7377_s11 + $0xf8] sm:$0xff]  }
 0x148   : > { %v4016_v48 = vor.u32 %v4015_v39, %v4012_v38  ;;  %v5749_v52 = vcombine.low %v3998_v36, %v4008_v46  ;;  %v4031_v54 = vrot.slane %v4029_v44, 6  ;;  %v5571_v55 = vrot.slane %v1552_v23, 9  ;;  %6497 = vmatprep.subr.bf16.mxu1 %v7035_v56  ;;  %v3666_v23 = vld [vmem:[%s7392_s21 + $0xb0] sm:$0x7]  ;;  %v1559_v46 = vld [vmem:[%s7392_s21 + $0x58] sm:$0xf] }
 0x149   : > { %v4025_v53 = vor.u32 %v4024_v43, %v4021_v42  ;;  %6276 = vmatprep.mubr.bf16.mxu1 %v5603_v47  ;;  %v4034_v58 = vrot.slane %v4032_v49, 7  ;;  %v1673_v59 = vrot.slane %v1553_v41, 5  ;;  %v1676_v61 = vrot.slane %v1554_v45, 5  ;;  %v1558_v41 = vld [vmem:[%s7392_s21 + $0x54] sm:$0xe] }
 0x14a   : > { %v4017_v57 = vrot.slane %v4016_v48, 4  ;;  %6433 = vmatmul.mubr.bf16.gmra.mrb[20].mxu0 %v5749_v52  ;;  %v4038_v1 = vshrl.u32 %v3661_v50, 16  ;;  %v4041_v2 = vshll.u32 %v3661_v50, 16  ;;  %v4047_v3 = vshrl.u32 %v3662_v51, 16 }
 0x14b   : > { %v4027_v63 = vrot.slane %v4025_v53, 4  ;;  %v4035_v6 = vor.u32 %v4034_v58, %v4031_v54  ;;  %v1674_v7 = vsel %vm7831_vm14, %v5571_v55, %v1673_v59  ;;  %v1675_v8 = vrot.slane %v1673_v59, 4  ;;  %6505 = vmatpush3.bf16.msra.mxu1 %v7035_v56  ;;  %v3667_v56 = vld [vmem:[%s7392_s21 + $0xb4] sm:$0xc] }
 0x14c   : > { %v4026_v5 = vsel %vm7723_vm11, %v4017_v57, %v4025_v53  ;;  %v4040_v10 = vrot.slane %v4038_v1, 6  ;;  %v4043_v11 = vrot.slane %v4041_v2, 7  ;;  %v4049_v13 = vrot.slane %v4047_v3, 6  ;;  %6498 = vmatprep.subr.bf16.mxu1 %v7036_v16 }
 0x14d   : > { %v4050_v12 = vshll.u32 %v3662_v51, 16  ;;  %v4036_v17 = vsel %vm7723_vm11, %v4027_v63, %v4035_v6  ;;  %v1677_v18 = vsel %vm7831_vm14, %v1675_v8, %v1676_v61  ;;  %v4057_v19 = vshrl.u32 %v3663_v0, 16  ;;  %v1560_v51 = vld [vmem:[%s7392_s21 + $0x5c] sm:$0x1]  ;;  %v3668_v63 = vld [vmem:[%s7392_s21 + $0xb8] sm:$0xf] }
 0x14e   : > { %v4060_v32 = vshll.u32 %v3663_v0, 16  ;;  %v5750_v22 = vcombine.low %v4026_v5, %v4036_v17  ;;  %v5604_v24 = vcombine.low %v1674_v7, %v1677_v18  ;;  %v4044_v25 = vor.u32 %v4043_v11, %v4040_v10  ;;  %v3669_v5 = vld [vmem:[%s7392_s21 + $0xbc] sm:$0x7]  ;;  %v1561_v10 = vld [vmem:[%s7392_s21 + $0x60] sm:$0xe] }
 0x14f   : > { %v4052_v26 = vrot.slane %v4050_v12, 7  ;;  %v4059_v27 = vrot.slane %v4057_v19, 6  ;;  %v5572_v29 = vrot.slane %v1555_v9, 9  ;;  %v1680_v30 = vrot.slane %v1556_v14, 5  ;;  %6506 = vmatpush3.bf16.msra.mxu1 %v7036_v16  ;;  %v1562_v16 = vld [vmem:[%s7392_s21 + $0x64] sm:$0xf] }
 0x150   : > { %v4062_v28 = vrot.slane %v4060_v32, 7  ;;  %6436 = vmatprep.mubr.bf16.mxu0 %v5750_v22  ;;  %6277 = vmatmul.mubr.bf16.gmra.mrb[8].mxu1 %v5604_v24  ;;  %v4045_v15 = vrot.slane %v4044_v25, 4  ;;  %v1683_v34 = vrot.slane %v1557_v20, 5  ;;  %v4066_v35 = vshrl.u32 %v3664_v21, 16  ;;  %v1563_v17 = vld [vmem:[%s7392_s21 + $0x68] sm:$0x1] }
 0x151   : > { %v4053_v33 = vor.u32 %v4052_v26, %v4049_v13  ;;  %v1681_v37 = vsel %vm7831_vm14, %v5572_v29, %v1680_v30  ;;  %v1682_v38 = vrot.slane %v1680_v30, 4  ;;  %v4069_v39 = vshll.u32 %v3664_v21, 16  ;;  %6499 = vmatprep.subr.bf16.mxu1 %v7037_v62  ;;  %v4509_v21 = vld [vmem:[%s7392_s21] sm:$0x8] }
 0x152   : > { %v4063_v36 = vor.u32 %v4062_v28, %v4059_v27  ;;  %v4068_v44 = vrot.slane %v4066_v35, 6  ;;  %v4075_v45 = vshrl.u32 %v3665_v31, 16  ;;  %v4078_v49 = vshll.u32 %v3665_v31, 16  ;;  %v4510_v27 = vld [vmem:[%s7392_s21 + $0x4] sm:$0xf] }
 0x153   : > { %v4054_v42 = vsel %vm7723_vm11, %v4045_v15, %v4053_v33  ;;  %v4055_v43 = vrot.slane %v4053_v33, 4  ;;  %v1684_v47 = vsel %vm7831_vm14, %v1682_v38, %v1683_v34  ;;  %v4071_v48 = vrot.slane %v4069_v39, 7  ;;  %6507 = vmatpush3.bf16.msra.mxu1 %v7037_v62  ;;  %v4511_v15 = vld [vmem:[%s7392_s21 + $0x8] sm:$0x7]  ;;  %v1564_v33 = vld [vmem:[%s7392_s21 + $0x6c] sm:$0xe] }
 0x154   : > { %v4085_v50 = vshrl.u32 %v3666_v23, 16  ;;  %v5605_v53 = vcombine.low %v1681_v37, %v1684_v47  ;;  %v4077_v54 = vrot.slane %v4075_v45, 6  ;;  %v4088_v55 = vshll.u32 %v3666_v23, 16  ;;  %v1565_v37 = vld [vmem:[%s7392_s21 + $0x70] sm:$0xf] }
 0x155   : > { %v4064_v52 = vsel %vm7723_vm11, %v4055_v43, %v4063_v36  ;;  %v4072_v58 = vor.u32 %v4071_v48, %v4068_v44  ;;  %v4080_v59 = vrot.slane %v4078_v49, 7  ;;  %v5573_v1 = vrot.slane %v1558_v41, 9  ;;  %v4512_v45 = vld [vmem:[%s7392_s21 + $0xc] sm:$0x8] }
 0x156   : > { %v5751_v57 = vcombine.low %v4054_v42, %v4064_v52  ;;  %v4087_v61 = vrot.slane %v4085_v50, 6  ;;  %6280 = vmatprep.mubr.bf16.mxu1 %v5605_v53  ;;  %v4090_v0 = vrot.slane %v4088_v55, 7  ;;  %v1687_v2 = vrot.slane %v1559_v46, 5  ;;  %v1566_v42 = vld [vmem:[%s7392_s21 + $0x74] sm:$0x1] }
 0x157   : > { %v1690_v3 = vrot.slane %v1560_v51, 5  ;;  %v4073_v6 = vrot.slane %v4072_v58, 4  ;;  %v4081_v7 = vor.u32 %v4080_v59, %v4077_v54  ;;  %v4094_v8 = vshrl.u32 %v3667_v56, 16  ;;  %v4513_v51 = vld [vmem:[%s7392_s21 + $0x10] sm:$0xf] }
 0x158   : > { %6437 = vmatmul.mubr.bf16.gmra.mrb[24].mxu0 %v5751_v57  ;;  %v4097_v9 = vshll.u32 %v3667_v56, 16  ;;  %v4091_v11 = vor.u32 %v4090_v0, %v4087_v61  ;;  %v1688_v13 = vsel %vm7831_vm14, %v5573_v1, %v1687_v2  ;;  %v1689_v12 = vrot.slane %v1687_v2, 4  ;;  %v4514_v52 = vld [vmem:[%s7392_s21 + $0x14] sm:$0x7]  ;;  %v1567_v53 = vld [vmem:[%s7392_s21 + $0x78] sm:$0xe] }
 0x159   : > { %v4103_v14 = vshrl.u32 %v3668_v63, 16  ;;  %v4082_v18 = vsel %vm7723_vm11, %v4073_v6, %v4081_v7  ;;  %v4083_v19 = vrot.slane %v4081_v7, 4  ;;  %v4096_v32 = vrot.slane %v4094_v8, 6  ;;  %v1568_v58 = vld [vmem:[%s7392_s21 + $0x7c] sm:$0xf] }
 0x15a   : > { %v4099_v20 = vrot.slane %v4097_v9, 7  ;;  %v1691_v22 = vsel %vm7831_vm14, %v1689_v12, %v1690_v3  ;;  %v4106_v25 = vshll.u32 %v3668_v63, 16  ;;  %v4113_v26 = vshrl.u32 %v3669_v5, 16  ;;  %v1569_v1 = vld [vmem:[%s7392_s21 + $0x80] sm:$0x1] }
 0x15b   : > { %v4105_v24 = vrot.slane %v4103_v14, 6  ;;  %v4092_v28 = vsel %vm7723_vm11, %v4083_v19, %v4091_v11  ;;  %v5606_v29 = vcombine.low %v1688_v13, %v1691_v22  ;;  %v4116_v31 = vshll.u32 %v3669_v5, 16  ;;  %v4515_v2 = vld [vmem:[%s7392_s21 + $0x18] sm:$0x8]  ;;  %v4516_v8 = vld [vmem:[%s7392_s21 + $0x1c] sm:$0xf] }
 0x15c   : > { %v4100_v30 = vor.u32 %v4099_v20, %v4096_v32  ;;  %v5752_v34 = vcombine.low %v4082_v18, %v4092_v28  ;;  %v4108_v23 = vrot.slane %v4106_v25, 7  ;;  %v4115_v35 = vrot.slane %v4113_v26, 6  ;;  %v4517_v9 = vld [vmem:[%s7392_s21 + $0x20] sm:$0x7]  ;;  %v1570_v14 = vld [vmem:[%s7392_s21 + $0x84] sm:$0xe] }
 0x15d   : > { %v5574_v36 = vrot.slane %v1561_v10, 9  ;;  %6281 = vmatmul.mubr.bf16.gmra.mrb[12].mxu1 %v5606_v29  ;;  %v4118_v39 = vrot.slane %v4116_v31, 7  ;;  %v1694_v41 = vrot.slane %v1562_v16, 5  ;;  %v1697_v62 = vrot.slane %v1563_v17, 5  ;;  %v1571_v16 = vld [vmem:[%s7392_s21 + $0x88] sm:$0xf] }
 0x15e   : > { %v4101_v38 = vrot.slane %v4100_v30, 4  ;;  %6440 = vmatprep.mubr.bf16.mxu0 %v5752_v34  ;;  %v4109_v43 = vor.u32 %v4108_v23, %v4105_v24  ;;  %v5762_v44 = vrot.slane %v4509_v21, 11  ;;  %v4610_v50 = vrot.slane %v4510_v27, 7  ;;  %v1572_v32 = vld [vmem:[%s7392_s21 + $0x8c] sm:$0x1] }
 0x15f   : > { %v4119_v46 = vor.u32 %v4118_v39, %v4115_v35  ;;  %v1695_v47 = vsel %vm7831_vm14, %v5574_v36, %v1694_v41  ;;  %v1696_v48 = vrot.slane %v1694_v41, 4  ;;  %v4613_v56 = vrot.slane %v4511_v15, 7  ;;  %v4518_v25 = vld [vmem:[%s7392_s21 + $0x24] sm:$0x8]  ;;  %v4519_v30 = vld [vmem:[%s7392_s21 + $0x28] sm:$0xf] }
 0x160   : > { %v4110_v54 = vsel %vm7723_vm11, %v4101_v38, %v4109_v43  ;;  %v4111_v55 = vrot.slane %v4109_v43, 4  ;;  %v5575_v57 = vrot.slane %v1564_v33, 9  ;;  %v4611_v61 = vsel %vm7965_vm1, %v5762_v44, %v4610_v50  ;;  %v4520_v31 = vld [vmem:[%s7392_s21 + $0x2c] sm:$0x7]  ;;  %v1573_v35 = vld [vmem:[%s7392_s21 + $0x90] sm:$0xe] }
 0x161   : > { %v1698_v59 = vsel %vm7831_vm14, %v1696_v48, %v1697_v62  ;;  %v4612_v63 = vrot.slane %v4610_v50, 4  ;;  %v1701_v0 = vrot.slane %v1565_v37, 5  ;;  %v1704_v6 = vrot.slane %v1566_v42, 5  ;;  %v1574_v41 = vld [vmem:[%s7392_s21 + $0x94] sm:$0xf] }
 0x162   : > { %v4120_v3 = vsel %vm7723_vm11, %v4111_v55, %v4119_v46  ;;  %v5607_v5 = vcombine.low %v1695_v47, %v1698_v59  ;;  %v5763_v7 = vrot.slane %v4512_v45, 11  ;;  %v4617_v17 = vrot.slane %v4513_v51, 7  ;;  %v1575_v62 = vld [vmem:[%s7392_s21 + $0x98] sm:$0x1]  ;;  %v4521_v46 = vld [vmem:[%s7392_s21 + $0x30] sm:$0x8] }
 0x163   : > { %v5753_v10 = vcombine.low %v4110_v54, %v4120_v3  ;;  %v4614_v11 = vsel %vm7965_vm1, %v4612_v63, %v4613_v56  ;;  %v1702_v13 = vsel %vm7831_vm14, %v5575_v57, %v1701_v0  ;;  %v1703_v12 = vrot.slane %v1701_v0, 4  ;;  %v4522_v47 = vld [vmem:[%s7392_s21 + $0x34] sm:$0xf]  ;;  %v1576_v54 = vld [vmem:[%s7392_s21 + $0x9c] sm:$0xe] }
 0x164   : > { %6284 = vmatprep.mubr.bf16.mxu1 %v5607_v5  ;;  %v5795_v60 = vcombine.low %v4611_v61, %v4614_v11  ;;  %v4620_v18 = vrot.slane %v4514_v52, 7  ;;  %v5576_v19 = vrot.slane %v1567_v53, 9  ;;  %v1708_v21 = vrot.slane %v1568_v58, 5  ;;  %v4523_v53 = vld [vmem:[%s7392_s21 + $0x38] sm:$0x7] }
 0x165   : > { %6441 = vmatmul.mubr.bf16.gmra.mrb[28].mxu0 %v5753_v10  ;;  %v1705_v20 = vsel %vm7831_vm14, %v1703_v12, %v1704_v6  ;;  %v1711_v22 = vrot.slane %v1569_v1, 5  ;;  %v5764_v24 = vrot.slane %v4515_v2, 11  ;;  %v4618_v27 = vsel %vm7965_vm1, %v5763_v7, %v4617_v17  ;;  %v1577_v59 = vld [vmem:[%s7392_s21 + $0xa0] sm:$0xf]  ;;  %v1578_v2 = vld [vmem:[%s7392_s21 + $0xa4] sm:$0x1] }
 0x166   : > { %6460 = vmatprep.mubr.bf16.mxu0 %v5795_v60  ;;  %v5608_v26 = vcombine.low %v1702_v13, %v1705_v20  ;;  %v4619_v28 = vrot.slane %v4617_v17, 4  ;;  %v4624_v29 = vrot.slane %v4516_v8, 7  ;;  %v1709_v15 = vsel %vm7831_vm14, %v5576_v19, %v1708_v21  ;;  %v4524_v8 = vld [vmem:[%s7392_s21 + $0x3c] sm:$0x8]  ;;  %v1579_v19 = vld [vmem:[%s7392_s21 + $0xa8] sm:$0xe] }
 0x167   : > { %v1710_v33 = vrot.slane %v1708_v21, 4  ;;  %v4627_v34 = vrot.slane %v4517_v9, 7  ;;  %v5577_v23 = vrot.slane %v1570_v14, 9  ;;  %v1715_v39 = vrot.slane %v1571_v16, 5  ;;  %v4525_v9 = vld [vmem:[%s7392_s21 + $0x40] sm:$0xf] }
 0x168   : > { %6285 = vmatmul.mubr.bf16.gmra.mrb[16].mxu1 %v5608_v26  ;;  %v4621_v36 = vsel %vm7965_vm1, %v4619_v28, %v4620_v18  ;;  %v4625_v37 = vsel %vm7965_vm1, %v5764_v24, %v4624_v29  ;;  %v4626_v38 = vrot.slane %v4624_v29, 4  ;;  %v1718_v44 = vrot.slane %v1572_v32, 5  ;;  %v4526_v14 = vld [vmem:[%s7392_s21 + $0x44] sm:$0x7]  ;;  %v1580_v32 = vld [vmem:[%s7392_s21 + $0xac] sm:$0xf] }
 0x169   : > { %v5796_v42 = vcombine.low %v4618_v27, %v4621_v36  ;;  %v1712_v43 = vsel %vm7831_vm14, %v1710_v33, %v1711_v22  ;;  %v5765_v45 = vrot.slane %v4518_v25, 11  ;;  %v1716_v51 = vsel %vm7831_vm14, %v5577_v23, %v1715_v39  ;;  %v1581_v25 = vld [vmem:[%s7392_s21 + $0xb0] sm:$0x1]  ;;  %v4527_v26 = vld [vmem:[%s7392_s21 + $0x48] sm:$0x8] }
 0x16a   : > { %v5609_v48 = vcombine.low %v1709_v15, %v1712_v43  ;;  %v4628_v50 = vsel %vm7965_vm1, %v4626_v38, %v4627_v34  ;;  %v1717_v52 = vrot.slane %v1715_v39, 4  ;;  %v4631_v56 = vrot.slane %v4519_v30, 7  ;;  %v4529_v15 = vld [vmem:[%s7392_s21 + $0x50] sm:$0x7]  ;;  %v1582_v36 = vld [vmem:[%s7392_s21 + $0xb4] sm:$0xe] }
 0x16b   : > { %v5797_v55 = vcombine.low %v4625_v37, %v4628_v50  ;;  %v4634_v57 = vrot.slane %v4520_v31, 7  ;;  %v5578_v58 = vrot.slane %v1573_v35, 9  ;;  %v1722_v63 = vrot.slane %v1574_v41, 5  ;;  %v4528_v31 = vld [vmem:[%s7392_s21 + $0x4c] sm:$0xf] }
 0x16c   : > { %6288 = vmatprep.mubr.bf16.mxu1 %v5609_v48  ;;  %v1719_v61 = vsel %vm7831_vm14, %v1717_v52, %v1718_v44  ;;  %v1725_v0 = vrot.slane %v1575_v62, 5  ;;  %v5766_v1 = vrot.slane %v4521_v46, 11  ;;  %v4632_v5 = vsel %vm7965_vm1, %v5765_v45, %v4631_v56  ;;  %v1583_v62 = vld [vmem:[%s7392_s21 + $0xb8] sm:$0xf]  ;;  %v1584_v46 = vld [vmem:[%s7392_s21 + $0xbc] sm:$0x1] }
 0x16d   : > { %6461 = vmatmul.mubr.bf16.vlgmr.msra.gmra.mrb[0].mxu0 %v5796_v42  ;;  %v5610_v3 = vcombine.low %v1716_v51, %v1719_v61  ;;  %v4633_v6 = vrot.slane %v4631_v56, 4  ;;  %v4638_v7 = vrot.slane %v4522_v47, 7  ;;  %v1723_v10 = vsel %vm7831_vm14, %v5578_v58, %v1722_v63  ;;  %v4530_v47 = vld [vmem:[%s7392_s21 + $0x54] sm:$0x8]  ;;  %v4532_v58 = vld [vmem:[%s7392_s21 + $0x5c] sm:$0x7] }
 0x16e   : > { %6464 = vmatprep.mubr.bf16.mxu0 %v5797_v55  ;;  %v1724_v11 = vrot.slane %v1722_v63, 4  ;;  %v4641_v13 = vrot.slane %v4523_v53, 7  ;;  %v5579_v12 = vrot.slane %v1576_v54, 9  ;;  %v1729_v18 = vrot.slane %v1577_v59, 5  ;;  %v4531_v53 = vld [vmem:[%s7392_s21 + $0x58] sm:$0xf] }
 0x16f   : > { %v4635_v16 = vsel %vm7965_vm1, %v4633_v6, %v4634_v57  ;;  %v4639_v60 = vsel %vm7965_vm1, %v5766_v1, %v4638_v7  ;;  %v4640_v17 = vrot.slane %v4638_v7, 4  ;;  %v1732_v22 = vrot.slane %v1578_v2, 5  ;;  %v2160_v59 = vld [vmem:[%s7392_s21 + $0x60] sm:$0xe]  ;;  %v2161_v2 = vld [vmem:[%s7392_s21 + $0x64] sm:$0xf] }
 0x170   : > { %6289 = vmatmul.mubr.bf16.gmra.mrb[20].mxu1 %v5610_v3  ;;  %v5798_v20 = vcombine.low %v4632_v5, %v4635_v16  ;;  %v1726_v21 = vsel %vm7831_vm14, %v1724_v11, %v1725_v0  ;;  %v5767_v24 = vrot.slane %v4524_v8, 11  ;;  %v1730_v29 = vsel %vm7831_vm14, %v5579_v12, %v1729_v18  ;;  %v2162_v8 = vld [vmem:[%s7392_s21 + $0x68] sm:$0x3]  ;;  %v4533_v12 = vld [vmem:[%s7392_s21 + $0x60] sm:$0x8] }
 0x171   : > { %v5611_v27 = vcombine.low %v1723_v10, %v1726_v21  ;;  %v4642_v28 = vsel %vm7965_vm1, %v4640_v17, %v4641_v13  ;;  %v1731_v30 = vrot.slane %v1729_v18, 4  ;;  %v4645_v34 = vrot.slane %v4525_v9, 7  ;;  %v4534_v18 = vld [vmem:[%s7392_s21 + $0x64] sm:$0xf] }
 0x172   : > { %v5799_v33 = vcombine.low %v4639_v60, %v4642_v28  ;;  %v4648_v23 = vrot.slane %v4526_v14, 7  ;;  %v5580_v35 = vrot.slane %v1579_v19, 9  ;;  %v1736_v38 = vrot.slane %v1580_v32, 5 }
 0x173   : > { %6292 = vmatprep.mubr.bf16.mxu1 %v5611_v27  ;;  %v1733_v37 = vsel %vm7831_vm14, %v1731_v30, %v1732_v22  ;;  %v1739_v39 = vrot.slane %v1581_v25, 5  ;;  %v5768_v41 = vrot.slane %v4527_v26, 11  ;;  %v4646_v43 = vsel %vm7965_vm1, %v5767_v24, %v4645_v34  ;;  %v4535_v27 = vld [vmem:[%s7392_s21 + $0x68] sm:$0x7] }
 0x174   : > { %v5612_v42 = vcombine.low %v1730_v29, %v1733_v37  ;;  %v4647_v44 = vrot.slane %v4645_v34, 4  ;;  %v4652_v45 = vrot.slane %v4528_v31, 7  ;;  %v1737_v48 = vsel %vm7831_vm14, %v5580_v35, %v1736_v38  ;;  %v2163_v31 = vld [vmem:[%s7392_s21 + $0x6c] sm:$0xe]  ;;  %v2164_v35 = vld [vmem:[%s7392_s21 + $0x70] sm:$0xf] }
 0x175   : > { %6465 = vmatmul.mubr.bf16.gmra.mrb[4].mxu0 %v5798_v20  ;;  %v1738_v50 = vrot.slane %v1736_v38, 4  ;;  %v4655_v51 = vrot.slane %v4529_v15, 7  ;;  %v5581_v52 = vrot.slane %v1582_v36, 9  ;;  %v1743_v57 = vrot.slane %v1583_v62, 5 }
 0x176   : > { %6468 = vmatprep.mubr.bf16.mxu0 %v5799_v33  ;;  %v4649_v54 = vsel %vm7965_vm1, %v4647_v44, %v4648_v23  ;;  %v4653_v55 = vsel %vm7965_vm1, %v5768_v41, %v4652_v45  ;;  %v4654_v56 = vrot.slane %v4652_v45, 4  ;;  %v1746_v0 = vrot.slane %v1584_v46, 5 }
 0x177   : > { %v5800_v61 = vcombine.low %v4646_v43, %v4649_v54  ;;  %v1740_v63 = vsel %vm7831_vm14, %v1738_v50, %v1739_v39  ;;  %v5769_v1 = vrot.slane %v4530_v47, 11  ;;  %v1744_v6 = vsel %vm7831_vm14, %v5581_v52, %v1743_v57  ;;  %v4536_v50 = vld [vmem:[%s7392_s21 + $0x6c] sm:$0x8] }
 0x178   : > { %6293 = vmatmul.mubr.bf16.gmra.mrb[24].mxu1 %v5612_v42  ;;  %v5613_v3 = vcombine.low %v1737_v48, %v1740_v63  ;;  %v4656_v5 = vsel %vm7965_vm1, %v4654_v56, %v4655_v51  ;;  %v1745_v7 = vrot.slane %v1743_v57, 4  ;;  %v4659_v10 = vrot.slane %v4531_v53, 7  ;;  %v2165_v42 = vld [vmem:[%s7392_s21 + $0x74] sm:$0x3]  ;;  %v2166_v63 = vld [vmem:[%s7392_s21 + $0x78] sm:$0xe] }
 0x179   : > { %v5801_v9 = vcombine.low %v4653_v55, %v4656_v5  ;;  %v4662_v11 = vrot.slane %v4532_v58, 7  ;;  %v2412_v13 = vshrl.u32 %v2160_v59, 16  ;;  %v2415_v16 = vshll.u32 %v2160_v59, 16  ;;  %v4537_v55 = vld [vmem:[%s7392_s21 + $0x70] sm:$0xf] }
 0x17a   : > { %6296 = vmatprep.mubr.bf16.mxu1 %v5613_v3  ;;  %v1747_v14 = vsel %vm7831_vm14, %v1745_v7, %v1746_v0  ;;  %v2421_v60 = vshrl.u32 %v2161_v2, 16  ;;  %v2424_v17 = vshll.u32 %v2161_v2, 16  ;;  %v4660_v32 = vsel %vm7965_vm1, %v5769_v1, %v4659_v10  ;;  %v4538_v56 = vld [vmem:[%s7392_s21 + $0x74] sm:$0x7]  ;;  %v2167_v5 = vld [vmem:[%s7392_s21 + $0x7c] sm:$0xf] }
 0x17b   : > { %v5614_v19 = vcombine.low %v1744_v6, %v1747_v14  ;;  %v4661_v20 = vrot.slane %v4659_v10, 4  ;;  %v2414_v21 = vrot.slane %v2412_v13, 5  ;;  %v2417_v22 = vrot.slane %v2415_v16, 6  ;;  %v2168_v13 = vld [vmem:[%s7392_s21 + $0x80] sm:$0x3] }
 0x17c   : > { %v2423_v24 = vrot.slane %v2421_v60, 5  ;;  %v2426_v25 = vrot.slane %v2424_v17, 6  ;;  %v2431_v26 = vshrl.u32 %v2162_v8, 16  ;;  %v2434_v28 = vshll.u32 %v2162_v8, 16 }
 0x17d   : > { %6469 = vmatmul.mubr.bf16.gmra.mrb[8].mxu0 %v5800_v61  ;;  %v4663_v4 = vsel %vm7965_vm1, %v4661_v20, %v4662_v11  ;;  %v5770_v29 = vrot.slane %v4533_v12, 11  ;;  %v4666_v30 = vrot.slane %v4534_v18, 7  ;;  %v2418_v33 = vor.u32 %v2417_v22, %v2414_v21  ;;  %v4539_v22 = vld [vmem:[%s7392_s21 + $0x78] sm:$0x8] }
 0x17e   : > { %6472 = vmatprep.mubr.bf16.mxu0 %v5801_v9  ;;  %v5802_v15 = vcombine.low %v4660_v32, %v4663_v4  ;;  %v2427_v34 = vor.u32 %v2426_v25, %v2423_v24  ;;  %v2433_v23 = vrot.slane %v2431_v26, 5  ;;  %v2436_v36 = vrot.slane %v2434_v28, 6  ;;  %v4540_v24 = vld [vmem:[%s7392_s21 + $0x7c] sm:$0xf]  ;;  %v4541_v28 = vld [vmem:[%s7392_s21 + $0x80] sm:$0x7] }
 0x17f   : > { %v4667_v37 = vsel %vm7965_vm1, %v5770_v29, %v4666_v30  ;;  %v4668_v38 = vrot.slane %v4666_v30, 4  ;;  %v4669_v39 = vrot.slane %v4535_v27, 7  ;;  %v2419_v41 = vrot.slane %v2418_v33, 4  ;;  %v2169_v33 = vld [vmem:[%s7392_s21 + $0x84] sm:$0xe] }
 0x180   : > { %6297 = vmatmul.mubr.bf16.gmra.mrb[28].mxu1 %v5614_v19  ;;  %v2429_v62 = vrot.slane %v2427_v34, 4  ;;  %v2440_v43 = vshrl.u32 %v2163_v31, 16  ;;  %v2443_v44 = vshll.u32 %v2163_v31, 16  ;;  %v2437_v45 = vor.u32 %v2436_v36, %v2433_v23 }
 0x181   : > { %v4670_v46 = vsel %vm7965_vm1, %v4668_v38, %v4669_v39  ;;  %v2449_v47 = vshrl.u32 %v2164_v35, 16  ;;  %v2452_v48 = vshll.u32 %v2164_v35, 16  ;;  %v2428_v51 = vsel %vm7408_vm2, %v2419_v41, %v2427_v34  ;;  %v2170_v34 = vld [vmem:[%s7392_s21 + $0x88] sm:$0xf] }
 0x182   : > { %v5803_v52 = vcombine.low %v4667_v37, %v4670_v46  ;;  %v2442_v53 = vrot.slane %v2440_v43, 5  ;;  %v2445_v54 = vrot.slane %v2443_v44, 6  ;;  %v2438_v57 = vsel %vm7408_vm2, %v2429_v62, %v2437_v45  ;;  %v2171_v43 = vld [vmem:[%s7392_s21 + $0x8c] sm:$0x3] }
 0x183   : > { %v2451_v58 = vrot.slane %v2449_v47, 5  ;;  %v2454_v59 = vrot.slane %v2452_v48, 6  ;;  %v2459_v61 = vshrl.u32 %v2165_v42, 16  ;;  %v5648_v0 = vcombine.low %v2428_v51, %v2438_v57  ;;  %v4543_v57 = vld [vmem:[%s7392_s21 + $0x88] sm:$0xf] }
 0x184   : > { %v2446_v1 = vor.u32 %v2445_v54, %v2442_v53  ;;  %v2462_v2 = vshll.u32 %v2165_v42, 16  ;;  %v5771_v3 = vrot.slane %v4536_v50, 11  ;;  %v4673_v8 = vrot.slane %v4537_v55, 7 }
 0x185   : > { %6473 = vmatmul.mubr.bf16.gmra.mrb[12].mxu0 %v5802_v15  ;;  %v2455_v6 = vor.u32 %v2454_v59, %v2451_v58  ;;  %v2461_v7 = vrot.slane %v2459_v61, 5  ;;  %v4676_v9 = vrot.slane %v4538_v56, 7  ;;  %6332 = vmatprep.mubr.bf16.mxu1 %v5648_v0  ;;  %v2468_v12 = vshrl.u32 %v2166_v63, 16  ;;  %v4544_v0 = vld [vmem:[%s7392_s21 + $0x8c] sm:$0x7] }
 0x186   : > { %6476 = vmatprep.mubr.bf16.mxu0 %v5803_v52  ;;  %v2447_v10 = vrot.slane %v2446_v1, 4  ;;  %v2464_v11 = vrot.slane %v2462_v2, 6  ;;  %v2471_v14 = vshll.u32 %v2166_v63, 16  ;;  %v4674_v60 = vsel %vm7965_vm1, %v5771_v3, %v4673_v8  ;;  %v4542_v52 = vld [vmem:[%s7392_s21 + $0x84] sm:$0x8] }
 0x187   : > { %v2457_v16 = vrot.slane %v2455_v6, 4  ;;  %v4675_v17 = vrot.slane %v4673_v8, 4  ;;  %v2477_v18 = vshrl.u32 %v2167_v5, 16  ;;  %v2470_v20 = vrot.slane %v2468_v12, 5 }
 0x188   : > { %v2456_v19 = vsel %vm7408_vm2, %v2447_v10, %v2455_v6  ;;  %v2465_v32 = vor.u32 %v2464_v11, %v2461_v7  ;;  %v2473_v21 = vrot.slane %v2471_v14, 6  ;;  %v2480_v27 = vshll.u32 %v2167_v5, 16  ;;  %v2172_v6 = vld [vmem:[%s7392_s21 + $0x90] sm:$0xe]  ;;  %v2173_v7 = vld [vmem:[%s7392_s21 + $0x94] sm:$0xf] }
 0x189   : > { %v4677_v25 = vsel %vm7965_vm1, %v4675_v17, %v4676_v9  ;;  %v2479_v26 = vrot.slane %v2477_v18, 5  ;;  %v2487_v4 = vshrl.u32 %v2168_v13, 16  ;;  %v2490_v15 = vshll.u32 %v2168_v13, 16  ;;  %v2174_v17 = vld [vmem:[%s7392_s21 + $0x98] sm:$0x3] }
 0x18a   : > { %v2466_v29 = vsel %vm7408_vm2, %v2457_v16, %v2465_v32  ;;  %v5804_v30 = vcombine.low %v4674_v60, %v4677_v25  ;;  %v2474_v31 = vor.u32 %v2473_v21, %v2470_v20  ;;  %v2482_v35 = vrot.slane %v2480_v27, 6  ;;  %v4545_v25 = vld [vmem:[%s7392_s21 + $0x90] sm:$0x8] }
 0x18b   : > { %v5649_v23 = vcombine.low %v2456_v19, %v2466_v29  ;;  %v2489_v36 = vrot.slane %v2487_v4, 5  ;;  %v5772_v37 = vrot.slane %v4539_v22, 11  ;;  %v2492_v39 = vrot.slane %v2490_v15, 6  ;;  %v4546_v29 = vld [vmem:[%s7392_s21 + $0x94] sm:$0xf] }
 0x18c   : > { %v2475_v38 = vrot.slane %v2474_v31, 4  ;;  %v4680_v41 = vrot.slane %v4540_v24, 7  ;;  %v4683_v62 = vrot.slane %v4541_v28, 7  ;;  %v2483_v42 = vor.u32 %v2482_v35, %v2479_v26 }
 0x18d   : > { %6333 = vmatmul.mubr.bf16.vlgmr.msra.gmra.mrb[16].mxu1 %v5649_v23  ;;  %6477 = vmatmul.mubr.bf16.gmra.mrb[16].mxu0 %v5804_v30  ;;  %v2496_v44 = vshrl.u32 %v2169_v33, 16  ;;  %v2499_v45 = vshll.u32 %v2169_v33, 16  ;;  %v2505_v46 = vshrl.u32 %v2170_v34, 16  ;;  %v2493_v47 = vor.u32 %v2492_v39, %v2489_v36  ;;  %v2175_v23 = vld [vmem:[%s7392_s21 + $0x9c] sm:$0xe] }
 0x18e   : > { %v4681_v48 = vsel %vm7965_vm1, %v5772_v37, %v4680_v41  ;;  %v4682_v50 = vrot.slane %v4680_v41, 4  ;;  %v2508_v51 = vshll.u32 %v2170_v34, 16  ;;  %v2484_v53 = vsel %vm7408_vm2, %v2475_v38, %v2483_v42  ;;  %v4547_v34 = vld [vmem:[%s7392_s21 + $0x98] sm:$0x7] }
 0x18f   : > { %v2485_v54 = vrot.slane %v2483_v42, 4  ;;  %v2498_v55 = vrot.slane %v2496_v44, 5  ;;  %v2501_v56 = vrot.slane %v2499_v45, 6  ;;  %v2507_v59 = vrot.slane %v2505_v46, 5 }
 0x190   : > { %v4684_v58 = vsel %vm7965_vm1, %v4682_v50, %v4683_v62  ;;  %v2510_v61 = vrot.slane %v2508_v51, 6  ;;  %v2515_v63 = vshrl.u32 %v2171_v43, 16  ;;  %v2518_v5 = vshll.u32 %v2171_v43, 16  ;;  %v2176_v43 = vld [vmem:[%s7392_s21 + $0xa0] sm:$0xf] }
 0x191   : > { %v2494_v1 = vsel %vm7408_vm2, %v2485_v54, %v2493_v47  ;;  %v5805_v2 = vcombine.low %v4681_v48, %v4684_v58  ;;  %v2502_v3 = vor.u32 %v2501_v56, %v2498_v55  ;;  %v5773_v11 = vrot.slane %v4542_v52, 11  ;;  %v2177_v47 = vld [vmem:[%s7392_s21 + $0xa4] sm:$0x3]  ;;  %v4548_v54 = vld [vmem:[%s7392_s21 + $0x9c] sm:$0x8] }
 0x192   : > { %v5650_v8 = vcombine.low %v2484_v53, %v2494_v1  ;;  %v2511_v9 = vor.u32 %v2510_v61, %v2507_v59  ;;  %v2517_v10 = vrot.slane %v2515_v63, 5  ;;  %v2520_v12 = vrot.slane %v2518_v5, 6  ;;  %v4549_v59 = vld [vmem:[%s7392_s21 + $0xa0] sm:$0xf] }
 0x193   : > { %6480 = vmatprep.mubr.bf16.mxu0 %v5805_v2  ;;  %v2503_v13 = vrot.slane %v2502_v3, 4  ;;  %v4687_v14 = vrot.slane %v4543_v57, 7  ;;  %v4690_v16 = vrot.slane %v4544_v0, 7  ;;  %v2524_v18 = vshrl.u32 %v2172_v6, 16  ;;  %v4550_v2 = vld [vmem:[%s7392_s21 + $0xa4] sm:$0x7] }
 0x194   : > { %6336 = vmatprep.mubr.bf16.mxu1 %v5650_v8  ;;  %v2513_v60 = vrot.slane %v2511_v9, 4  ;;  %v2527_v19 = vshll.u32 %v2172_v6, 16  ;;  %v2533_v32 = vshrl.u32 %v2173_v7, 16  ;;  %v2521_v21 = vor.u32 %v2520_v12, %v2517_v10  ;;  %v2178_v8 = vld [vmem:[%s7392_s21 + $0xa8] sm:$0xe] }
 0x195   : > { %v2512_v20 = vsel %vm7408_vm2, %v2503_v13, %v2511_v9  ;;  %v4688_v22 = vsel %vm7965_vm1, %v5773_v11, %v4687_v14  ;;  %v4689_v24 = vrot.slane %v4687_v14, 4  ;;  %v2526_v26 = vrot.slane %v2524_v18, 5  ;;  %v2179_v12 = vld [vmem:[%s7392_s21 + $0xac] sm:$0xf] }
 0x196   : > { %v2529_v27 = vrot.slane %v2527_v19, 6  ;;  %v2535_v4 = vrot.slane %v2533_v32, 5  ;;  %v2536_v28 = vshll.u32 %v2173_v7, 16  ;;  %v2522_v30 = vsel %vm7408_vm2, %v2513_v60, %v2521_v21  ;;  %v2180_v32 = vld [vmem:[%s7392_s21 + $0xb0] sm:$0x3] }
 0x197   : > { %v4691_v31 = vsel %vm7965_vm1, %v4689_v24, %v4690_v16  ;;  %v2543_v15 = vshrl.u32 %v2174_v17, 16  ;;  %v2546_v33 = vshll.u32 %v2174_v17, 16  ;;  %v5651_v35 = vcombine.low %v2512_v20, %v2522_v30 }
 0x198   : > { %v5806_v36 = vcombine.low %v4688_v22, %v4691_v31  ;;  %v2530_v37 = vor.u32 %v2529_v27, %v2526_v26  ;;  %v2538_v38 = vrot.slane %v2536_v28, 6  ;;  %v5774_v62 = vrot.slane %v4545_v25, 11  ;;  %v4551_v27 = vld [vmem:[%s7392_s21 + $0xa8] sm:$0x8]  ;;  %v4552_v31 = vld [vmem:[%s7392_s21 + $0xac] sm:$0xf] }
 0x199   : > { %v2545_v39 = vrot.slane %v2543_v15, 5  ;;  %v2548_v41 = vrot.slane %v2546_v33, 6  ;;  %v4694_v42 = vrot.slane %v4546_v29, 7  ;;  %6337 = vmatmul.mubr.bf16.gmra.mrb[20].mxu1 %v5651_v35  ;;  %v4697_v46 = vrot.slane %v4547_v34, 7  ;;  %v4553_v35 = vld [vmem:[%s7392_s21 + $0xb0] sm:$0x7] }
 0x19a   : > { %6481 = vmatmul.mubr.bf16.gmra.mrb[20].mxu0 %v5806_v36  ;;  %v2531_v44 = vrot.slane %v2530_v37, 4  ;;  %v2539_v45 = vor.u32 %v2538_v38, %v2535_v4  ;;  %v2552_v48 = vshrl.u32 %v2175_v23, 16  ;;  %v2555_v53 = vshll.u32 %v2175_v23, 16 }
 0x19b   : > { %v2549_v50 = vor.u32 %v2548_v41, %v2545_v39  ;;  %v4695_v51 = vsel %vm7965_vm1, %v5774_v62, %v4694_v42  ;;  %v4696_v52 = vrot.slane %v4694_v42, 4  ;;  %v2561_v58 = vshrl.u32 %v2176_v43, 16  ;;  %v2181_v41 = vld [vmem:[%s7392_s21 + $0xb4] sm:$0xe]  ;;  %v2182_v62 = vld [vmem:[%s7392_s21 + $0xb8] sm:$0xf] }
 0x19c   : > { %v2540_v55 = vsel %vm7408_vm2, %v2531_v44, %v2539_v45  ;;  %v2541_v56 = vrot.slane %v2539_v45, 4  ;;  %v2554_v57 = vrot.slane %v2552_v48, 5  ;;  %v2557_v63 = vrot.slane %v2555_v53, 6 }
 0x19d   : > { %v4698_v61 = vsel %vm7965_vm1, %v4696_v52, %v4697_v46  ;;  %v2564_v0 = vshll.u32 %v2176_v43, 16  ;;  %v2571_v1 = vshrl.u32 %v2177_v47, 16  ;;  %v2563_v6 = vrot.slane %v2561_v58, 5  ;;  %v2183_v52 = vld [vmem:[%s7392_s21 + $0xbc] sm:$0x3] }
 0x19e   : > { %v2550_v3 = vsel %vm7408_vm2, %v2541_v56, %v2549_v50  ;;  %v5807_v5 = vcombine.low %v4695_v51, %v4698_v61  ;;  %v2574_v7 = vshll.u32 %v2177_v47, 16  ;;  %v2558_v10 = vor.u32 %v2557_v63, %v2554_v57  ;;  %v4554_v61 = vld [vmem:[%s7392_s21 + $0xb4] sm:$0x8] }
 0x19f   : > { %v5652_v9 = vcombine.low %v2540_v55, %v2550_v3  ;;  %v2566_v11 = vrot.slane %v2564_v0, 6  ;;  %v2573_v13 = vrot.slane %v2571_v1, 5  ;;  %v5775_v16 = vrot.slane %v4548_v54, 11  ;;  %v4555_v3 = vld [vmem:[%s7392_s21 + $0xb8] sm:$0xf] }
 0x1a0   : > { %6484 = vmatprep.mubr.bf16.mxu0 %v5807_v5  ;;  %v2576_v14 = vrot.slane %v2574_v7, 6  ;;  %v4701_v60 = vrot.slane %v4549_v59, 7  ;;  %v4704_v17 = vrot.slane %v4550_v2, 7  ;;  %v2559_v18 = vrot.slane %v2558_v10, 4 }
 0x1a1   : > { %6340 = vmatprep.mubr.bf16.mxu1 %v5652_v9  ;;  %v2567_v19 = vor.u32 %v2566_v11, %v2563_v6  ;;  %v2580_v20 = vshrl.u32 %v2178_v8, 16  ;;  %v2583_v21 = vshll.u32 %v2178_v8, 16  ;;  %v2589_v26 = vshrl.u32 %v2179_v12, 16  ;;  %v4556_v9 = vld [vmem:[%s7392_s21 + $0xbc] sm:$0x7] }
 0x1a2   : > { %v2577_v22 = vor.u32 %v2576_v14, %v2573_v13  ;;  %v4702_v24 = vsel %vm7965_vm1, %v5775_v16, %v4701_v60  ;;  %v4703_v25 = vrot.slane %v4701_v60, 4  ;;  %v2592_v34 = vshll.u32 %v2179_v12, 16 }
 0x1a3   : > { %v2568_v4 = vsel %vm7408_vm2, %v2559_v18, %v2567_v19  ;;  %v2569_v28 = vrot.slane %v2567_v19, 4  ;;  %v2582_v29 = vrot.slane %v2580_v20, 5  ;;  %v2585_v30 = vrot.slane %v2583_v21, 6 }
 0x1a4   : > { %v4705_v15 = vsel %vm7965_vm1, %v4703_v25, %v4704_v17  ;;  %v2591_v33 = vrot.slane %v2589_v26, 5  ;;  %v2599_v23 = vshrl.u32 %v2180_v32, 16  ;;  %v2602_v39 = vshll.u32 %v2180_v32, 16 }
 0x1a5   : > { %v2578_v36 = vsel %vm7408_vm2, %v2569_v28, %v2577_v22  ;;  %v5808_v37 = vcombine.low %v4702_v24, %v4705_v15  ;;  %v2586_v38 = vor.u32 %v2585_v30, %v2582_v29  ;;  %v2594_v43 = vrot.slane %v2592_v34, 6 }
 0x1a6   : > { %v5653_v42 = vcombine.low %v2568_v4, %v2578_v36  ;;  %v2601_v44 = vrot.slane %v2599_v23, 5  ;;  %v5776_v45 = vrot.slane %v4551_v27, 11  ;;  %v2604_v47 = vrot.slane %v2602_v39, 6 }
 0x1a7   : > { %6485 = vmatmul.mubr.bf16.gmra.mrb[24].mxu0 %v5808_v37  ;;  %v2587_v46 = vrot.slane %v2586_v38, 4  ;;  %v4708_v48 = vrot.slane %v4552_v31, 7  ;;  %v4711_v50 = vrot.slane %v4553_v35, 7  ;;  %v2595_v51 = vor.u32 %v2594_v43, %v2591_v33  ;;  %v296_v43 = vld [vmem:[#allocation2 + $0x10] sm:$0xff] }
 0x1a8   : > { %6341 = vmatmul.mubr.bf16.gmra.mrb[24].mxu1 %v5653_v42  ;;  %v2608_v53 = vshrl.u32 %v2181_v41, 16  ;;  %v2611_v54 = vshll.u32 %v2181_v41, 16  ;;  %v2617_v55 = vshrl.u32 %v2182_v62, 16  ;;  %v2605_v56 = vor.u32 %v2604_v47, %v2601_v44  ;;  %v294_v44 = vld [vmem:[#allocation2] sm:$0xff]  ;;  %v295_v47 = vld [vmem:[#allocation2 + $0x8] sm:$0xff] }
 0x1a9   : > { %v4709_v57 = vsel %vm7965_vm1, %v5776_v45, %v4708_v48  ;;  %v4710_v58 = vrot.slane %v4708_v48, 4  ;;  %v2620_v59 = vshll.u32 %v2182_v62, 16  ;;  %v2596_v63 = vsel %vm7408_vm2, %v2587_v46, %v2595_v51  ;;  %v297_v45 = vld [vmem:[#allocation2 + $0x18] sm:$0xff] }
 0x1aa   : > { %v2597_v0 = vrot.slane %v2595_v51, 4  ;;  %v2610_v1 = vrot.slane %v2608_v53, 5  ;;  %v2613_v2 = vrot.slane %v2611_v54, 6  ;;  %v2619_v6 = vrot.slane %v2617_v55, 5 }
 0x1ab   : > { %v4712_v5 = vsel %vm7965_vm1, %v4710_v58, %v4711_v50  ;;  %v2622_v7 = vrot.slane %v2620_v59, 6  ;;  %v2627_v8 = vshrl.u32 %v2183_v52, 16  ;;  %v2630_v12 = vshll.u32 %v2183_v52, 16  ;;  %v300_v59 = vld [vmem:[#allocation2 + $0x30] sm:$0xff] }
 0x1ac   : > { %v2606_v10 = vsel %vm7408_vm2, %v2597_v0, %v2605_v56  ;;  %v5809_v11 = vcombine.low %v4709_v57, %v4712_v5  ;;  %v2614_v13 = vor.u32 %v2613_v2, %v2610_v1  ;;  %v5777_v17 = vrot.slane %v4554_v61, 11  ;;  %v301_v0 = vld [vmem:[#allocation2 + $0x38] sm:$0xff]  ;;  %v299_v2 = vld [vmem:[#allocation2 + $0x28] sm:$0xff] }
 0x1ad   : > { %v5654_v14 = vcombine.low %v2596_v63, %v2606_v10  ;;  %v2623_v16 = vor.u32 %v2622_v7, %v2619_v6  ;;  %v2629_v60 = vrot.slane %v2627_v8, 5  ;;  %v2632_v19 = vrot.slane %v2630_v12, 6  ;;  %v298_v63 = vld [vmem:[#allocation2 + $0x20] sm:$0xff] }
 0x1ae   : > { %6488 = vmatprep.mubr.bf16.mxu0 %v5809_v11  ;;  %v2615_v18 = vrot.slane %v2614_v13, 4  ;;  %v4715_v32 = vrot.slane %v4555_v3, 7  ;;  %v4718_v20 = vrot.slane %v4556_v9, 7 }
 0x1af   : > { %6344 = vmatprep.mubr.bf16.mxu1 %v5654_v14  ;;  %v2625_v21 = vrot.slane %v2623_v16, 4  ;;  %v2633_v24 = vor.u32 %v2632_v19, %v2629_v60  ;;  %v304_v14 = vld [vmem:[#allocation2 + $0x50] sm:$0xff]  ;;  %v302_v60 = vld [vmem:[#allocation2 + $0x40] sm:$0xff]  ;;  %v303_v19 = vld [vmem:[#allocation2 + $0x48] sm:$0xff] }
 0x1b0   : > { %v2624_v22 = vsel %vm7408_vm2, %v2615_v18, %v2623_v16  ;;  %v4716_v25 = vsel %vm7965_vm1, %v5777_v17, %v4715_v32  ;;  %v4717_v26 = vrot.slane %v4715_v32, 4  ;;  %v305_v17 = vld [vmem:[#allocation2 + $0x58] sm:$0xff] }
 0x1b1   : > { %v2634_v27 = vsel %vm7408_vm2, %v2625_v21, %v2633_v24 }
 0x1b2   : > { %v4719_v4 = vsel %vm7965_vm1, %v4717_v26, %v4718_v20  ;;  %v5655_v28 = vcombine.low %v2624_v22, %v2634_v27 }
 0x1b3   : > { %v5810_v29 = vcombine.low %v4716_v25, %v4719_v4 }
 0x1b4   : > { %6345 = vmatmul.mubr.bf16.gmra.mrb[28].mxu1 %v5655_v28 }
 0x1b5   : > { %6489 = vmatmul.mubr.bf16.gmra.mrb[28].mxu0 %v5810_v29  ;;  %v308_v29 = vld [vmem:[#allocation2 + $0x70] sm:$0xff] }
 0x208   : > { %v6270_v30 = vpop.f32.mrb[0].mxu1 }
 0x209   : > { %v1945_v31 = vpop.f32.mrb[1].mxu1  ;;  %v6510_v46 = vadd.f32 %v6270_v30, %v296_v43 }
 0x20a   : > { %v6271_v15 = vpop.f32.mrb[2].mxu1  ;;  %v6516_v48 = vadd.f32 %v1945_v31, %v294_v44  ;;  %v306_v31 = vld [vmem:[#allocation2 + $0x60] sm:$0xff] }
 0x20b   : > { %v1948_v33 = vpop.f32.mrb[3].mxu1  ;;  %v6522_v51 = vadd.f32 %v6271_v15, %v297_v45  ;;  %v309_v15 = vld [vmem:[#allocation2 + $0x78] sm:$0xff] }
 0x20c   : > { %v6528_v54 = vadd.f32 %v1948_v33, %v295_v47  ;;  %v310_v47 = vld [vmem:[#allocation2 + $0x80] sm:$0xff] }
 0x215   : > { %v6274_v34 = vpop.f32.mrb[4].mxu1 }
 0x216   : > { %v1961_v23 = vpop.f32.mrb[5].mxu1  ;;  %v6534_v1 = vadd.f32 %v6274_v34, %v300_v59  ;;  %v307_v34 = vld [vmem:[#allocation2 + $0x68] sm:$0xff] }
 0x217   : > { %v6275_v35 = vpop.f32.mrb[6].mxu1  ;;  %v6540_v3 = vadd.f32 %v1961_v23, %v298_v63 }
 0x218   : > { %v1964_v36 = vpop.f32.mrb[7].mxu1  ;;  %v6546_v6 = vadd.f32 %v6275_v35, %v301_v0 }
 0x219   : > { %v6552_v9 = vadd.f32 %v1964_v36, %v299_v2  ;;  %v316_v2 = vld [vmem:[#allocation2 + $0xb0] sm:$0xff] }
 0x223   : > { %v6278_v37 = vpop.f32.mrb[8].mxu1 }
 0x224   : > { %v1977_v38 = vpop.f32.mrb[9].mxu1  ;;  %v6558_v18 = vadd.f32 %v6278_v37, %v304_v14 }
 0x225   : > { %v6279_v39 = vpop.f32.mrb[10].mxu1  ;;  %v6564_v32 = vadd.f32 %v1977_v38, %v302_v60 }
 0x226   : > { %v1980_v40 = vpop.f32.mrb[11].mxu1  ;;  %v6570_v21 = vadd.f32 %v6279_v39, %v305_v17 }
 0x227   : > { %v6576_v25 = vadd.f32 %v1980_v40, %v303_v19 }
 0x230   : > { %v8185_v41 = vpop.f32.mrb[12].mxu1 }
 0x231   : > { %v8187_v49 = vpop.f32.mrb[13].mxu1  ;;  %v6582_v33 = vadd.f32 %v8185_v41, %v308_v29  ;;  %v312_v41 = vld [vmem:[#allocation2 + $0x90] sm:$0xff] }
 0x232   : > { %v8189_v62 = vpop.f32.mrb[14].mxu1  ;;  %v6588_v23 = vadd.f32 %v8187_v49, %v306_v31  ;;  %v319_v31 = vld [vmem:[#allocation2 + $0xc8] sm:$0xff] }
 0x233   : > { %v8191_v42 = vpop.f32.mrb[15].mxu1  ;;  %v6594_v36 = vadd.f32 %v8189_v62, %v309_v15 }
 0x234   : > { %v6600_v39 = vadd.f32 %v8191_v42, %v307_v34 }
 0x240   : > { %v6462_v50 = vpop.f32.mrb[0].mxu0 }
 0x241   : > { %v6513_v52 = vadd.f32 %v6510_v46, %v6462_v50  ;;  %v4917_v53 = vpop.f32.mrb[1].mxu0  ;;  %v313_v50 = vld [vmem:[#allocation2 + $0x98] sm:$0xff] }
 0x242   : > { %v6519_v55 = vadd.f32 %v6516_v48, %v4917_v53  ;;  %v6463_v56 = vpop.f32.mrb[2].mxu0  ;;  %v311_v53 = vld [vmem:[#allocation2 + $0x88] sm:$0xff] }
 0x243   : > { %5078 = vst [vmem:[#allocation2 + $0x10] sm:$0xff] %v6513_v52  ;;  %v6525_v57 = vadd.f32 %v6522_v51, %v6463_v56  ;;  %v4920_v58 = vpop.f32.mrb[3].mxu0 }
 0x244   : > { %5076 = vst [vmem:[#allocation2] sm:$0xff] %v6519_v55  ;;  %v6531_v61 = vadd.f32 %v6528_v54, %v4920_v58 }
 0x245   : > { %5079 = vst [vmem:[#allocation2 + $0x18] sm:$0xff] %v6525_v57 }
 0x246   : > { %5077 = vst [vmem:[#allocation2 + $0x8] sm:$0xff] %v6531_v61 }
 0x248   : > { %v6466_v5 = vpop.f32.mrb[4].mxu0 }
 0x249   : > { %v6537_v7 = vadd.f32 %v6534_v1, %v6466_v5  ;;  %v4933_v8 = vpop.f32.mrb[5].mxu0 }
 0x24a   : > { %v6543_v10 = vadd.f32 %v6540_v3, %v4933_v8  ;;  %v6467_v11 = vpop.f32.mrb[6].mxu0  ;;  %v314_v3 = vld [vmem:[#allocation2 + $0xa0] sm:$0xff] }
 0x24b   : > { %5082 = vst [vmem:[#allocation2 + $0x30] sm:$0xff] %v6537_v7  ;;  %v6549_v13 = vadd.f32 %v6546_v6, %v6467_v11  ;;  %v4936_v12 = vpop.f32.mrb[7].mxu0  ;;  %v317_v7 = vld [vmem:[#allocation2 + $0xb8] sm:$0xff]  ;;  %v315_v11 = vld [vmem:[#allocation2 + $0xa8] sm:$0xff] }
 0x24c   : > { %5080 = vst [vmem:[#allocation2 + $0x20] sm:$0xff] %v6543_v10  ;;  %v6555_v16 = vadd.f32 %v6552_v9, %v4936_v12 }
 0x24d   : > { %5083 = vst [vmem:[#allocation2 + $0x38] sm:$0xff] %v6549_v13 }
 0x24e   : > { %5081 = vst [vmem:[#allocation2 + $0x28] sm:$0xff] %v6555_v16 }
 0x250   : > { %v6470_v20 = vpop.f32.mrb[8].mxu0 }
 0x251   : > { %v6561_v22 = vadd.f32 %v6558_v18, %v6470_v20  ;;  %v4949_v24 = vpop.f32.mrb[9].mxu0 }
 0x252   : > { %v6567_v26 = vadd.f32 %v6564_v32, %v4949_v24  ;;  %v6471_v27 = vpop.f32.mrb[10].mxu0 }
 0x253   : > { %5086 = vst [vmem:[#allocation2 + $0x50] sm:$0xff] %v6561_v22  ;;  %v6573_v4 = vadd.f32 %v6570_v21, %v6471_v27  ;;  %v4952_v28 = vpop.f32.mrb[11].mxu0  ;;  %v320_v22 = vld [vmem:[#allocation2 + $0xd0] sm:$0xff] }
 0x254   : > { %5084 = vst [vmem:[#allocation2 + $0x40] sm:$0xff] %v6567_v26  ;;  %v6579_v30 = vadd.f32 %v6576_v25, %v4952_v28  ;;  %v318_v25 = vld [vmem:[#allocation2 + $0xc0] sm:$0xff] }
 0x255   : > { %5087 = vst [vmem:[#allocation2 + $0x58] sm:$0xff] %v6573_v4  ;;  %v321_v4 = vld [vmem:[#allocation2 + $0xd8] sm:$0xff] }
 0x256   : > { %5085 = vst [vmem:[#allocation2 + $0x48] sm:$0xff] %v6579_v30 }
 0x258   : > { %v6474_v35 = vpop.f32.mrb[12].mxu0 }
 0x259   : > { %v6585_v37 = vadd.f32 %v6582_v33, %v6474_v35  ;;  %v4965_v38 = vpop.f32.mrb[13].mxu0 }
 0x25a   : > { %v6591_v40 = vadd.f32 %v6588_v23, %v4965_v38  ;;  %v6475_v43 = vpop.f32.mrb[14].mxu0 }
 0x25b   : > { %5090 = vst [vmem:[#allocation2 + $0x70] sm:$0xff] %v6585_v37  ;;  %v6597_v44 = vadd.f32 %v6594_v36, %v6475_v43  ;;  %v4968_v45 = vpop.f32.mrb[15].mxu0  ;;  %v324_v43 = vld [vmem:[#allocation2 + $0xf0] sm:$0xff] }
 0x25c   : > { %5088 = vst [vmem:[#allocation2 + $0x60] sm:$0xff] %v6591_v40  ;;  %v6603_v46 = vadd.f32 %v6600_v39, %v4968_v45 }
 0x25d   : > { %5091 = vst [vmem:[#allocation2 + $0x78] sm:$0xff] %v6597_v44  ;;  %v322_v44 = vld [vmem:[#allocation2 + $0xe0] sm:$0xff] }
 0x25e   : > { %5089 = vst [vmem:[#allocation2 + $0x68] sm:$0xff] %v6603_v46 }
 0x260   : > { %v6334_v48 = vpop.f32.mrb[16].mxu1  ;;  %v6478_v49 = vpop.f32.mrb[16].mxu0 }
 0x261   : > { %v6606_v51 = vadd.f32 %v6334_v48, %v312_v41  ;;  %v2896_v62 = vpop.f32.mrb[17].mxu1  ;;  %v4981_v52 = vpop.f32.mrb[17].mxu0  ;;  %v325_v41 = vld [vmem:[#allocation2 + $0xf8] sm:$0xff] }
 0x262   : > { %v6612_v54 = vadd.f32 %v2896_v62, %v310_v47  ;;  %v6335_v42 = vpop.f32.mrb[18].mxu1  ;;  %v6479_v55 = vpop.f32.mrb[18].mxu0 }
 0x263   : > { %v6609_v56 = vadd.f32 %v6606_v51, %v6478_v49  ;;  %v6618_v57 = vadd.f32 %v6335_v42, %v313_v50  ;;  %v2899_v58 = vpop.f32.mrb[19].mxu1  ;;  %v4984_v59 = vpop.f32.mrb[19].mxu0  ;;  %v323_v50 = vld [vmem:[#allocation2 + $0xe8] sm:$0xff] }
 0x264   : > { %v6615_v61 = vadd.f32 %v6612_v54, %v4981_v52  ;;  %v6624_v63 = vadd.f32 %v2899_v58, %v311_v53 }
 0x265   : > { %5094 = vst [vmem:[#allocation2 + $0x90] sm:$0xff] %v6609_v56  ;;  %v6621_v0 = vadd.f32 %v6618_v57, %v6479_v55 }
 0x266   : > { %5092 = vst [vmem:[#allocation2 + $0x80] sm:$0xff] %v6615_v61  ;;  %v6627_v1 = vadd.f32 %v6624_v63, %v4984_v59  ;;  %v5112_v61 = vld [vmem:[#allocation2] sm:$0xff] (!%p5819_p10)  ;;  %v5113_v63 = vld [vmem:[#allocation2 + $0x8] sm:$0xff] (!%p5819_p10) }
 0x267   : > { %5095 = vst [vmem:[#allocation2 + $0x98] sm:$0xff] %v6621_v0  ;;  %v8198_v0 = vld [vmem:[#allocation6] ss:$0 sm:$0xff] (!%p5819_p10) }
 0x268   : > { %5093 = vst [vmem:[#allocation2 + $0x88] sm:$0xff] %v6627_v1  ;;  %v5151_v1 = vadd.f32 (!%p5819_p10), %v8198_v0, %v5112_v61 }
 0x26c   : > { %v6338_v5 = vpop.f32.mrb[20].mxu1 }
 0x26d   : > { %v6482_v6 = vpop.f32.mrb[20].mxu0  ;;  %v6630_v8 = vadd.f32 %v6338_v5, %v316_v2  ;;  %v2912_v9 = vpop.f32.mrb[21].mxu1  ;;  %v5152_v2 = vadd.f32 (!%p5819_p10), %v8198_v0, %v5113_v63  ;;  %v5115_v5 = vld [vmem:[#allocation2 + $0x18] sm:$0xff] (!%p5819_p10) }
 0x26e   : > { %v4997_v10 = vpop.f32.mrb[21].mxu0  ;;  %v6636_v13 = vadd.f32 %v2912_v9, %v314_v3  ;;  %v6339_v12 = vpop.f32.mrb[22].mxu1  ;;  %v5114_v3 = vld [vmem:[#allocation2 + $0x10] sm:$0xff] (!%p5819_p10)  ;;  %v5117_v9 = vld [vmem:[#allocation2 + $0x28] sm:$0xff] (!%p5819_p10) }
 0x26f   : > { %v6483_v14 = vpop.f32.mrb[22].mxu0  ;;  %v6633_v16 = vadd.f32 %v6630_v8, %v6482_v6  ;;  %v6642_v60 = vadd.f32 %v6339_v12, %v317_v7  ;;  %v2915_v17 = vpop.f32.mrb[23].mxu1  ;;  %v5116_v6 = vld [vmem:[#allocation2 + $0x20] sm:$0xff] (!%p5819_p10)  ;;  %v5153_v7 = vadd.f32 (!%p5819_p10), %v8198_v0, %v5114_v3  ;;  %v5154_v8 = vadd.f32 (!%p5819_p10), %v8198_v0, %v5115_v5 }
 0x270   : > { %v5000_v18 = vpop.f32.mrb[23].mxu0  ;;  %v6639_v19 = vadd.f32 %v6636_v13, %v4997_v10  ;;  %v6648_v32 = vadd.f32 %v2915_v17, %v315_v11  ;;  %v5155_v10 = vadd.f32 (!%p5819_p10), %v8198_v0, %v5116_v6  ;;  %v5118_v11 = vld [vmem:[#allocation2 + $0x30] sm:$0xff] (!%p5819_p10)  ;;  %v5119_v13 = vld [vmem:[#allocation2 + $0x38] sm:$0xff] (!%p5819_p10)  ;;  %v5896_v12 = vpack.c.bf16 (!%p5819_p10), %v5152_v2, %v5151_v1  ;;  %v5120_v17 = vld [vmem:[#allocation2 + $0x40] sm:$0xff] (!%p5819_p10) }
 0x271   : > { %5098 = vst [vmem:[#allocation2 + $0xb0] sm:$0xff] %v6633_v16  ;;  %v6645_v20 = vadd.f32 %v6642_v60, %v6483_v14  ;;  %v5156_v14 = vadd.f32 (!%p5819_p10), %v8198_v0, %v5117_v9  ;;  %v5157_v16 = vadd.f32 (!%p5819_p10), %v8198_v0, %v5118_v11  ;;  %v5158_v60 = vadd.f32 (!%p5819_p10), %v8198_v0, %v5119_v13 }
 0x272   : > { %5096 = vst [vmem:[#allocation2 + $0xa0] sm:$0xff] %v6639_v19  ;;  %v6651_v21 = vadd.f32 %v6648_v32, %v5000_v18  ;;  %v5121_v18 = vld [vmem:[#allocation2 + $0x48] sm:$0xff] (!%p5819_p10)  ;;  %v5122_v19 = vld [vmem:[#allocation2 + $0x50] sm:$0xff] (!%p5819_p10)  ;;  %v5901_v32 = vpack.c.bf16 (!%p5819_p10), %v5154_v8, %v5153_v7  ;;  %5897 = vst [vmem:[%s7373_s10] sm:$0xff] (!%p5819_p10), %v5896_v12  }
 0x273   : > { %5099 = vst [vmem:[#allocation2 + $0xb8] sm:$0xff] %v6645_v20  ;;  %v5159_v20 = vadd.f32 (!%p5819_p10), %v8198_v0, %v5120_v17 }
 0x274   : > { %5097 = vst [vmem:[#allocation2 + $0xa8] sm:$0xff] %v6651_v21  ;;  %v5160_v21 = vadd.f32 (!%p5819_p10), %v8198_v0, %v5121_v18  ;;  %5973 = vst [vmem:[%s7373_s10 + $0x8] sm:$0xff] (!%p5819_p10), %v5901_v32  }
 0x27a   : > { %v6486_v24 = vpop.f32.mrb[24].mxu0 }
 0x27b   : > { %v6342_v26 = vpop.f32.mrb[24].mxu1  ;;  %v5013_v27 = vpop.f32.mrb[25].mxu0 }
 0x27c   : > { %v6654_v28 = vadd.f32 %v6342_v26, %v320_v22  ;;  %v2928_v29 = vpop.f32.mrb[25].mxu1  ;;  %v6487_v30 = vpop.f32.mrb[26].mxu0  ;;  %v5123_v22 = vld [vmem:[#allocation2 + $0x58] sm:$0xff] (!%p5819_p10)  ;;  %v5125_v26 = vld [vmem:[#allocation2 + $0x68] sm:$0xff] (!%p5819_p10) }
 0x27d   : > { %v6660_v15 = vadd.f32 %v2928_v29, %v318_v25  ;;  %v6343_v33 = vpop.f32.mrb[26].mxu1  ;;  %v5016_v34 = vpop.f32.mrb[27].mxu0  ;;  %v5124_v25 = vld [vmem:[#allocation2 + $0x60] sm:$0xff] (!%p5819_p10) }
 0x27e   : > { %v6657_v23 = vadd.f32 %v6654_v28, %v6486_v24  ;;  %v6666_v35 = vadd.f32 %v6343_v33, %v321_v4  ;;  %v2931_v36 = vpop.f32.mrb[27].mxu1  ;;  %v5161_v24 = vadd.f32 (!%p5819_p10), %v8198_v0, %v5122_v19  ;;  %v5911_v4 = vpack.c.bf16 (!%p5819_p10), %v5158_v60, %v5157_v16 }
 0x27f   : > { %v6663_v37 = vadd.f32 %v6660_v15, %v5013_v27  ;;  %v6672_v38 = vadd.f32 %v2931_v36, %v319_v31  ;;  %v5906_v27 = vpack.c.bf16 (!%p5819_p10), %v5156_v14, %v5155_v10  ;;  %v5162_v28 = vadd.f32 (!%p5819_p10), %v8198_v0, %v5123_v22  ;;  %v5127_v31 = vld [vmem:[#allocation2 + $0x78] sm:$0xff] (!%p5819_p10)  ;;  %v5128_v15 = vld [vmem:[#allocation2 + $0x80] sm:$0xff] (!%p5819_p10)  ;;  %v5129_v36 = vld [vmem:[#allocation2 + $0x88] sm:$0xff] (!%p5819_p10) }
 0x280   : > { %5102 = vst [vmem:[#allocation2 + $0xd0] sm:$0xff] %v6657_v23  ;;  %v6669_v39 = vadd.f32 %v6666_v35, %v6487_v30  ;;  %v5163_v29 = vadd.f32 (!%p5819_p10), %v8198_v0, %v5124_v25  ;;  %v5126_v30 = vld [vmem:[#allocation2 + $0x70] sm:$0xff] (!%p5819_p10)  ;;  %v5916_v33 = vpack.c.bf16 (!%p5819_p10), %v5160_v21, %v5159_v20  ;;  %v5166_v35 = vadd.f32 (!%p5819_p10), %v8198_v0, %v5127_v31 }
 0x281   : > { %5100 = vst [vmem:[#allocation2 + $0xc0] sm:$0xff] %v6663_v37  ;;  %v6675_v40 = vadd.f32 %v6672_v38, %v5016_v34  ;;  %v5164_v34 = vadd.f32 (!%p5819_p10), %v8198_v0, %v5125_v26  ;;  %v5165_v23 = vadd.f32 (!%p5819_p10), %v8198_v0, %v5126_v30  ;;  %v5130_v37 = vld [vmem:[#allocation2 + $0x90] sm:$0xff] (!%p5819_p10)  ;;  %v5131_v38 = vld [vmem:[#allocation2 + $0x98] sm:$0xff] (!%p5819_p10)  ;;  %5974 = vst [vmem:[%s7373_s10 + $0x10] sm:$0xff] (!%p5819_p10), %v5906_v27  }
 0x282   : > { %5103 = vst [vmem:[#allocation2 + $0xd8] sm:$0xff] %v6669_v39  ;;  %5975 = vst [vmem:[%s7373_s10 + $0x18] sm:$0xff] (!%p5819_p10), %v5911_v4   ;;  %v5921_v39 = vpack.c.bf16 (!%p5819_p10), %v5162_v28, %v5161_v24 }
 0x283   : > { %5101 = vst [vmem:[#allocation2 + $0xc8] sm:$0xff] %v6675_v40  ;;  %v5167_v40 = vadd.f32 (!%p5819_p10), %v8198_v0, %v5128_v15  ;;  %5976 = vst [vmem:[%s7373_s10 + $0x20] sm:$0xff] (!%p5819_p10), %v5916_v33  }
 0x284   : > { %5977 = vst [vmem:[%s7373_s10 + $0x28] sm:$0xff] (!%p5819_p10), %v5921_v39  }
 0x287   : > { %v6346_v45 = vpop.f32.mrb[28].mxu1 }
 0x288   : > { %v6490_v46 = vpop.f32.mrb[28].mxu0  ;;  %v6678_v47 = vadd.f32 %v6346_v45, %v324_v43  ;;  %v2944_v48 = vpop.f32.mrb[29].mxu1  ;;  %v5168_v43 = vadd.f32 (!%p5819_p10), %v8198_v0, %v5129_v36  ;;  %v5132_v45 = vld [vmem:[#allocation2 + $0xa0] sm:$0xff] (!%p5819_p10) }
 0x289   : > { %v5029_v49 = vpop.f32.mrb[29].mxu0  ;;  %v6684_v51 = vadd.f32 %v2944_v48, %v322_v44  ;;  %v6347_v62 = vpop.f32.mrb[30].mxu1  ;;  %5111 = sbr.rel (%p5819_p10) target bundleno = 668 (0x29c), region = 48  ;;  %v5169_v44 = vadd.f32 (!%p5819_p10), %v8198_v0, %v5130_v37  ;;  %v5931_v48 = vpack.c.bf16 (!%p5819_p10), %v5166_v35, %v5165_v23 }
 0x28a   : > { %v6491_v52 = vpop.f32.mrb[30].mxu0  ;;  %v6681_v53 = vadd.f32 %v6678_v47, %v6490_v46  ;;  %v6690_v54 = vadd.f32 %v6347_v62, %v325_v41  ;;  %v2947_v42 = vpop.f32.mrb[31].mxu1  ;;  %v5133_v46 = vld [vmem:[#allocation2 + $0xa8] sm:$0xff] (!%p5819_p10)  ;;  %v5134_v41 = vld [vmem:[#allocation2 + $0xb0] sm:$0xff] (!%p5819_p10)  ;;  %v5926_v47 = vpack.c.bf16 (!%p5819_p10), %v5164_v34, %v5163_v29  ;;  %v5136_v62 = vld [vmem:[#allocation2 + $0xc0] sm:$0xff] (!%p5819_p10) }
 0x28b   : > { %v5032_v55 = vpop.f32.mrb[31].mxu0  ;;  %v6687_v56 = vadd.f32 %v6684_v51, %v5029_v49  ;;  %v6696_v57 = vadd.f32 %v2947_v42, %v323_v50  ;;  %v5170_v49 = vadd.f32 (!%p5819_p10), %v8198_v0, %v5131_v38  ;;  %v5171_v50 = vadd.f32 (!%p5819_p10), %v8198_v0, %v5132_v45  ;;  %v5135_v51 = vld [vmem:[#allocation2 + $0xb8] sm:$0xff] (!%p5819_p10)  ;;  %5979 = vst [vmem:[%s7373_s10 + $0x38] sm:$0xff] (!%p5819_p10), %v5931_v48  }
 0x28c   : > { %5106 = vst [vmem:[#allocation2 + $0xf0] sm:$0xff] %v6681_v53  ;;  %v6693_v58 = vadd.f32 %v6690_v54, %v6491_v52  ;;  %v5137_v52 = vld [vmem:[#allocation2 + $0xc8] sm:$0xff] (!%p5819_p10)  ;;  %v5936_v53 = vpack.c.bf16 (!%p5819_p10), %v5168_v43, %v5167_v40  ;;  %v5172_v54 = vadd.f32 (!%p5819_p10), %v8198_v0, %v5133_v46  ;;  %v5173_v42 = vadd.f32 (!%p5819_p10), %v8198_v0, %v5134_v41 }
 0x28d   : > { %5104 = vst [vmem:[#allocation2 + $0xe0] sm:$0xff] %v6687_v56  ;;  %v6699_v59 = vadd.f32 %v6696_v57, %v5032_v55  ;;  %v5174_v55 = vadd.f32 (!%p5819_p10), %v8198_v0, %v5135_v51  ;;  %v5138_v56 = vld [vmem:[#allocation2 + $0xd0] sm:$0xff] (!%p5819_p10)  ;;  %v5139_v57 = vld [vmem:[#allocation2 + $0xd8] sm:$0xff] (!%p5819_p10)  ;;  %5978 = vst [vmem:[%s7373_s10 + $0x30] sm:$0xff] (!%p5819_p10), %v5926_v47   ;;  %v5175_v61 = vadd.f32 (!%p5819_p10), %v8198_v0, %v5136_v62 }
 0x28e   : > { %5107 = vst [vmem:[#allocation2 + $0xf8] sm:$0xff] %v6693_v58  ;;  %v5176_v63 = vadd.f32 (!%p5819_p10), %v8198_v0, %v5137_v52  ;;  %v5177_v1 = vadd.f32 (!%p5819_p10), %v8198_v0, %v5138_v56  ;;  %5980 = vst [vmem:[%s7373_s10 + $0x40] sm:$0xff] (!%p5819_p10), %v5936_v53   ;;  %v5946_v6 = vpack.c.bf16 (!%p5819_p10), %v5172_v54, %v5171_v50 }
 0x28f   : > { %5105 = vst [vmem:[#allocation2 + $0xe8] sm:$0xff] %v6699_v59  ;;  %v5941_v59 = vpack.c.bf16 (!%p5819_p10), %v5170_v49, %v5169_v44  ;;  %v5951_v7 = vpack.c.bf16 (!%p5819_p10), %v5174_v55, %v5173_v42  ;;  %v5178_v8 = vadd.f32 (!%p5819_p10), %v8198_v0, %v5139_v57 }
 0x290   : > { %v5956_v10 = vpack.c.bf16 %v5176_v63, %v5175_v61  ;;  %5982 = vst [vmem:[%s7373_s10 + $0x50] sm:$0xff] %v5946_v6  }
 0x291   : > { %5981 = vst [vmem:[%s7373_s10 + $0x48] sm:$0xff] %v5941_v59   ;;  %5983 = vst [vmem:[%s7373_s10 + $0x58] sm:$0xff] %v5951_v7   ;;  %v5961_v14 = vpack.c.bf16 %v5178_v8, %v5177_v1 }
 0x292   : > { %5984 = vst [vmem:[%s7373_s10 + $0x60] sm:$0xff] %v5956_v10  }
 0x293   : > { %v5142_v3 = vld [vmem:[#allocation2 + $0xf0] sm:$0xff]  ;;  %5985 = vst [vmem:[%s7373_s10 + $0x68] sm:$0xff] %v5961_v14  }
 0x294   : > { %v5140_v58 = vld [vmem:[#allocation2 + $0xe0] sm:$0xff]  ;;  %v5181_v13 = vadd.f32 %v8198_v0, %v5142_v3 }
 0x295   : > { %v5143_v5 = vld [vmem:[#allocation2 + $0xf8] sm:$0xff]  ;;  %v5179_v9 = vadd.f32 %v8198_v0, %v5140_v58 }
 0x296   : > { %v5141_v2 = vld [vmem:[#allocation2 + $0xe8] sm:$0xff]  ;;  %v5182_v12 = vadd.f32 %v8198_v0, %v5143_v5 }
 0x297   : > { %v5180_v11 = vadd.f32 %v8198_v0, %v5141_v2 }
 0x298   : > { %v5971_v60 = vpack.c.bf16 %v5182_v12, %v5181_v13 }
 0x299   : > { %v5966_v16 = vpack.c.bf16 %v5180_v11, %v5179_v9 }
 0x29a   : > { %5987 = vst [vmem:[%s7373_s10 + $0x78] sm:$0xff] %v5971_v60  }
 0x29b   : > { %5986 = vst [vmem:[%s7373_s10 + $0x70] sm:$0xff] %v5966_v16  }
 0x29c PF: > { %s5892_s15 = sshll.u32 %s7184_s16, 11  ;;  %s5358_s23 = sshll.u32 %s7373_s10, 4  ;;  %s8255_s23 = int_to_ptr.vmem [resolvable:$true] %s5358_s23 }
 0x29d   : > { %s8252_s28 = scalar_lea.hbm %s8314_s3, %s5892_s15  ;;  %s8259_s18 = scalar_lea.sflag [#allocation5], %s210_s22 }
 0x29e   : > { %s7094_s27 = scalar_lea.vmem %s8255_s23, 2048  ;;  %p8343_p1 = scmp.ne.s32.totalorder %s8323_s25, 0 }
 0x29f   : > { %p7095_p13 = scmp.ne.s32.totalorder %s8255_s23, %s7094_s27  ;;  %s7203_s16 = smov [#allocation8]  }
 0x2a0   : > { %s7098_s6 = sshll.u32 %s7203_s16, 4  ;;  %s7099_s6 = int_to_ptr.vmem [resolvable:$false] %s7098_s6 }
 0x2a1   : > { %p7096_p4 = pnand %p7095_p13, %p8343_p1  ;;  %s7100_s4 = scalar_lea.vmem %s7099_s6, 4096 }
 0x2a2   : > { %p7101_p6 = scmp.lt.s32.totalorder %s8255_s23, %s7099_s6  ;;  %p7102_p7 = scmp.lt.s32.totalorder %s7100_s4, %s7094_s27 }
 0x2a3   : > { %p7097_p5 = pneg %p7096_p4 }
 0x2a4   : > { %p7103_p8 = por %p7102_p7, %p7101_p6 }
 0x2a6   : > { %p7104_p11 = pnand %p7103_p8, %p7097_p5 }
 0x2a8   : > { %7107 = shalt.err (!%p7104_p11)
}
 0x2a9   : > { %s7108_s22 = scalar_lea.hbm %s8252_s28, 2048  ;;  %s7112_s9 = scalar_lea.hbm %s8314_s3, 4096 }
 0x2aa   : > { %p7109_p12 = scmp.ne.s32.totalorder %s8252_s28, %s7108_s22  ;;  %p7113_p0 = scmp.lt.u32.totalorder %s8252_s28, %s8314_s3 }
 0x2ab   : > { %p7114_p2 = scmp.lt.u32.totalorder %s7112_s9, %s7108_s22  ;;  %p7116_p13 = scmp.lt.u32.totalorder %s7108_s22, %s8252_s28 }
 0x2ac   : > { %p7110_p3 = pnand %p7109_p12, %p8343_p1 }
 0x2ad   : > { %p7115_p10 = por %p7114_p2, %p7113_p0 }
 0x2ae   : > { %p7111_p9 = pneg %p7110_p3 }
 0x2af   : > { %p7117_p4 = por %p7116_p13, %p7115_p10 }
 0x2b1   : > { %p7118_p5 = pnand %p7117_p4, %p7111_p9 }
 0x2b3   : > { %7121 = shalt.err (!%p7118_p5)
}
 0x2b4   : > { %s7204_s11 = smov 64   ;;  %s7205_s20 = smov 4  }
 0x2b5   : > { %6869 = dma.vmem_to_hbm [thread:$0]  (%p8343_p1), %s8255_s23, 2048, %s8252_s28, %s8259_s18, %s7204_s11, %s7204_s11, %s7205_s20  }
 0x2b6 PF: > { %p6886_p6 = scmp.ge.s32.totalorder %s7196_s19, 2  ;;  %s5373_s21 = sand.u32 1, %s7168_s12  }
 0x2b7   : > { %p8344_p7 = scmp.ne.s32.totalorder %s8325_s26, 0  ;;  %s5374_s15 = scalar_lea.sflag [#allocation5], %s5373_s21 }
 0x2b9   : > { %p6879_p8 = pnand %p6886_p6, %p8344_p7 }
 0x2bb   : > { %7163 = dma.done.wait (!%p6879_p8), %s5374_s15, 2048  }
 0x2bc   : > { %7165 = vsyncadd (!%p6879_p8), %s5374_s15, 4294965248  ;;  %s18_s19 = sadd.s32 1, %s7196_s19   ;;  %s8345_s16 = sld [smem:[#allocation12_spill]] }
 0x2bd   : > { %p15_p11 = scmp.ge.s32.totalorder %s18_s19, 16   ;;  %s8346_s25 = sld [smem:[#allocation13_spill]] }
 0x2be   : > { %s8347_s18 = sld [smem:[#allocation14_spill]]  ;;  %s8348_s12 = smov %s7172_s13 }
 0x2bf   : > { %s8349_s13 = smov %s7176_s14  ;;  %s8350_s14 = smov %s7303_s30 }
 0x2c0   : > { %s8351_s15 = smov %s7188_s17  ;;  %17 = sbr.rel (!%p15_p11) target bundleno = 7 (0x7), region = 92 }
 0x2c3   : > { %s8352_s17 = smov %s8346_s25 }
 0x2c7   :  { %5379 = vsyncpa [#allocation4], 1 }
 0x2c8   :  { %5381 = vsyncpa [#allocation4 + $0x1], 1 }
 0x2c9   :  { %5382 = vsyncpa [#allocation7], 1 }
 0x2ca   :  { %5383 = vsyncpa [#allocation5], 1 }
 0x2cb   :  { %5385 = vsyncpa [#allocation5 + $0x1], 1 }

</bundles_post_ra>
